<compile_context>
chip_gen: v6e
topology: v6e:2x2x1
jax: 0.10.0
libtpu: 0.0.40
codegen_flags: <defaults>
</compile_context>

<pallas_src>
import functools
import math

import jax
import jax.numpy as jnp
from jax.experimental import pallas as pl
from jax.experimental.pallas import tpu as pltpu


def _pick_strip_rows(Ho, Wo, max_strip_elems=1024):
    """Pick the output-row strip height TH.

    TH must divide Ho and keep the flattened strip (TH*Wo) either a multiple of
    128 (lane-dense stores) or the full Ho*Wo (single strip).  Prefer the
    largest such TH with TH*Wo <= max_strip_elems so per-step VMEM stays small
    and the pipeline gets several steps per sample.
    """
    valid = [t for t in range(1, Ho + 1)
             if Ho % t == 0 and (t == Ho or (t * Wo) % 128 == 0)]
    fitting = [t for t in valid if t * Wo <= max_strip_elems]
    return max(fitting) if fitting else min(valid)


def _masked_conv_kernel(x_ref, w_ref, b_ref, o_ref, *scratch, kh, kw, stride,
                        dilation, TH, Wo, C_in, C_out, fold, num_strips):
    """One (sample, output-row-strip) tile of the convolution.

    x_ref  : (Hp, Wp, C_in)  bf16   zero-padded sample (VMEM-resident across strips)
    w_ref  : (Kp, Cp) bf16 if fold else (kh*kw, C_in, Cp) bf16   masked weights
    b_ref  : (1, Cp) f32            bias (zeros in the padded channels)
    o_ref  : (C_out, TH*Wo) f32     channel-major strip; spatial index on lanes
    scratch: [(TH*Wo, Kp) bf16]     im2col staging tile (fold path only)
    """
    M = TH * Wo

    if num_strips == 1:
        row0 = 0                                            # fully static slicing
    else:
        row0 = pl.multiple_of(pl.program_id(1) * (TH * stride), TH * stride)

    def tap_window(k):
        i, j = divmod(k, kw)
        h0 = row0 + i * dilation
        w0 = j * dilation
        if stride == 1:
            win = x_ref[pl.ds(h0, TH), w0:w0 + Wo, :]       # (TH, Wo, C_in)
        else:
            # TODO(synk): stride > 1 uses strided vector loads; for hot strided
            # convs compact rows/cols once per strip at the DMA level instead.
            win = x_ref[pl.ds(h0, TH, stride), pl.ds(w0, Wo, stride), :]
        return win.reshape(M, C_in)                         # MXU lhs slice (bf16)

    if fold:
        # Assemble the im2col tile for this strip in VMEM once, then hit it with
        # a single MXU matmul of depth kh*kw*C_in (instead of kh*kw K=C_in ones).
        lhs_ref = scratch[0]
        K = kh * kw * C_in
        Kp = lhs_ref.shape[1]
        if Kp > K:
            # Zero the alignment tail so (padded lhs lanes) x (zero weight rows)
            # contributes exactly 0 (never NaN from stale VMEM).
            lhs_ref[:, K:Kp] = jnp.zeros((M, Kp - K), jnp.bfloat16)
        for k in range(kh * kw):                            # static, unrolled
            lhs_ref[:, k * C_in:(k + 1) * C_in] = tap_window(k)
        acc = jnp.dot(lhs_ref[...], w_ref[...],
                      preferred_element_type=jnp.float32)   # (M, Cp) f32
    else:
        # Large C_in: per-tap matmuls with value-chained accumulation (no VMEM
        # RMW; partials ride the MXU result path / MRB instead of vld+add+vst).
        acc = jnp.dot(tap_window(0), w_ref[0], preferred_element_type=jnp.float32)
        for k in range(1, kh * kw):
            acc = acc + jnp.dot(tap_window(k), w_ref[k],
                                preferred_element_type=jnp.float32)

    acc = acc + b_ref[...]                                  # per-channel bias
    # Channel-major, lane-dense store: (M, Cp) -> (Cp, M), keep real channels.
    o_ref[...] = acc.T[:C_out, :].astype(o_ref.dtype)


def masked_conv2d(x, weight, bias=None, default_mask=None, *,
                  stride=1, padding=0, dilation=1, groups=1):
    """MaskedConv2d.forward: conv2d(x, weight * default_mask, bias, stride,
    padding, dilation).  x: [N, C_in, H, W] f32; weight: [C_out, C_in, kh, kw].
    Returns NCHW f32 (matches torch.nn.functional.conv2d with the masked weight).
    """
    if groups != 1:
        # TODO(synk): grouped convolution (groups > 1) not implemented in the Pallas path.
        raise NotImplementedError("groups != 1 is not supported")

    N, C_in, H, W = x.shape
    C_out, C_in_w, kh, kw = weight.shape
    assert C_in_w == C_in, (C_in_w, C_in)

    if default_mask is not None:                     # MaskedConv2d semantics
        weight = weight * default_mask

    Ho = (H + 2 * padding - dilation * (kh - 1) - 1) // stride + 1
    Wo = (W + 2 * padding - dilation * (kw - 1) - 1) // stride + 1
    Hp, Wp = H + 2 * padding, W + 2 * padding
    Cp = pl.cdiv(C_out, 128) * 128                   # lane-dense MXU N dimension
    TH = _pick_strip_rows(Ho, Wo)
    num_strips = Ho // TH
    M = TH * Wo
    K = kh * kw * C_in
    fold = K <= 512                                  # fold taps into the MXU K dim

    # Layout glue (single pass, no kh*kw HBM duplication): NCHW -> padded NHWC bf16.
    # TODO(synk): padding/cast is one extra HBM pass over x; could be folded into
    # the kernel with pl.when-guarded edge taps if input prep ever dominates.
    x_nhwc = jnp.pad(x.transpose(0, 2, 3, 1),
                     ((0, 0), (padding, padding), (padding, padding), (0, 0)))
    x_nhwc = x_nhwc.astype(jnp.bfloat16)

    # weight [C_out, C_in, kh, kw] -> taps [kh*kw, C_in, Cp] (zero-padded channels).
    w_taps = weight.transpose(2, 3, 1, 0).reshape(kh * kw, C_in, C_out)
    w_taps = jnp.pad(w_taps, ((0, 0), (0, 0), (0, Cp - C_out))).astype(jnp.bfloat16)

    if fold:
        Kp = pl.cdiv(K, 128) * 128                   # aligned contraction depth
        w_arg = jnp.pad(w_taps.reshape(K, Cp), ((0, Kp - K), (0, 0)))
        w_spec = pl.BlockSpec((Kp, Cp), lambda n, s: (0, 0))
        scratch_shapes = [pltpu.VMEM((M, Kp), jnp.bfloat16)]
        lhs_bytes = M * Kp * 2
    else:
        Kp = K
        w_arg = w_taps
        w_spec = pl.BlockSpec((kh * kw, C_in, Cp), lambda n, s: (0, 0, 0))
        scratch_shapes = []
        lhs_bytes = M * C_in * 2

    if bias is None:
        bias = jnp.zeros((C_out,), jnp.float32)
    b_pad = jnp.pad(bias.astype(jnp.float32), (0, Cp - C_out)).reshape(1, Cp)

    kernel = functools.partial(
        _masked_conv_kernel, kh=kh, kw=kw, stride=stride, dilation=dilation,
        TH=TH, Wo=Wo, C_in=C_in, C_out=C_out, fold=fold, num_strips=num_strips)

    # VMEM budget: double-buffered input sample + output strip, weights/bias,
    # staging tile and f32 intermediates, plus slack.  Capped at v7x's 64 MiB.
    vmem_bytes = (2 * (Hp * Wp * C_in * 2 + C_out * M * 4)
                  + 2 * (Kp * Cp * 2 + Cp * 4)
                  + lhs_bytes + 3 * M * Cp * 4 + (2 << 20))
    vmem_limit = int(min(64 << 20, max(vmem_bytes, 16 << 20)))

    out = pl.pallas_call(
        kernel,
        out_shape=jax.ShapeDtypeStruct((N, C_out, Ho * Wo), jnp.float32),
        grid=(N, num_strips),
        in_specs=[
            # Full padded sample; constant block index across the strip axis =>
            # one DMA per sample, VMEM-resident while its strips are processed.
            pl.BlockSpec((None, Hp, Wp, C_in), lambda n, s: (n, 0, 0, 0)),
            w_spec,
            pl.BlockSpec((1, Cp), lambda n, s: (0, 0)),
        ],
        out_specs=pl.BlockSpec((None, C_out, M), lambda n, s: (n, 0, s)),
        scratch_shapes=scratch_shapes,
        compiler_params=pltpu.CompilerParams(
            dimension_semantics=("parallel", "parallel"),
            vmem_limit_bytes=vmem_limit),
    )(x_nhwc, w_arg, b_pad)

    # (N, C_out, Ho*Wo) is already NCHW memory order: the final reshape is free.
    return out.reshape(N, C_out, Ho, Wo)


def _reference(x, weight, bias, mask, *, stride, padding, dilation=1, groups=1):
    """Plain-JAX reference matching torch.nn.functional.conv2d(x, weight*mask, bias, ...)."""
    w = weight if mask is None else weight * mask
    y = jax.lax.conv_general_dilated(
        x, w, window_strides=(stride, stride),
        padding=[(padding, padding), (padding, padding)],
        rhs_dilation=(dilation, dilation),
        feature_group_count=groups,
        dimension_numbers=("NCHW", "OIHW", "NCHW"))
    if bias is not None:
        y = y + bias.reshape(1, -1, 1, 1)
    return y


if __name__ == "__main__":
    root = jax.random.PRNGKey(0)

    def run_case(key, *, N, C_in, H, W, C_out, ksize, stride, padding, dilation,
                 use_mask):
        kx, kw_, kb, km = jax.random.split(key, 4)
        x = jax.random.normal(kx, (N, C_in, H, W), jnp.float32)
        # kaiming_uniform_(a=sqrt(5)) == U(-1/sqrt(fan_in), 1/sqrt(fan_in))
        fan_in = C_in * ksize * ksize
        bound = 1.0 / math.sqrt(fan_in)
        weight = jax.random.uniform(kw_, (C_out, C_in, ksize, ksize), jnp.float32,
                                    minval=-bound, maxval=bound)
        bias = jax.random.uniform(kb, (C_out,), jnp.float32,
                                  minval=-bound, maxval=bound)
        mask = ((jax.random.uniform(km, weight.shape) > 0.3).astype(jnp.float32)
                if use_mask else None)

        out = masked_conv2d(x, weight, bias, mask, stride=stride,
                            padding=padding, dilation=dilation)
        out = jax.block_until_ready(out)
        ref = _reference(x, weight, bias, mask, stride=stride,
                         padding=padding, dilation=dilation)
        assert out.shape == ref.shape, (out.shape, ref.shape)
        err = float(jnp.max(jnp.abs(out - ref)))
        tol = 3e-2 * max(1.0, float(jnp.max(jnp.abs(ref))))   # bf16 MXU operands
        assert err < tol, f"max abs error too large: {err} (tol {tol})"
        return err

    k1, k2, k3, k4 = jax.random.split(root, 4)

    # Masked and unmasked (default_mask == []) paths, folded taps, single strip.
    run_case(k1, N=2, C_in=4, H=16, W=16, C_out=8, ksize=3, stride=1, padding=1,
             dilation=1, use_mask=True)
    run_case(k1, N=2, C_in=4, H=16, W=16, C_out=8, ksize=3, stride=1, padding=1,
             dilation=1, use_mask=False)
    # Multi-strip path (Ho=48 -> 3 row strips of 16, exercises the strip axis).
    run_case(k2, N=1, C_in=8, H=48, W=48, C_out=16, ksize=3, stride=1, padding=1,
             dilation=1, use_mask=True)
    # Dilated conv.
    run_case(k3, N=2, C_in=4, H=16, W=16, C_out=8, ksize=3, stride=1, padding=2,
             dilation=2, use_mask=True)
    # Large C_in -> per-tap value-chained accumulation path (no tap folding).
    run_case(k4, N=1, C_in=64, H=16, W=16, C_out=8, ksize=3, stride=1, padding=1,
             dilation=1, use_mask=True)

    print("KERNEL_OK")
</pallas_src>

<mosaic_0001>
module attributes {stable_mosaic.version = 11 : i64} {
  func.func @_masked_conv_kernel(%arg0: i32, %arg1: i32, %arg2: memref<1x18x18x4xbf16, #tpu.memory_space<vmem>>, %arg3: memref<128x128xbf16, #tpu.memory_space<vmem>>, %arg4: memref<1x128xf32, #tpu.memory_space<vmem>>, %arg5: memref<1x8x256xf32, #tpu.memory_space<vmem>>, %arg6: memref<256x128xbf16, #tpu.memory_space<vmem>>) attributes {dimension_semantics = [#tpu.dimension_semantics<parallel>, #tpu.dimension_semantics<parallel>], iteration_bounds = array<i64: 2, 1>, scalar_prefetch = 0 : i64, scratch_operands = 1 : i64, tpu.core_type = #tpu.core_type<tc>, window_params = [{transform_indices = @transform_0, window_bounds = array<i64: 1, 18, 18, 4>}, {pipeline_mode = #tpu.pipeline_mode<synchronous>, transform_indices = @transform_1, window_bounds = array<i64: 128, 128>}, {pipeline_mode = #tpu.pipeline_mode<synchronous>, transform_indices = @transform_2, window_bounds = array<i64: 1, 128>}, {transform_indices = @transform_3, window_bounds = array<i64: 1, 8, 256>}]} {
    %cst = arith.constant 0.000000e+00 : bf16
    %0 = vector.broadcast %cst : bf16 to vector<256x92xbf16>
    %c0 = arith.constant 0 : index
    %c36 = arith.constant 36 : index
    %1 = vector.load %arg6[%c0, %c36] : memref<256x128xbf16, #tpu.memory_space<vmem>>, vector<256x92xbf16>
    tpu.vector_store %arg6[%c0, %c36], %0 {strides = array<i32>} : memref<256x128xbf16, #tpu.memory_space<vmem>>, vector<256x92xbf16>,
    %c0_0 = arith.constant 0 : index
    %c0_1 = arith.constant 0 : index
    %c0_2 = arith.constant 0 : index
    %c0_3 = arith.constant 0 : index
    %2 = vector.load %arg2[%c0_0, %c0_1, %c0_2, %c0_3] : memref<1x18x18x4xbf16, #tpu.memory_space<vmem>>, vector<1x16x16x4xbf16>
    %3 = vector.shape_cast %2 : vector<1x16x16x4xbf16> to vector<16x16x4xbf16>
    %4 = vector.shape_cast %3 : vector<16x16x4xbf16> to vector<256x4xbf16>
    %c0_4 = arith.constant 0 : index
    %c0_5 = arith.constant 0 : index
    %5 = vector.load %arg6[%c0_4, %c0_5] : memref<256x128xbf16, #tpu.memory_space<vmem>>, vector<256x4xbf16>
    tpu.vector_store %arg6[%c0_4, %c0_5], %4 {strides = array<i32>} : memref<256x128xbf16, #tpu.memory_space<vmem>>, vector<256x4xbf16>,
    %c0_6 = arith.constant 0 : index
    %c0_7 = arith.constant 0 : index
    %c1 = arith.constant 1 : index
    %c0_8 = arith.constant 0 : index
    %6 = vector.load %arg2[%c0_6, %c0_7, %c1, %c0_8] : memref<1x18x18x4xbf16, #tpu.memory_space<vmem>>, vector<1x16x16x4xbf16>
    %7 = vector.shape_cast %6 : vector<1x16x16x4xbf16> to vector<16x16x4xbf16>
    %8 = vector.shape_cast %7 : vector<16x16x4xbf16> to vector<256x4xbf16>
    %c0_9 = arith.constant 0 : index
    %c4 = arith.constant 4 : index
    %9 = vector.load %arg6[%c0_9, %c4] : memref<256x128xbf16, #tpu.memory_space<vmem>>, vector<256x4xbf16>
    tpu.vector_store %arg6[%c0_9, %c4], %8 {strides = array<i32>} : memref<256x128xbf16, #tpu.memory_space<vmem>>, vector<256x4xbf16>,
    %c0_10 = arith.constant 0 : index
    %c0_11 = arith.constant 0 : index
    %c2 = arith.constant 2 : index
    %c0_12 = arith.constant 0 : index
    %10 = vector.load %arg2[%c0_10, %c0_11, %c2, %c0_12] : memref<1x18x18x4xbf16, #tpu.memory_space<vmem>>, vector<1x16x16x4xbf16>
    %11 = vector.shape_cast %10 : vector<1x16x16x4xbf16> to vector<16x16x4xbf16>
    %12 = vector.shape_cast %11 : vector<16x16x4xbf16> to vector<256x4xbf16>
    %c0_13 = arith.constant 0 : index
    %c8 = arith.constant 8 : index
    %13 = vector.load %arg6[%c0_13, %c8] : memref<256x128xbf16, #tpu.memory_space<vmem>>, vector<256x4xbf16>
    tpu.vector_store %arg6[%c0_13, %c8], %12 {strides = array<i32>} : memref<256x128xbf16, #tpu.memory_space<vmem>>, vector<256x4xbf16>,
    %c0_14 = arith.constant 0 : index
    %c1_15 = arith.constant 1 : index
    %c0_16 = arith.constant 0 : index
    %c0_17 = arith.constant 0 : index
    %14 = vector.load %arg2[%c0_14, %c1_15, %c0_16, %c0_17] : memref<1x18x18x4xbf16, #tpu.memory_space<vmem>>, vector<1x16x16x4xbf16>
    %15 = vector.shape_cast %14 : vector<1x16x16x4xbf16> to vector<16x16x4xbf16>
    %16 = vector.shape_cast %15 : vector<16x16x4xbf16> to vector<256x4xbf16>
    %c0_18 = arith.constant 0 : index
    %c12 = arith.constant 12 : index
    %17 = vector.load %arg6[%c0_18, %c12] : memref<256x128xbf16, #tpu.memory_space<vmem>>, vector<256x4xbf16>
    tpu.vector_store %arg6[%c0_18, %c12], %16 {strides = array<i32>} : memref<256x128xbf16, #tpu.memory_space<vmem>>, vector<256x4xbf16>,
    %c0_19 = arith.constant 0 : index
    %c1_20 = arith.constant 1 : index
    %c1_21 = arith.constant 1 : index
    %c0_22 = arith.constant 0 : index
    %18 = vector.load %arg2[%c0_19, %c1_20, %c1_21, %c0_22] : memref<1x18x18x4xbf16, #tpu.memory_space<vmem>>, vector<1x16x16x4xbf16>
    %19 = vector.shape_cast %18 : vector<1x16x16x4xbf16> to vector<16x16x4xbf16>
    %20 = vector.shape_cast %19 : vector<16x16x4xbf16> to vector<256x4xbf16>
    %c0_23 = arith.constant 0 : index
    %c16 = arith.constant 16 : index
    %21 = vector.load %arg6[%c0_23, %c16] : memref<256x128xbf16, #tpu.memory_space<vmem>>, vector<256x4xbf16>
    tpu.vector_store %arg6[%c0_23, %c16], %20 {strides = array<i32>} : memref<256x128xbf16, #tpu.memory_space<vmem>>, vector<256x4xbf16>,
    %c0_24 = arith.constant 0 : index
    %c1_25 = arith.constant 1 : index
    %c2_26 = arith.constant 2 : index
    %c0_27 = arith.constant 0 : index
    %22 = vector.load %arg2[%c0_24, %c1_25, %c2_26, %c0_27] : memref<1x18x18x4xbf16, #tpu.memory_space<vmem>>, vector<1x16x16x4xbf16>
    %23 = vector.shape_cast %22 : vector<1x16x16x4xbf16> to vector<16x16x4xbf16>
    %24 = vector.shape_cast %23 : vector<16x16x4xbf16> to vector<256x4xbf16>
    %c0_28 = arith.constant 0 : index
    %c20 = arith.constant 20 : index
    %25 = vector.load %arg6[%c0_28, %c20] : memref<256x128xbf16, #tpu.memory_space<vmem>>, vector<256x4xbf16>
    tpu.vector_store %arg6[%c0_28, %c20], %24 {strides = array<i32>} : memref<256x128xbf16, #tpu.memory_space<vmem>>, vector<256x4xbf16>,
    %c0_29 = arith.constant 0 : index
    %c2_30 = arith.constant 2 : index
    %c0_31 = arith.constant 0 : index
    %c0_32 = arith.constant 0 : index
    %26 = vector.load %arg2[%c0_29, %c2_30, %c0_31, %c0_32] : memref<1x18x18x4xbf16, #tpu.memory_space<vmem>>, vector<1x16x16x4xbf16>
    %27 = vector.shape_cast %26 : vector<1x16x16x4xbf16> to vector<16x16x4xbf16>
    %28 = vector.shape_cast %27 : vector<16x16x4xbf16> to vector<256x4xbf16>
    %c0_33 = arith.constant 0 : index
    %c24 = arith.constant 24 : index
    %29 = vector.load %arg6[%c0_33, %c24] : memref<256x128xbf16, #tpu.memory_space<vmem>>, vector<256x4xbf16>
    tpu.vector_store %arg6[%c0_33, %c24], %28 {strides = array<i32>} : memref<256x128xbf16, #tpu.memory_space<vmem>>, vector<256x4xbf16>,
    %c0_34 = arith.constant 0 : index
    %c2_35 = arith.constant 2 : index
    %c1_36 = arith.constant 1 : index
    %c0_37 = arith.constant 0 : index
    %30 = vector.load %arg2[%c0_34, %c2_35, %c1_36, %c0_37] : memref<1x18x18x4xbf16, #tpu.memory_space<vmem>>, vector<1x16x16x4xbf16>
    %31 = vector.shape_cast %30 : vector<1x16x16x4xbf16> to vector<16x16x4xbf16>
    %32 = vector.shape_cast %31 : vector<16x16x4xbf16> to vector<256x4xbf16>
    %c0_38 = arith.constant 0 : index
    %c28 = arith.constant 28 : index
    %33 = vector.load %arg6[%c0_38, %c28] : memref<256x128xbf16, #tpu.memory_space<vmem>>, vector<256x4xbf16>
    tpu.vector_store %arg6[%c0_38, %c28], %32 {strides = array<i32>} : memref<256x128xbf16, #tpu.memory_space<vmem>>, vector<256x4xbf16>,
    %c0_39 = arith.constant 0 : index
    %c2_40 = arith.constant 2 : index
    %c2_41 = arith.constant 2 : index
    %c0_42 = arith.constant 0 : index
    %34 = vector.load %arg2[%c0_39, %c2_40, %c2_41, %c0_42] : memref<1x18x18x4xbf16, #tpu.memory_space<vmem>>, vector<1x16x16x4xbf16>
    %35 = vector.shape_cast %34 : vector<1x16x16x4xbf16> to vector<16x16x4xbf16>
    %36 = vector.shape_cast %35 : vector<16x16x4xbf16> to vector<256x4xbf16>
    %c0_43 = arith.constant 0 : index
    %c32 = arith.constant 32 : index
    %37 = vector.load %arg6[%c0_43, %c32] : memref<256x128xbf16, #tpu.memory_space<vmem>>, vector<256x4xbf16>
    tpu.vector_store %arg6[%c0_43, %c32], %36 {strides = array<i32>} : memref<256x128xbf16, #tpu.memory_space<vmem>>, vector<256x4xbf16>,
    %c0_44 = arith.constant 0 : index
    %c0_45 = arith.constant 0 : index
    %38 = vector.load %arg6[%c0_44, %c0_45] : memref<256x128xbf16, #tpu.memory_space<vmem>>, vector<256x128xbf16>
    %c0_46 = arith.constant 0 : index
    %c0_47 = arith.constant 0 : index
    %39 = vector.load %arg3[%c0_46, %c0_47] : memref<128x128xbf16, #tpu.memory_space<vmem>>, vector<128x128xbf16>
    %cst_48 = arith.constant dense<0.000000e+00> : vector<256x128xf32>
    %40 = tpu.matmul %38, %39, %cst_48 {dimension_numbers = #tpu.dot_dimension_numbers<[1], [0], [0], [1], [0, 0, 1, 1], [], []>} : vector<256x128xbf16>, vector<128x128xbf16>, vector<256x128xf32> -> vector<256x128xf32>
    %c0_49 = arith.constant 0 : index
    %c0_50 = arith.constant 0 : index
    %41 = vector.load %arg4[%c0_49, %c0_50] : memref<1x128xf32, #tpu.memory_space<vmem>>, vector<1x128xf32>
    %42 = vector.broadcast %41 : vector<1x128xf32> to vector<256x128xf32>
    %43 = arith.addf %40, %42 : vector<256x128xf32>
    %44 = tpu.transpose %43, [1, 0] : vector<256x128xf32> -> vector<128x256xf32>
    %45 = vector.extract_strided_slice %44 {offsets = [0, 0], sizes = [8, 256], strides = [1, 1]} : vector<128x256xf32> to vector<8x256xf32>
    %c0_51 = arith.constant 0 : index
    %c0_52 = arith.constant 0 : index
    %c0_53 = arith.constant 0 : index
    %46 = vector.load %arg5[%c0_51, %c0_52, %c0_53] : memref<1x8x256xf32, #tpu.memory_space<vmem>>, vector<1x8x256xf32>
    %47 = vector.shape_cast %46 : vector<1x8x256xf32> to vector<8x256xf32>
    %48 = vector.shape_cast %45 : vector<8x256xf32> to vector<1x8x256xf32>
    tpu.vector_store %arg5[%c0_51, %c0_52, %c0_53], %48 {strides = array<i32>} : memref<1x8x256xf32, #tpu.memory_space<vmem>>, vector<1x8x256xf32>,
    return
  }
  func.func @transform_0(%arg0: i32, %arg1: i32) -> (i32, i32, i32, i32) {
    %c0_i32 = arith.constant 0 : i32
    %c0_i32_0 = arith.constant 0 : i32
    %c0_i32_1 = arith.constant 0 : i32
    %c0_i32_2 = arith.constant 0 : i32
    return %arg0, %c0_i32, %c0_i32_0, %c0_i32_1 : i32, i32, i32, i32
  }
  func.func @transform_1(%arg0: i32, %arg1: i32) -> (i32, i32) {
    %c0_i32 = arith.constant 0 : i32
    %c0_i32_0 = arith.constant 0 : i32
    %c0_i32_1 = arith.constant 0 : i32
    return %c0_i32, %c0_i32_0 : i32, i32
  }
  func.func @transform_2(%arg0: i32, %arg1: i32) -> (i32, i32) {
    %c0_i32 = arith.constant 0 : i32
    %c0_i32_0 = arith.constant 0 : i32
    %c0_i32_1 = arith.constant 0 : i32
    return %c0_i32, %c0_i32_0 : i32, i32
  }
  func.func @transform_3(%arg0: i32, %arg1: i32) -> (i32, i32, i32) {
    %c0_i32 = arith.constant 0 : i32
    %c0_i32_0 = arith.constant 0 : i32
    return %arg0, %c0_i32, %arg1 : i32, i32, i32
  }
}

</mosaic_0001>

<bundles_post_ra>
// kernel: tpu_custom_call.1
= control target key start
LH: loop header
LB: loop body
LE: loop exit
PB: predicated region body
PF: predicated region fallthrough
CT: control target
= control target key end

     0   :  { %8 = vsyncpa [#allocation4], 0  ;;  %s6143_s0 = inlined_call_operand.vmem [shape: bf16[2,18,18,4], index: 0, kind: input, shape index: {}]   ;;  %s6144_s1 = inlined_call_operand.vmem [shape: bf16[128,128], index: 1, kind: input, shape index: {}]   ;;  %s6145_s2 = inlined_call_operand.vmem [shape: f32[1,128], index: 2, kind: input, shape index: {}]   ;;  %s6146_s3 = inlined_call_operand.hbm [shape: f32[2,8,256], index: 3, kind: output, shape index: {}]  }
   0x1   :  { %10 = vsyncpa [#allocation4 + $0x1], 0  ;;  %s4512_s12 = smov 0   ;;  %s4514_s13 = smov 0  }
   0x2   :  { %s4516_s14 = smov 0   ;;  %s4518_s15 = smov 0  }
   0x3   :  { %s4520_s16 = smov 0   ;;  %s4522_s17 = smov 0  }
   0x4 LB: > { %s3884_s18 = sadd.s32 4294967295, %s4480_s17   ;;  %s3885_s19 = sadd.s32 4294967294, %s4480_s17   ;;  %s4480_s17 = sphi %s4522_s17, %s16_s17   ;;  %s4476_s16 = sphi %s4520_s16, %s6157_s16   ;;  %s4472_s15 = sphi %s4518_s15, %s6156_s15   ;;  %s4468_s14 = sphi %s4516_s14, %s6155_s14   ;;  %s4464_s13 = sphi %s4514_s13, %s6154_s13   ;;  %s4460_s12 = sphi %s4512_s12, %s6153_s12  }
   0x5   : > { %s28_s20 = sadd.s32 1, %s4476_s16  ;;  %s105_s21 = sadd.s32 1, %s4468_s14 }
   0x6   : > { %p30_p0 = scmp.ge.s32.totalorder %s28_s20, 2  ;;  %p115_p1 = scmp.ne.s32.totalorder %s4468_s14, %s4464_s13 }
   0x7   : > { %p116_p2 = scmp.eq.s32.totalorder %s3884_s18, 1  ;;  %p121_p3 = scmp.ne.s32.totalorder %s4464_s13, %s4460_s12 }
   0x8   : > { %s6159_s20 = smov (%p30_p0, %s28_s20), 0  ;;  %p122_p5 = scmp.eq.s32.totalorder %s3885_s19, 1 }
   0x9   : > { %p4552_p4 = por %p116_p2, %p115_p1  ;;  %s100_s23 = ssub.s32 %s4476_s16, %s6159_s20 }
   0xa   : > { %p3888_p6 = scmp.ge.s32.totalorder %s4480_s17, 1  ;;  %p103_p7 = scmp.eq.s32.totalorder %s100_s23, 0 }
   0xb   : > { %p4559_p8 = por %p122_p5, %p121_p3  ;;  %p154_p9 = scmp.lt.s32.totalorder %s4480_s17, 3 }
   0xc   : > { %s4565_s25 = scalar_select %p103_p7, %s4468_s14, %s105_s21  }
   0xd   : > { %p155_p10 = pnand %p3888_p6, %p154_p9 }
   0xe   : > { %p178_p11 = scmp.lt.s32.totalorder (!%p155_p10), %s4472_s15, 1  ;;  %s4483_s4 = smov (!%p155_p10), 4  }
   0xf   : > { %158 = sbr.rel (%p155_p10) target bundleno = 962 (0x3c2), region = 32  ;;  %s4484_s5 = smov (!%p155_p10), 8  }
  0x10   : > { %s4485_s6 = smov (!%p155_p10), 12   ;;  %s4486_s7 = smov (!%p155_p10), 16  }
  0x11   : > { %s4487_s8 = smov (!%p155_p10), 20   ;;  %s4488_s9 = smov (!%p155_p10), 24  }
  0x12   : > { %s4490_s18 = smov (!%p155_p10), 32   ;;  %s4491_s10 = smov (!%p155_p10), [#allocation3]  }
  0x14   : > { %s4569_s26 = scalar_select %p178_p11, %s4472_s15, 1  ;;  %vm331_vm0 = vsmask.f32 3328  ;;  %vm332_vm1 = vsmask.f32 7440  ;;  %vm185_vm2 = vcmask 1043744  }
  0x15   : > { %v4482_v0 = vmov 0   ;;  %vm4618_vm3 = vmor %vm331_vm0, %vm332_vm1  ;;  %vm250_vm4 = vcmask 27648   ;;  %vm943_vm5 = vcmask 1042432   ;;  %vm944_vm6 = vcmask 1046532  }
  0x16   : > { %188 = vst.msk [vmem:[#allocation2 + $0x8] sm:$0xf] %vm185_vm2, %v4482_v0  ;;  %186 = vst.msk [vmem:[#allocation2] sm:$0xf] %vm185_vm2, %v4482_v0  ;;  %s4314_s27 = smul.u32 216, %s4569_s26  ;;  %vm814_vm8 = vcmask 60448  }
  0x17   : > { %187 = vst.msk [vmem:[#allocation2 + $0x4] sm:$0xf] %vm185_vm2, %v4482_v0  ;;  %189 = vst.msk [vmem:[#allocation2 + $0xc] sm:$0xf] %vm185_vm2, %v4482_v0  ;;  %vm1154_vm9 = vcmask 93248   ;;  %vm1348_vm10 = vcmask 126048  }
  0x18   : > { %190 = vst.msk [vmem:[#allocation2 + $0x10] sm:$0xf] %vm185_vm2, %v4482_v0  ;;  %191 = vst.msk [vmem:[#allocation2 + $0x14] sm:$0xf] %vm185_vm2, %v4482_v0  ;;  %s4607_s30 = scalar_lea.vmem %s6143_s0, %s4314_s27  ;;  %s4489_s26 = smov 28   ;;  %vm1909_vm11 = vcmask 158848  }
  0x19   : > { %192 = vst.msk [vmem:[#allocation2 + $0x18] sm:$0xf] %vm185_vm2, %v4482_v0  ;;  %193 = vst.msk [vmem:[#allocation2 + $0x1c] sm:$0xf] %vm185_vm2, %v4482_v0  ;;  %v286_v1 = vld [vmem:[%s4607_s30 + $0xc] sm:$0xf] }
  0x1a   : > { %194 = vst.msk [vmem:[#allocation2 + $0x20] sm:$0xf] %vm185_vm2, %v4482_v0  ;;  %195 = vst.msk [vmem:[#allocation2 + $0x24] sm:$0xf] %vm185_vm2, %v4482_v0  ;;  %v287_v2 = vld [vmem:[%s4607_s30 + $0x10] sm:$0xf] }
  0x1b   : > { %196 = vst.msk [vmem:[#allocation2 + $0x28] sm:$0xf] %vm185_vm2, %v4482_v0  ;;  %197 = vst.msk [vmem:[#allocation2 + $0x2c] sm:$0xf] %vm185_vm2, %v4482_v0  ;;  %v283_v3 = vld [vmem:[%s4607_s30] sm:$0xf] }
  0x1c   : > { %198 = vst.msk [vmem:[#allocation2 + $0x30] sm:$0xf] %vm185_vm2, %v4482_v0  ;;  %199 = vst.msk [vmem:[#allocation2 + $0x34] sm:$0xf] %vm185_vm2, %v4482_v0  ;;  %v359_v4 = vshrl.u32 %v286_v1, 16  ;;  %v362_v5 = vshll.u32 %v286_v1, 16 }
  0x1d   : > { %200 = vst.msk [vmem:[#allocation2 + $0x38] sm:$0xf] %vm185_vm2, %v4482_v0  ;;  %201 = vst.msk [vmem:[#allocation2 + $0x3c] sm:$0xf] %vm185_vm2, %v4482_v0  ;;  %v368_v6 = vshll.u32 %v287_v2, 16  ;;  %v372_v7 = vshrl.u32 %v287_v2, 16 }
  0x1e   : > { %202 = vst.msk [vmem:[#allocation2 + $0x40] sm:$0xf] %vm185_vm2, %v4482_v0  ;;  %203 = vst.msk [vmem:[#allocation2 + $0x44] sm:$0xf] %vm185_vm2, %v4482_v0  ;;  %v284_v8 = vld [vmem:[%s4607_s30 + $0x4] sm:$0xf] }
  0x1f   : > { %204 = vst.msk [vmem:[#allocation2 + $0x48] sm:$0xf] %vm185_vm2, %v4482_v0  ;;  %205 = vst.msk [vmem:[#allocation2 + $0x4c] sm:$0xf] %vm185_vm2, %v4482_v0  ;;  %v335_v9 = vshrl.u32 %v283_v3, 16  ;;  %v338_v10 = vshll.u32 %v283_v3, 16 }
  0x20   : > { %206 = vst.msk [vmem:[#allocation2 + $0x50] sm:$0xf] %vm185_vm2, %v4482_v0  ;;  %207 = vst.msk [vmem:[#allocation2 + $0x54] sm:$0xf] %vm185_vm2, %v4482_v0  ;;  %v344_v11 = vshll.u32 %v284_v8, 16  ;;  %v348_v12 = vshrl.u32 %v284_v8, 16 }
  0x21   : > { %208 = vst.msk [vmem:[#allocation2 + $0x58] sm:$0xf] %vm185_vm2, %v4482_v0  ;;  %209 = vst.msk [vmem:[#allocation2 + $0x5c] sm:$0xf] %vm185_vm2, %v4482_v0  ;;  %v288_v13 = vld [vmem:[%s4607_s30 + $0x14] sm:$0x1] }
  0x22   : > { %210 = vst.msk [vmem:[#allocation2 + $0x60] sm:$0xf] %vm185_vm2, %v4482_v0  ;;  %211 = vst.msk [vmem:[#allocation2 + $0x64] sm:$0xf] %vm185_vm2, %v4482_v0  ;;  %v361_v14 = vrot.slane %v359_v4, 4  ;;  %v364_v15 = vrot.slane %v362_v5, 5 }
  0x23   : > { %212 = vst.msk [vmem:[#allocation2 + $0x68] sm:$0xf] %vm185_vm2, %v4482_v0  ;;  %213 = vst.msk [vmem:[#allocation2 + $0x6c] sm:$0xf] %vm185_vm2, %v4482_v0  ;;  %v370_v16 = vrot.slane %v368_v6, 5  ;;  %v374_v17 = vrot.slane %v372_v7, 4 }
  0x24   : > { %214 = vst.msk [vmem:[#allocation2 + $0x70] sm:$0xf] %vm185_vm2, %v4482_v0  ;;  %215 = vst.msk [vmem:[#allocation2 + $0x74] sm:$0xf] %vm185_vm2, %v4482_v0  ;;  %v285_v18 = vld [vmem:[%s4607_s30 + $0x8] sm:$0x1]  ;;  %v365_v24 = vor.u32 %v364_v15, %v361_v14 }
  0x25   : > { %216 = vst.msk [vmem:[#allocation2 + $0x78] sm:$0xf] %vm185_vm2, %v4482_v0  ;;  %217 = vst.msk [vmem:[#allocation2 + $0x7c] sm:$0xf] %vm185_vm2, %v4482_v0  ;;  %v337_v19 = vrot.slane %v335_v9, 4  ;;  %v340_v20 = vrot.slane %v338_v10, 5  ;;  %v375_v25 = vor.u32 %v374_v17, %v370_v16 }
  0x26   : > { %v346_v21 = vrot.slane %v344_v11, 5  ;;  %v350_v22 = vrot.slane %v348_v12, 4  ;;  %v290_v23 = vld [vmem:[%s4607_s30 + $0x1c] sm:$0xf]  ;;  %v378_v26 = vshll.u32 %v288_v13, 16  ;;  %v354_v27 = vshll.u32 %v285_v18, 16  ;;  %vm4762_vm7 = vmor %vm943_vm5, %vm944_vm6 }
  0x27   : > { %v341_v29 = vor.u32 %v340_v20, %v337_v19  ;;  %v291_v31 = vld [vmem:[%s4607_s30 + $0x20] sm:$0x1]  ;;  %v392_v32 = vshll.u32 %v290_v23, 16  ;;  %v396_v33 = vshrl.u32 %v290_v23, 16  ;;  %v289_v34 = vld [vmem:[%s4607_s30 + $0x18] sm:$0xf] }
  0x28   : > { %v351_v30 = vor.u32 %v350_v22, %v346_v21  ;;  %v366_v35 = vrot.slane %v365_v24, 4  ;;  %v376_v36 = vrot.slane %v375_v25, 4  ;;  %v380_v37 = vrot.slane %v378_v26, 5  ;;  %v293_v43 = vld [vmem:[%s4607_s30 + $0x28] sm:$0xf]  ;;  %s4225_s27 = sshll.u32 %s4472_s15, 8 }
  0x29   : > { %v356_v38 = vrot.slane %v354_v27, 5  ;;  %v342_v39 = vrot.slane %v341_v29, 4  ;;  %v394_v41 = vrot.slane %v392_v32, 5  ;;  %v398_v42 = vrot.slane %v396_v33, 4  ;;  %v294_v48 = vld [vmem:[%s4607_s30 + $0x2c] sm:$0x1] }
  0x2a   : > { %v352_v40 = vrot.slane %v351_v30, 4  ;;  %v371_v44 = vsel %vm4618_vm3, %v366_v35, %v370_v16  ;;  %v381_v45 = vsel %vm4618_vm3, %v376_v36, %v380_v37  ;;  %v402_v46 = vshll.u32 %v291_v31, 16  ;;  %v292_v49 = vld [vmem:[%s4607_s30 + $0x24] sm:$0xf]  ;;  %v296_v54 = vld [vmem:[%s4607_s30 + $0x34] sm:$0xf] }
  0x2b   : > { %v383_v47 = vshrl.u32 %v289_v34, 16  ;;  %722 = vrot.lane.b32.xlu1 %v371_v44, %s4483_s4  ;;  %v347_v50 = vsel %vm4618_vm3, %v342_v39, %v346_v21  ;;  %v399_v52 = vor.u32 %v398_v42, %v394_v41  ;;  %v386_v53 = vshll.u32 %v289_v34, 16  ;;  %v297_v63 = vld [vmem:[%s4607_s30 + $0x38] sm:$0x1]  ;;  %v295_v4 = vld [vmem:[%s4607_s30 + $0x30] sm:$0xf] }
  0x2c   : > { %v357_v51 = vsel %vm4618_vm3, %v352_v40, %v356_v38  ;;  %718 = vrot.lane.b32.xlu0 %v347_v50, %s4483_s4  ;;  %v404_v55 = vrot.slane %v402_v46, 5  ;;  %v416_v57 = vshll.u32 %v293_v43, 16  ;;  %v420_v58 = vshrl.u32 %v293_v43, 16  ;;  %v299_v9 = vld [vmem:[%s4607_s30 + $0x40] sm:$0xf]  ;;  %s4408_s15 = sshll.u32 %s4491_s10, 4  ;;  %s4409_s15 = int_to_ptr.vmem [resolvable:$false] %s4408_s15 }
  0x2d   : > { %v385_v56 = vrot.slane %v383_v47, 4  ;;  %v400_v59 = vrot.slane %v399_v52, 4  ;;  %v388_v60 = vrot.slane %v386_v53, 5  ;;  %v426_v61 = vshll.u32 %v294_v48, 16  ;;  %v300_v18 = vld [vmem:[%s4607_s30 + $0x44] sm:$0x1] }
  0x2e   : > { %v407_v62 = vshrl.u32 %v292_v49, 16  ;;  %v418_v0 = vrot.slane %v416_v57, 5  ;;  %v422_v1 = vrot.slane %v420_v58, 4  ;;  %v410_v2 = vshll.u32 %v292_v49, 16  ;;  %v298_v23 = vld [vmem:[%s4607_s30 + $0x3c] sm:$0xf] }
  0x2f   : > { %v440_v3 = vshll.u32 %v296_v54, 16  ;;  %724 = vrot.lane.b32.xlu1 %v381_v45, %s4483_s4  ;;  %v405_v5 = vsel %vm4618_vm3, %v400_v59, %v404_v55  ;;  %v389_v6 = vor.u32 %v388_v60, %v385_v56  ;;  %v428_v7 = vrot.slane %v426_v61, 5  ;;  %v302_v29 = vld [vmem:[%s4607_s30 + $0x4c] sm:$0xf]  ;;  %v303_v38 = vld [vmem:[%s4607_s30 + $0x50] sm:$0x1] }
  0x30   : > { %v409_v8 = vrot.slane %v407_v62, 4  ;;  %720 = vrot.lane.b32.xlu0 %v357_v51, %s4483_s4  ;;  %v423_v10 = vor.u32 %v422_v1, %v418_v0  ;;  %v412_v11 = vrot.slane %v410_v2, 5  ;;  %v444_v13 = vshrl.u32 %v296_v54, 16  ;;  %v301_v43 = vld [vmem:[%s4607_s30 + $0x48] sm:$0xf]  ;;  %s4410_s11 = scalar_lea.vmem %s4409_s15, 512 }
  0x31   : > { %v442_v12 = vrot.slane %v440_v3, 5  ;;  %v390_v14 = vrot.slane %v389_v6, 4  ;;  %v450_v15 = vshll.u32 %v297_v63, 16  ;;  %v431_v16 = vshrl.u32 %v295_v4, 16  ;;  %v305_v48 = vld [vmem:[%s4607_s30 + $0x58] sm:$0xf] }
  0x32   : > { %v434_v17 = vshll.u32 %v295_v4, 16  ;;  %v424_v19 = vrot.slane %v423_v10, 4  ;;  %v413_v20 = vor.u32 %v412_v11, %v409_v8  ;;  %v446_v21 = vrot.slane %v444_v13, 4  ;;  %v306_v57 = vld [vmem:[%s4607_s30 + $0x5c] sm:$0x1] }
  0x33   : > { %v464_v22 = vshll.u32 %v299_v9, 16  ;;  %728 = vrot.lane.b32.xlu1 %v405_v5, %s4483_s4  ;;  %v395_v24 = vsel %vm4618_vm3, %v390_v14, %v394_v41  ;;  %v452_v25 = vrot.slane %v450_v15, 5  ;;  %v433_v26 = vrot.slane %v431_v16, 4  ;;  %v304_v62 = vld [vmem:[%s4607_s30 + $0x54] sm:$0xf] }
  0x34   : > { %v436_v27 = vrot.slane %v434_v17, 5  ;;  %726 = vrot.lane.b32.xlu0 %v395_v24, %s4483_s4  ;;  %v429_v30 = vsel %vm4618_vm3, %v424_v19, %v428_v7  ;;  %v414_v31 = vrot.slane %v413_v20, 4  ;;  %v447_v32 = vor.u32 %v446_v21, %v442_v12  ;;  %v308_v7 = vld [vmem:[%s4607_s30 + $0x64] sm:$0xf]  ;;  %v309_v16 = vld [vmem:[%s4607_s30 + $0x68] sm:$0x1] }
  0x35   : > { %v466_v33 = vrot.slane %v464_v22, 5  ;;  %v468_v35 = vshrl.u32 %v299_v9, 16  ;;  %v474_v36 = vshll.u32 %v300_v18, 16  ;;  %v455_v37 = vshrl.u32 %v298_v23, 16  ;;  %v307_v17 = vld [vmem:[%s4607_s30 + $0x60] sm:$0xf] }
  0x36   : > { %v437_v34 = vor.u32 %v436_v27, %v433_v26  ;;  %v419_v39 = vsel %vm4618_vm3, %v414_v31, %v418_v0  ;;  %v448_v40 = vrot.slane %v447_v32, 4  ;;  %v458_v41 = vshll.u32 %v298_v23, 16  ;;  %v311_v26 = vld [vmem:[%s4607_s30 + $0x70] sm:$0xf] }
  0x37   : > { %v488_v42 = vshll.u32 %v302_v29, 16  ;;  %732 = vrot.lane.b32.xlu1 %v429_v30, %s4483_s4  ;;  %v470_v45 = vrot.slane %v468_v35, 4  ;;  %v476_v46 = vrot.slane %v474_v36, 5  ;;  %v457_v47 = vrot.slane %v455_v37, 4  ;;  %v312_v36 = vld [vmem:[%s4607_s30 + $0x74] sm:$0x1] }
  0x38   : > { %v438_v44 = vrot.slane %v437_v34, 4  ;;  %730 = vrot.lane.b32.xlu0 %v419_v39, %s4483_s4  ;;  %v453_v49 = vsel %vm4618_vm3, %v448_v40, %v452_v25  ;;  %v460_v50 = vrot.slane %v458_v41, 5  ;;  %v492_v52 = vshrl.u32 %v302_v29, 16  ;;  %v310_v37 = vld [vmem:[%s4607_s30 + $0x6c] sm:$0xf] }
  0x39   : > { %v490_v51 = vrot.slane %v488_v42, 5  ;;  %v471_v54 = vor.u32 %v470_v45, %v466_v33  ;;  %v498_v55 = vshll.u32 %v303_v38, 16  ;;  %v479_v56 = vshrl.u32 %v301_v43, 16 }
  0x3a   : > { %v443_v53 = vsel %vm4618_vm3, %v438_v44, %v442_v12  ;;  %v461_v58 = vor.u32 %v460_v50, %v457_v47  ;;  %v494_v59 = vrot.slane %v492_v52, 4  ;;  %v482_v60 = vshll.u32 %v301_v43, 16 }
  0x3b   : > { %v512_v61 = vshll.u32 %v305_v48, 16  ;;  %736 = vrot.lane.b32.xlu1 %v453_v49, %s4483_s4  ;;  %v472_v63 = vrot.slane %v471_v54, 4  ;;  %v500_v0 = vrot.slane %v498_v55, 5  ;;  %v481_v1 = vrot.slane %v479_v56, 4  ;;  %v315_v55 = vld [vmem:[%s4607_s30 + $0x80] sm:$0x1] }
  0x3c   : > { %v516_v2 = vshrl.u32 %v305_v48, 16  ;;  %734 = vrot.lane.b32.xlu0 %v443_v53, %s4483_s4  ;;  %v462_v3 = vrot.slane %v461_v58, 4  ;;  %v495_v4 = vor.u32 %v494_v59, %v490_v51  ;;  %v484_v5 = vrot.slane %v482_v60, 5  ;;  %v313_v56 = vld [vmem:[%s4607_s30 + $0x78] sm:$0xf] }
  0x3d   : > { %v514_v6 = vrot.slane %v512_v61, 5  ;;  %v477_v8 = vsel %vm4618_vm3, %v472_v63, %v476_v46  ;;  %v522_v10 = vshll.u32 %v306_v57, 16  ;;  %v503_v11 = vshrl.u32 %v304_v62, 16  ;;  %v314_v46 = vld [vmem:[%s4607_s30 + $0x7c] sm:$0xf] }
  0x3e   : > { %v518_v9 = vrot.slane %v516_v2, 4  ;;  %v467_v12 = vsel %vm4618_vm3, %v462_v3, %v466_v33  ;;  %v496_v13 = vrot.slane %v495_v4, 4  ;;  %v485_v14 = vor.u32 %v484_v5, %v481_v1  ;;  %v317_v1 = vld [vmem:[%s4607_s30 + $0x88] sm:$0xf] }
  0x3f   : > { %v506_v15 = vshll.u32 %v304_v62, 16  ;;  %740 = vrot.lane.b32.xlu1 %v477_v8, %s4483_s4  ;;  %v524_v19 = vrot.slane %v522_v10, 5  ;;  %v505_v20 = vrot.slane %v503_v11, 4  ;;  %v536_v21 = vshll.u32 %v308_v7, 16  ;;  %v316_v11 = vld [vmem:[%s4607_s30 + $0x84] sm:$0xf] }
  0x40   : > { %v519_v18 = vor.u32 %v518_v9, %v514_v6  ;;  %738 = vrot.lane.b32.xlu0 %v467_v12, %s4483_s4  ;;  %v501_v22 = vsel %vm4618_vm3, %v496_v13, %v500_v0  ;;  %v486_v23 = vrot.slane %v485_v14, 4  ;;  %v540_v25 = vshrl.u32 %v308_v7, 16 }
  0x41   : > { %v508_v24 = vrot.slane %v506_v15, 5  ;;  %v538_v29 = vrot.slane %v536_v21, 5  ;;  %v546_v30 = vshll.u32 %v309_v16, 16  ;;  %v527_v31 = vshrl.u32 %v307_v17, 16 }
  0x42   : > { %v520_v27 = vrot.slane %v519_v18, 4  ;;  %v491_v32 = vsel %vm4618_vm3, %v486_v23, %v490_v51  ;;  %v542_v34 = vrot.slane %v540_v25, 4  ;;  %v530_v35 = vshll.u32 %v307_v17, 16  ;;  %v321_v25 = vld [vmem:[%s4607_s30 + $0x98] sm:$0x1] }
  0x43   : > { %v509_v33 = vor.u32 %v508_v24, %v505_v20  ;;  %744 = vrot.lane.b32.xlu1 %v501_v22, %s4483_s4  ;;  %v548_v39 = vrot.slane %v546_v30, 5  ;;  %v529_v40 = vrot.slane %v527_v31, 4  ;;  %v560_v41 = vshll.u32 %v311_v26, 16  ;;  %v320_v20 = vld [vmem:[%s4607_s30 + $0x94] sm:$0xf] }
  0x44   : > { %v525_v38 = vsel %vm4618_vm3, %v520_v27, %v524_v19  ;;  %742 = vrot.lane.b32.xlu0 %v491_v32, %s4483_s4  ;;  %v543_v43 = vor.u32 %v542_v34, %v538_v29  ;;  %v532_v44 = vrot.slane %v530_v35, 5  ;;  %v564_v45 = vshrl.u32 %v311_v26, 16  ;;  %v319_v31 = vld [vmem:[%s4607_s30 + $0x90] sm:$0xf] }
  0x45   : > { %v510_v42 = vrot.slane %v509_v33, 4  ;;  %v562_v47 = vrot.slane %v560_v41, 5  ;;  %v570_v48 = vshll.u32 %v312_v36, 16  ;;  %v551_v49 = vshrl.u32 %v310_v37, 16 }
  0x46   : > { %v554_v50 = vshll.u32 %v310_v37, 16  ;;  %v544_v52 = vrot.slane %v543_v43, 4  ;;  %v533_v53 = vor.u32 %v532_v44, %v529_v40  ;;  %v566_v54 = vrot.slane %v564_v45, 4  ;;  %v323_v40 = vld [vmem:[%s4607_s30 + $0xa0] sm:$0xf] }
  0x47   : > { %v515_v51 = vsel %vm4618_vm3, %v510_v42, %v514_v6  ;;  %748 = vrot.lane.b32.xlu1 %v525_v38, %s4483_s4  ;;  %v572_v57 = vrot.slane %v570_v48, 5  ;;  %v553_v58 = vrot.slane %v551_v49, 4  ;;  %v584_v60 = vshll.u32 %v314_v46, 16  ;;  %v318_v6 = vld [vmem:[%s4607_s30 + $0x8c] sm:$0x1] }
  0x48   : > { %v556_v59 = vrot.slane %v554_v50, 5  ;;  %746 = vrot.lane.b32.xlu0 %v515_v51, %s4483_s4  ;;  %v549_v61 = vsel %vm4618_vm3, %v544_v52, %v548_v39  ;;  %v534_v62 = vrot.slane %v533_v53, 4  ;;  %v567_v63 = vor.u32 %v566_v54, %v562_v47  ;;  %v324_v49 = vld [vmem:[%s4607_s30 + $0xa4] sm:$0x1]  ;;  %v322_v50 = vld [vmem:[%s4607_s30 + $0x9c] sm:$0xf] }
  0x49   : > { %v588_v0 = vshrl.u32 %v314_v46, 16  ;;  %v586_v3 = vrot.slane %v584_v60, 5  ;;  %v594_v4 = vshll.u32 %v315_v55, 16  ;;  %v575_v5 = vshrl.u32 %v313_v56, 16 }
  0x4a   : > { %v557_v2 = vor.u32 %v556_v59, %v553_v58  ;;  %v539_v7 = vsel %vm4618_vm3, %v534_v62, %v538_v29  ;;  %v568_v8 = vrot.slane %v567_v63, 4  ;;  %v578_v10 = vshll.u32 %v313_v56, 16  ;;  %v326_v59 = vld [vmem:[%s4607_s30 + $0xac] sm:$0xf] }
  0x4b   : > { %v590_v9 = vrot.slane %v588_v0, 4  ;;  %752 = vrot.lane.b32.xlu1 %v549_v61, %s4483_s4  ;;  %v596_v13 = vrot.slane %v594_v4, 5  ;;  %v577_v14 = vrot.slane %v575_v5, 4  ;;  %v608_v15 = vshll.u32 %v317_v1, 16  ;;  %v327_v4 = vld [vmem:[%s4607_s30 + $0xb0] sm:$0x1] }
  0x4c   : > { %v558_v12 = vrot.slane %v557_v2, 4  ;;  %750 = vrot.lane.b32.xlu0 %v539_v7, %s4483_s4  ;;  %v573_v16 = vsel %vm4618_vm3, %v568_v8, %v572_v57  ;;  %v580_v18 = vrot.slane %v578_v10, 5  ;;  %v612_v19 = vshrl.u32 %v317_v1, 16  ;;  %v325_v5 = vld [vmem:[%s4607_s30 + $0xa8] sm:$0xf] }
  0x4d   : > { %v591_v17 = vor.u32 %v590_v9, %v586_v3  ;;  %v610_v22 = vrot.slane %v608_v15, 5  ;;  %v618_v23 = vshll.u32 %v318_v6, 16  ;;  %v599_v24 = vshrl.u32 %v316_v11, 16 }
  0x4e   : > { %v563_v21 = vsel %vm4618_vm3, %v558_v12, %v562_v47  ;;  %v581_v27 = vor.u32 %v580_v18, %v577_v14  ;;  %v614_v29 = vrot.slane %v612_v19, 4  ;;  %v602_v30 = vshll.u32 %v316_v11, 16  ;;  %v329_v14 = vld [vmem:[%s4607_s30 + $0xb8] sm:$0xf] }
  0x4f   : > { %v592_v26 = vrot.slane %v591_v17, 4  ;;  %756 = vrot.lane.b32.xlu1 %v573_v16, %s4483_s4  ;;  %v620_v32 = vrot.slane %v618_v23, 5  ;;  %v601_v33 = vrot.slane %v599_v24, 4  ;;  %v632_v34 = vshll.u32 %v320_v20, 16  ;;  %v330_v23 = vld [vmem:[%s4607_s30 + $0xbc] sm:$0x1] }
  0x50   : > { %v636_v35 = vshrl.u32 %v320_v20, 16  ;;  %754 = vrot.lane.b32.xlu0 %v563_v21, %s4483_s4  ;;  %v582_v37 = vrot.slane %v581_v27, 4  ;;  %v615_v38 = vor.u32 %v614_v29, %v610_v22  ;;  %v604_v39 = vrot.slane %v602_v30, 5  ;;  %v328_v24 = vld [vmem:[%s4607_s30 + $0xb4] sm:$0xf] }
  0x51   : > { %v597_v36 = vsel %vm4618_vm3, %v592_v26, %v596_v13  ;;  %v634_v41 = vrot.slane %v632_v34, 5  ;;  %v642_v43 = vshll.u32 %v321_v25, 16  ;;  %v623_v44 = vshrl.u32 %v319_v31, 16 }
  0x52   : > { %v638_v42 = vrot.slane %v636_v35, 4  ;;  %v587_v45 = vsel %vm4618_vm3, %v582_v37, %v586_v3  ;;  %v616_v46 = vrot.slane %v615_v38, 4  ;;  %v605_v47 = vor.u32 %v604_v39, %v601_v33  ;;  %v848_v38 = vld [vmem:[%s4607_s30 + $0x4] sm:$0xf] }
  0x53   : > { %v626_v48 = vshll.u32 %v319_v31, 16  ;;  %760 = vrot.lane.b32.xlu1 %v597_v36, %s4483_s4  ;;  %v644_v52 = vrot.slane %v642_v43, 5  ;;  %v625_v53 = vrot.slane %v623_v44, 4  ;;  %v656_v54 = vshll.u32 %v323_v40, 16 }
  0x54   : > { %v639_v51 = vor.u32 %v638_v42, %v634_v41  ;;  %758 = vrot.lane.b32.xlu0 %v587_v45, %s4483_s4  ;;  %v621_v55 = vsel %vm4618_vm3, %v616_v46, %v620_v32  ;;  %v606_v56 = vrot.slane %v605_v47, 4  ;;  %v660_v58 = vshrl.u32 %v323_v40, 16 }
  0x55   : > { %v628_v57 = vrot.slane %v626_v48, 5  ;;  %v658_v61 = vrot.slane %v656_v54, 5  ;;  %v666_v62 = vshll.u32 %v324_v49, 16  ;;  %v647_v63 = vshrl.u32 %v322_v50, 16  ;;  %v849_v49 = vld [vmem:[%s4607_s30 + $0x8] sm:$0x1] }
  0x56   : > { %v640_v60 = vrot.slane %v639_v51, 4  ;;  %v611_v0 = vsel %vm4618_vm3, %v606_v56, %v610_v22  ;;  %v662_v2 = vrot.slane %v660_v58, 4  ;;  %v650_v3 = vshll.u32 %v322_v50, 16 }
  0x57   : > { %v629_v1 = vor.u32 %v628_v57, %v625_v53  ;;  %764 = vrot.lane.b32.xlu1 %v621_v55, %s4483_s4  ;;  %v668_v7 = vrot.slane %v666_v62, 5  ;;  %v649_v8 = vrot.slane %v647_v63, 4  ;;  %v680_v9 = vshll.u32 %v326_v59, 16  ;;  %v847_v55 = vld [vmem:[%s4607_s30] sm:$0xe] }
  0x58   : > { %v645_v6 = vsel %vm4618_vm3, %v640_v60, %v644_v52  ;;  %762 = vrot.lane.b32.xlu0 %v611_v0, %s4483_s4  ;;  %v663_v11 = vor.u32 %v662_v2, %v658_v61  ;;  %v652_v12 = vrot.slane %v650_v3, 5  ;;  %v684_v13 = vshrl.u32 %v326_v59, 16  ;;  %v851_v52 = vld [vmem:[%s4607_s30 + $0x10] sm:$0xf]  ;;  %v220_v57 = vld [vmem:[%s4607_s30 + $0xc] sm:$0xf] }
  0x59   : > { %v630_v10 = vrot.slane %v629_v1, 4  ;;  %v682_v15 = vrot.slane %v680_v9, 5  ;;  %v690_v16 = vshll.u32 %v327_v4, 16  ;;  %v671_v17 = vshrl.u32 %v325_v5, 16  ;;  %253 = vst.msk [vmem:[#allocation2 + $0x8] sm:$0xf] %vm250_vm4, %v220_v57 }
  0x5a   : > { %v674_v18 = vshll.u32 %v325_v5, 16  ;;  %v664_v20 = vrot.slane %v663_v11, 4  ;;  %v653_v21 = vor.u32 %v652_v12, %v649_v8  ;;  %v686_v22 = vrot.slane %v684_v13, 4  ;;  %v218_v62 = vld [vmem:[%s4607_s30] sm:$0xf] }
  0x5b   : > { %v635_v19 = vsel %vm4618_vm3, %v630_v10, %v634_v41  ;;  %768 = vrot.lane.b32.xlu1 %v645_v6, %s4483_s4  ;;  %v692_v25 = vrot.slane %v690_v16, 5  ;;  %v673_v26 = vrot.slane %v671_v17, 4  ;;  %v704_v29 = vshll.u32 %v329_v14, 16  ;;  %v852_v1 = vld [vmem:[%s4607_s30 + $0x14] sm:$0x1] }
  0x5c   : > { %v676_v27 = vrot.slane %v674_v18, 5  ;;  %766 = vrot.lane.b32.xlu0 %v635_v19, %s4483_s4  ;;  %v669_v30 = vsel %vm4618_vm3, %v664_v20, %v668_v7  ;;  %v654_v31 = vrot.slane %v653_v21, 4  ;;  %v687_v32 = vor.u32 %v686_v22, %v682_v15  ;;  %v854_v2 = vld [vmem:[%s4607_s30 + $0x1c] sm:$0xf]  ;;  %251 = vst.msk [vmem:[#allocation2] sm:$0xf] %vm250_vm4, %v218_v62 }
  0x5d   : > { %v708_v33 = vshrl.u32 %v329_v14, 16  ;;  %v706_v35 = vrot.slane %v704_v29, 5  ;;  %v714_v36 = vshll.u32 %v330_v23, 16  ;;  %v695_v37 = vshrl.u32 %v328_v24, 16  ;;  %v850_v4 = vld [vmem:[%s4607_s30 + $0xc] sm:$0xe] }
  0x5e   : > { %v677_v34 = vor.u32 %v676_v27, %v673_v26  ;;  %v659_v39 = vsel %vm4618_vm3, %v654_v31, %v658_v61  ;;  %v688_v40 = vrot.slane %v687_v32, 4  ;;  %v698_v42 = vshll.u32 %v328_v24, 16  ;;  %v221_v5 = vld [vmem:[%s4607_s30 + $0x10] sm:$0xf]  ;;  %v219_v6 = vld [vmem:[%s4607_s30 + $0x4] sm:$0xf] }
  0x5f   : > { %v710_v41 = vrot.slane %v708_v33, 4  ;;  %772 = vrot.lane.b32.xlu1 %v669_v30, %s4483_s4  ;;  %v716_v44 = vrot.slane %v714_v36, 5  ;;  %v697_v45 = vrot.slane %v695_v37, 4  ;;  %v948_v50 = vrot.slane %v848_v38, 5  ;;  %254 = vst.msk [vmem:[#allocation2 + $0xc] sm:$0xf] %vm250_vm4, %v221_v5 }
  0x60   : > { %v678_v43 = vrot.slane %v677_v34, 4  ;;  %770 = vrot.lane.b32.xlu0 %v659_v39, %s4483_s4  ;;  %v693_v46 = vsel %vm4618_vm3, %v688_v40, %v692_v25  ;;  %v700_v48 = vrot.slane %v698_v42, 5  ;;  %v951_v56 = vrot.slane %v849_v49, 5  ;;  %252 = vst.msk [vmem:[#allocation2 + $0x4] sm:$0xf] %vm250_vm4, %v219_v6 }
  0x61   : > { %v711_v47 = vor.u32 %v710_v41, %v706_v35  ;;  %v950_v60 = vrot.slane %v948_v50, 4  ;;  %v955_v61 = vrot.slane %v851_v52, 5  ;;  %v3891_v0 = vrot.slane %v847_v55, 9  ;;  %v855_v13 = vld [vmem:[%s4607_s30 + $0x20] sm:$0x1] }
  0x62   : > { %v683_v51 = vsel %vm4618_vm3, %v678_v43, %v682_v15  ;;  %v701_v54 = vor.u32 %v700_v48, %v697_v45  ;;  %v958_v9 = vrot.slane %v852_v1, 5  ;;  %v962_v10 = vrot.slane %v854_v2, 5  ;;  %v857_v14 = vld [vmem:[%s4607_s30 + $0x28] sm:$0xf]  ;;  %v853_v15 = vld [vmem:[%s4607_s30 + $0x18] sm:$0xe] }
  0x63   : > { %v712_v53 = vrot.slane %v711_v47, 4  ;;  %776 = vrot.lane.b32.xlu1 %v693_v46, %s4483_s4  ;;  %v952_v7 = vsel %vm4762_vm7, %v950_v60, %v951_v56  ;;  %v957_v8 = vrot.slane %v955_v61, 4  ;;  %v949_v11 = vsel %vm4762_vm7, %v3891_v0, %v948_v50  ;;  %v223_v16 = vld [vmem:[%s4607_s30 + $0x1c] sm:$0xf]  ;;  %v222_v17 = vld [vmem:[%s4607_s30 + $0x18] sm:$0xf] }
  0x64   : > { %774 = vrot.lane.b32.xlu0 %v683_v51, %s4483_s4  ;;  %v702_v59 = vrot.slane %v701_v54, 4  ;;  %v3892_v12 = vrot.slane %v850_v4, 9  ;;  %256 = vst.msk [vmem:[#allocation2 + $0x14] sm:$0xf] %vm250_vm4, %v223_v16  ;;  %v964_v19 = vrot.slane %v962_v10, 4  ;;  %v965_v20 = vrot.slane %v855_v13, 5 }
  0x65   : > { %v717_v58 = vsel %vm4618_vm3, %v712_v53, %v716_v44  ;;  %v959_v18 = vsel %vm4762_vm7, %v957_v8, %v958_v9  ;;  %v969_v21 = vrot.slane %v857_v14, 5  ;;  %255 = vst.msk [vmem:[#allocation2 + $0x10] sm:$0xf] %vm250_vm4, %v222_v17  ;;  %v3893_v23 = vrot.slane %v853_v15, 9  ;;  %v858_v24 = vld [vmem:[%s4607_s30 + $0x2c] sm:$0x1] }
  0x66   : > { %v707_v3 = vsel %vm4618_vm3, %v702_v59, %v706_v35  ;;  %v956_v22 = vsel %vm4762_vm7, %v3892_v12, %v955_v61  ;;  %v860_v25 = vld [vmem:[%s4607_s30 + $0x34] sm:$0xf]  ;;  %v856_v26 = vld [vmem:[%s4607_s30 + $0x24] sm:$0xe]  ;;  %v225_v27 = vld [vmem:[%s4607_s30 + $0x28] sm:$0xf]  ;;  %v966_v30 = vsel %vm4762_vm7, %v964_v19, %v965_v20 }
  0x67   : > { %780 = vrot.lane.b32.xlu1 %v717_v58, %s4483_s4  ;;  %258 = vst.msk [vmem:[#allocation2 + $0x1c] sm:$0xf] %vm250_vm4, %v225_v27  ;;  %v224_v29 = vld [vmem:[%s4607_s30 + $0x24] sm:$0xf]  ;;  %v971_v31 = vrot.slane %v969_v21, 4  ;;  %v972_v32 = vrot.slane %v858_v24, 5  ;;  %v963_v35 = vsel %vm4762_vm7, %v3893_v23, %v962_v10 }
  0x68   : > { %778 = vrot.lane.b32.xlu0 %v707_v3, %s4483_s4  ;;  %v861_v33 = vld [vmem:[%s4607_s30 + $0x38] sm:$0x1]  ;;  %v976_v34 = vrot.slane %v860_v25, 5  ;;  %257 = vst.msk [vmem:[#allocation2 + $0x18] sm:$0xf] %vm250_vm4, %v224_v29  ;;  %v3894_v36 = vrot.slane %v856_v26, 9  ;;  %s3812_s4 = scalar_lea.hbm %s6146_s3, %s4225_s27 }
  0x69   : > { %v863_v37 = vld [vmem:[%s4607_s30 + $0x40] sm:$0xf]  ;;  %v227_v38 = vld [vmem:[%s4607_s30 + $0x34] sm:$0xf]  ;;  %v859_v39 = vld [vmem:[%s4607_s30 + $0x30] sm:$0xe]  ;;  %v973_v42 = vsel %vm4762_vm7, %v971_v31, %v972_v32 }
  0x6a   : > { %260 = vst.msk [vmem:[#allocation2 + $0x24] sm:$0xf] %vm250_vm4, %v227_v38  ;;  %v226_v40 = vld [vmem:[%s4607_s30 + $0x30] sm:$0xf]  ;;  %v864_v41 = vld [vmem:[%s4607_s30 + $0x44] sm:$0x1]  ;;  %v970_v47 = vsel %vm4762_vm7, %v3894_v36, %v969_v21 }
  0x6b   : > { %1060 = vrot.lane.b32.xlu1 %v952_v7, %s4484_s5  ;;  %259 = vst.msk [vmem:[#allocation2 + $0x20] sm:$0xf] %vm250_vm4, %v226_v40  ;;  %v978_v43 = vrot.slane %v976_v34, 4  ;;  %v979_v44 = vrot.slane %v861_v33, 5  ;;  %v983_v45 = vrot.slane %v863_v37, 5  ;;  %v3895_v48 = vrot.slane %v859_v39, 9 }
  0x6c   : > { %1058 = vrot.lane.b32.xlu0 %v949_v11, %s4484_s5  ;;  %v229_v46 = vld [vmem:[%s4607_s30 + $0x40] sm:$0xf]  ;;  %v866_v49 = vld [vmem:[%s4607_s30 + $0x4c] sm:$0xf]  ;;  %v228_v50 = vld [vmem:[%s4607_s30 + $0x3c] sm:$0xf] }
  0x6d   : > { %262 = vst.msk [vmem:[#allocation2 + $0x2c] sm:$0xf] %vm250_vm4, %v229_v46  ;;  %v862_v51 = vld [vmem:[%s4607_s30 + $0x3c] sm:$0xe]  ;;  %261 = vst.msk [vmem:[#allocation2 + $0x28] sm:$0xf] %vm250_vm4, %v228_v50  ;;  %v980_v54 = vsel %vm4762_vm7, %v978_v43, %v979_v44  ;;  %v977_v59 = vsel %vm4762_vm7, %v3895_v48, %v976_v34 }
  0x6e   : > { %v867_v52 = vld [vmem:[%s4607_s30 + $0x50] sm:$0x1]  ;;  %v231_v53 = vld [vmem:[%s4607_s30 + $0x4c] sm:$0xf]  ;;  %v985_v55 = vrot.slane %v983_v45, 4  ;;  %v986_v56 = vrot.slane %v864_v41, 5 }
  0x6f   : > { %1064 = vrot.lane.b32.xlu1 %v959_v18, %s4484_s5  ;;  %v990_v57 = vrot.slane %v866_v49, 5  ;;  %264 = vst.msk [vmem:[#allocation2 + $0x34] sm:$0xf] %vm250_vm4, %v231_v53  ;;  %v230_v58 = vld [vmem:[%s4607_s30 + $0x48] sm:$0xf]  ;;  %v3896_v60 = vrot.slane %v862_v51, 9 }
  0x70   : > { %1062 = vrot.lane.b32.xlu0 %v956_v22, %s4484_s5  ;;  %v4839_v61 = vld [vmem:[%s4607_s30 + $0x58] sm:$0xf]  ;;  %263 = vst.msk [vmem:[#allocation2 + $0x30] sm:$0xf] %vm250_vm4, %v230_v58  ;;  %v865_v0 = vld [vmem:[%s4607_s30 + $0x48] sm:$0xe]  ;;  %v987_v6 = vsel %vm4762_vm7, %v985_v55, %v986_v56 }
  0x71   : > { %v233_v62 = vld [vmem:[%s4607_s30 + $0x58] sm:$0xf]  ;;  %v870_v1 = vld [vmem:[%s4607_s30 + $0x5c] sm:$0x1]  ;;  %v232_v2 = vld [vmem:[%s4607_s30 + $0x54] sm:$0xf]  ;;  %v984_v11 = vsel %vm4762_vm7, %v3896_v60, %v983_v45 }
  0x72   : > { %266 = vst.msk [vmem:[#allocation2 + $0x3c] sm:$0xf] %vm250_vm4, %v233_v62  ;;  %v993_v3 = vrot.slane %v867_v52, 5  ;;  %265 = vst.msk [vmem:[#allocation2 + $0x38] sm:$0xf] %vm250_vm4, %v232_v2  ;;  %v992_v7 = vrot.slane %v990_v57, 4 }
  0x73   : > { %1068 = vrot.lane.b32.xlu1 %v966_v30, %s4484_s5  ;;  %v235_v4 = vld [vmem:[%s4607_s30 + $0x64] sm:$0xf]  ;;  %v234_v5 = vld [vmem:[%s4607_s30 + $0x60] sm:$0xf]  ;;  %v997_v8 = vrot.slane %v4839_v61, 5  ;;  %v3897_v12 = vrot.slane %v865_v0, 9 }
  0x74   : > { %1066 = vrot.lane.b32.xlu0 %v963_v35, %s4484_s5  ;;  %268 = vst.msk [vmem:[#allocation2 + $0x44] sm:$0xf] %vm250_vm4, %v235_v4  ;;  %267 = vst.msk [vmem:[#allocation2 + $0x40] sm:$0xf] %vm250_vm4, %v234_v5  ;;  %v237_v9 = vld [vmem:[%s4607_s30 + $0x70] sm:$0xf]  ;;  %v994_v21 = vsel %vm4762_vm7, %v992_v7, %v993_v3 }
  0x75   : > { %v236_v10 = vld [vmem:[%s4607_s30 + $0x6c] sm:$0xf]  ;;  %v872_v13 = vld [vmem:[%s4607_s30 + $0x64] sm:$0xf]  ;;  %270 = vst.msk [vmem:[#allocation2 + $0x4c] sm:$0xf] %vm250_vm4, %v237_v9  ;;  %v991_v26 = vsel %vm4762_vm7, %v3897_v12, %v990_v57 }
  0x76   : > { %269 = vst.msk [vmem:[#allocation2 + $0x48] sm:$0xf] %vm250_vm4, %v236_v10  ;;  %v239_v14 = vld [vmem:[%s4607_s30 + $0x7c] sm:$0xf]  ;;  %v868_v15 = vld [vmem:[%s4607_s30 + $0x54] sm:$0xe] }
  0x77   : > { %1072 = vrot.lane.b32.xlu1 %v973_v42, %s4484_s5  ;;  %v873_v16 = vld [vmem:[%s4607_s30 + $0x68] sm:$0x1]  ;;  %272 = vst.msk [vmem:[#allocation2 + $0x54] sm:$0xf] %vm250_vm4, %v239_v14  ;;  %v238_v17 = vld [vmem:[%s4607_s30 + $0x78] sm:$0xf] }
  0x78   : > { %1070 = vrot.lane.b32.xlu0 %v970_v47, %s4484_s5  ;;  %v1000_v18 = vrot.slane %v870_v1, 5  ;;  %271 = vst.msk [vmem:[#allocation2 + $0x50] sm:$0xf] %vm250_vm4, %v238_v17  ;;  %v241_v19 = vld [vmem:[%s4607_s30 + $0x88] sm:$0xf]  ;;  %v999_v22 = vrot.slane %v997_v8, 4 }
  0x79   : > { %v240_v20 = vld [vmem:[%s4607_s30 + $0x84] sm:$0xf]  ;;  %v1004_v23 = vrot.slane %v872_v13, 5  ;;  %274 = vst.msk [vmem:[#allocation2 + $0x5c] sm:$0xf] %vm250_vm4, %v241_v19  ;;  %v3898_v27 = vrot.slane %v868_v15, 9 }
  0x7a   : > { %273 = vst.msk [vmem:[#allocation2 + $0x58] sm:$0xf] %vm250_vm4, %v240_v20  ;;  %v243_v24 = vld [vmem:[%s4607_s30 + $0x94] sm:$0xf]  ;;  %v242_v25 = vld [vmem:[%s4607_s30 + $0x90] sm:$0xf]  ;;  %v1001_v36 = vsel %vm4762_vm7, %v999_v22, %v1000_v18 }
  0x7b   : > { %1076 = vrot.lane.b32.xlu1 %v980_v54, %s4484_s5  ;;  %v875_v29 = vld [vmem:[%s4607_s30 + $0x70] sm:$0xf]  ;;  %276 = vst.msk [vmem:[#allocation2 + $0x64] sm:$0xf] %vm250_vm4, %v243_v24  ;;  %275 = vst.msk [vmem:[#allocation2 + $0x60] sm:$0xf] %vm250_vm4, %v242_v25  ;;  %v998_v41 = vsel %vm4762_vm7, %v3898_v27, %v997_v8 }
  0x7c   : > { %1074 = vrot.lane.b32.xlu0 %v977_v59, %s4484_s5  ;;  %v245_v30 = vld [vmem:[%s4607_s30 + $0xa0] sm:$0xf]  ;;  %v244_v32 = vld [vmem:[%s4607_s30 + $0x9c] sm:$0xf]  ;;  %v1007_v33 = vrot.slane %v873_v16, 5  ;;  %v1006_v37 = vrot.slane %v1004_v23, 4 }
  0x7d   : > { %v871_v31 = vld [vmem:[%s4607_s30 + $0x60] sm:$0xe]  ;;  %278 = vst.msk [vmem:[#allocation2 + $0x6c] sm:$0xf] %vm250_vm4, %v245_v30  ;;  %277 = vst.msk [vmem:[#allocation2 + $0x68] sm:$0xf] %vm250_vm4, %v244_v32 }
  0x7e   : > { %v247_v34 = vld [vmem:[%s4607_s30 + $0xac] sm:$0xf]  ;;  %v246_v35 = vld [vmem:[%s4607_s30 + $0xa8] sm:$0xf]  ;;  %v1011_v38 = vrot.slane %v875_v29, 5  ;;  %v3899_v42 = vrot.slane %v871_v31, 9  ;;  %v1008_v46 = vsel %vm4762_vm7, %v1006_v37, %v1007_v33 }
  0x7f   : > { %1080 = vrot.lane.b32.xlu1 %v987_v6, %s4484_s5  ;;  %280 = vst.msk [vmem:[#allocation2 + $0x74] sm:$0xf] %vm250_vm4, %v247_v34  ;;  %279 = vst.msk [vmem:[#allocation2 + $0x70] sm:$0xf] %vm250_vm4, %v246_v35  ;;  %v249_v39 = vld [vmem:[%s4607_s30 + $0xb8] sm:$0xf] }
  0x80   : > { %1078 = vrot.lane.b32.xlu0 %v984_v11, %s4484_s5  ;;  %v248_v40 = vld [vmem:[%s4607_s30 + $0xb4] sm:$0xf]  ;;  %v878_v44 = vld [vmem:[%s4607_s30 + $0x7c] sm:$0xf]  ;;  %282 = vst.msk [vmem:[#allocation2 + $0x7c] sm:$0xf] %vm250_vm4, %v249_v39  ;;  %v1005_v50 = vsel %vm4762_vm7, %v3899_v42, %v1004_v23 }
  0x81   : > { %v876_v43 = vld [vmem:[%s4607_s30 + $0x74] sm:$0x1]  ;;  %281 = vst.msk [vmem:[#allocation2 + $0x78] sm:$0xf] %vm250_vm4, %v248_v40  ;;  %v874_v45 = vld [vmem:[%s4607_s30 + $0x6c] sm:$0xe] }
  0x82   : > { %v1013_v47 = vrot.slane %v1011_v38, 4  ;;  %v1014_v48 = vrot.slane %v876_v43, 5  ;;  %v1018_v49 = vrot.slane %v878_v44, 5  ;;  %v3900_v51 = vrot.slane %v874_v45, 9  ;;  %v879_v52 = vld [vmem:[%s4607_s30 + $0x80] sm:$0x1] }
  0x83   : > { %1084 = vrot.lane.b32.xlu1 %v994_v21, %s4484_s5  ;;  %v881_v53 = vld [vmem:[%s4607_s30 + $0x88] sm:$0xf]  ;;  %v877_v54 = vld [vmem:[%s4607_s30 + $0x78] sm:$0xe]  ;;  %v1021_v57 = vrot.slane %v879_v52, 5  ;;  %vm2246_vm12 = vcmask 191648  }
  0x84   : > { %1082 = vrot.lane.b32.xlu0 %v991_v26, %s4484_s5  ;;  %v1015_v55 = vsel %vm4762_vm7, %v1013_v47, %v1014_v48  ;;  %v1020_v56 = vrot.slane %v1018_v49, 4  ;;  %v1025_v58 = vrot.slane %v881_v53, 5  ;;  %v1012_v59 = vsel %vm4762_vm7, %v3900_v51, %v1011_v38  ;;  %v882_v61 = vld [vmem:[%s4607_s30 + $0x8c] sm:$0x1]  ;;  %v884_v62 = vld [vmem:[%s4607_s30 + $0x94] sm:$0xf] }
  0x85   : > { %v3901_v60 = vrot.slane %v877_v54, 9  ;;  %v880_v0 = vld [vmem:[%s4607_s30 + $0x84] sm:$0xe]  ;;  %v1028_v3 = vrot.slane %v882_v61, 5  ;;  %v1032_v4 = vrot.slane %v884_v62, 5  ;;  %vm2440_vm13 = vcmask 224448  }
  0x86   : > { %v1022_v1 = vsel %vm4762_vm7, %v1020_v56, %v1021_v57  ;;  %v1027_v2 = vrot.slane %v1025_v58, 4  ;;  %v3902_v6 = vrot.slane %v880_v0, 9  ;;  %v885_v7 = vld [vmem:[%s4607_s30 + $0x98] sm:$0x1]  ;;  %v887_v8 = vld [vmem:[%s4607_s30 + $0xa0] sm:$0xf] }
  0x87   : > { %1088 = vrot.lane.b32.xlu1 %v1001_v36, %s4484_s5  ;;  %v1019_v5 = vsel %vm4762_vm7, %v3901_v60, %v1018_v49  ;;  %v883_v9 = vld [vmem:[%s4607_s30 + $0x90] sm:$0xe]  ;;  %v1034_v11 = vrot.slane %v1032_v4, 4  ;;  %v1035_v12 = vrot.slane %v885_v7, 5  ;;  %v1039_v13 = vrot.slane %v887_v8, 5 }
  0x88   : > { %1086 = vrot.lane.b32.xlu0 %v998_v41, %s4484_s5  ;;  %v1029_v10 = vsel %vm4762_vm7, %v1027_v2, %v1028_v3  ;;  %v1026_v14 = vsel %vm4762_vm7, %v3902_v6, %v1025_v58  ;;  %v3903_v15 = vrot.slane %v883_v9, 9  ;;  %v888_v16 = vld [vmem:[%s4607_s30 + $0xa4] sm:$0x1]  ;;  %v890_v17 = vld [vmem:[%s4607_s30 + $0xac] sm:$0xf]  ;;  %vm3001_vm14 = vcmask 257248  }
  0x89   : > { %v886_v18 = vld [vmem:[%s4607_s30 + $0x9c] sm:$0xe]  ;;  %v1036_v19 = vsel %vm4762_vm7, %v1034_v11, %v1035_v12  ;;  %v1041_v20 = vrot.slane %v1039_v13, 4  ;;  %v1042_v21 = vrot.slane %v888_v16, 5  ;;  %v1046_v22 = vrot.slane %v890_v17, 5 }
  0x8a   : > { %v1033_v23 = vsel %vm4762_vm7, %v3903_v15, %v1032_v4  ;;  %v3904_v24 = vrot.slane %v886_v18, 9  ;;  %v891_v25 = vld [vmem:[%s4607_s30 + $0xb0] sm:$0x1]  ;;  %v893_v26 = vld [vmem:[%s4607_s30 + $0xb8] sm:$0xf]  ;;  %vm3338_vm15 = vcmask 290048  }
  0x8b   : > { %1092 = vrot.lane.b32.xlu1 %v1008_v46, %s4484_s5  ;;  %v889_v27 = vld [vmem:[%s4607_s30 + $0xa8] sm:$0xe]  ;;  %v1043_v29 = vsel %vm4762_vm7, %v1041_v20, %v1042_v21  ;;  %v1048_v30 = vrot.slane %v1046_v22, 4  ;;  %v1049_v31 = vrot.slane %v891_v25, 5  ;;  %v1053_v32 = vrot.slane %v893_v26, 5 }
  0x8c   : > { %1090 = vrot.lane.b32.xlu0 %v1005_v50, %s4484_s5  ;;  %v1040_v34 = vsel %vm4762_vm7, %v3904_v24, %v1039_v13  ;;  %v3905_v35 = vrot.slane %v889_v27, 9  ;;  %v894_v36 = vld [vmem:[%s4607_s30 + $0xbc] sm:$0x1]  ;;  %v892_v38 = vld [vmem:[%s4607_s30 + $0xb4] sm:$0xe] }
  0x8d   : > { %v1050_v39 = vsel %vm4762_vm7, %v1048_v30, %v1049_v31  ;;  %v1055_v40 = vrot.slane %v1053_v32, 4  ;;  %v1056_v41 = vrot.slane %v894_v36, 5  ;;  %v3906_v44 = vrot.slane %v892_v38, 9  ;;  %v3908_v50 = vld [vmem:[%s4607_s30 + $0x10] sm:$0xf] }
  0x8e   : > { %v1047_v43 = vsel %vm4762_vm7, %v3905_v35, %v1046_v22  ;;  %v3907_v52 = vld [vmem:[%s4607_s30 + $0xc] sm:$0xf]  ;;  %v3910_v54 = vld [vmem:[%s4607_s30 + $0x1c] sm:$0xf]  ;;  %v3909_v56 = vld [vmem:[%s4607_s30 + $0x18] sm:$0xf] }
  0x8f   : > { %1096 = vrot.lane.b32.xlu1 %v1015_v55, %s4484_s5  ;;  %v1057_v46 = vsel %vm4762_vm7, %v1055_v40, %v1056_v41  ;;  %v1054_v48 = vsel %vm4762_vm7, %v3906_v44, %v1053_v32  ;;  %v3912_v58 = vld [vmem:[%s4607_s30 + $0x28] sm:$0xf]  ;;  %v3911_v60 = vld [vmem:[%s4607_s30 + $0x24] sm:$0xf]  ;;  %v3914_v62 = vld [vmem:[%s4607_s30 + $0x34] sm:$0xf] }
  0x90   : > { %1094 = vrot.lane.b32.xlu0 %v1012_v59, %s4484_s5  ;;  %v3916_v3 = vld [vmem:[%s4607_s30 + $0x40] sm:$0xf]  ;;  %v3918_v7 = vld [vmem:[%s4607_s30 + $0x4c] sm:$0xf]  ;;  %v3917_v9 = vld [vmem:[%s4607_s30 + $0x48] sm:$0xf] }
  0x91   : > { %v3920_v11 = vld [vmem:[%s4607_s30 + $0x58] sm:$0xf]  ;;  %v3919_v13 = vld [vmem:[%s4607_s30 + $0x54] sm:$0xf]  ;;  %v3922_v15 = vld [vmem:[%s4607_s30 + $0x64] sm:$0xf] }
  0x92   : > { %v3921_v17 = vld [vmem:[%s4607_s30 + $0x60] sm:$0xf]  ;;  %v3923_v21 = vld [vmem:[%s4607_s30 + $0x6c] sm:$0xf]  ;;  %v3925_v25 = vld [vmem:[%s4607_s30 + $0x78] sm:$0xf] }
  0x93   : > { %1100 = vrot.lane.b32.xlu1 %v1022_v1, %s4484_s5  ;;  %v3913_v1 = vld [vmem:[%s4607_s30 + $0x30] sm:$0xf]  ;;  %v3928_v27 = vld [vmem:[%s4607_s30 + $0x88] sm:$0xf]  ;;  %v3927_v30 = vld [vmem:[%s4607_s30 + $0x84] sm:$0xf] }
  0x94   : > { %1098 = vrot.lane.b32.xlu0 %v1019_v5, %s4484_s5  ;;  %v3915_v5 = vld [vmem:[%s4607_s30 + $0x3c] sm:$0xf]  ;;  %v3940_v32 = vld [vmem:[%s4607_s30 + $0x10] sm:$0xf]  ;;  %v3942_v38 = vld [vmem:[%s4607_s30 + $0x18] sm:$0xf] }
  0x95   : > { %v3943_v35 = vld [vmem:[%s4607_s30 + $0x1c] sm:$0xf]  ;;  %v1439_v40 = vshll.u32 %v3940_v32, 16  ;;  %v1443_v41 = vshrl.u32 %v3940_v32, 16  ;;  %v3937_v32 = vld [vmem:[%s4607_s30 + $0xc0] sm:$0xf] }
  0x96   : > { %v1463_v44 = vshll.u32 %v3943_v35, 16 }
  0x97   : > { %1104 = vrot.lane.b32.xlu1 %v1029_v10, %s4484_s5 }
  0x98   : > { %1102 = vrot.lane.b32.xlu0 %v1026_v14, %s4484_s5 }
  0x9b   : > { %1108 = vrot.lane.b32.xlu1 %v1036_v19, %s4484_s5  ;;  %v3924_v19 = vld [vmem:[%s4607_s30 + $0x70] sm:$0xf] }
  0x9c   : > { %1106 = vrot.lane.b32.xlu0 %v1033_v23, %s4484_s5  ;;  %v3926_v23 = vld [vmem:[%s4607_s30 + $0x7c] sm:$0xf] }
  0x9d   : > { %v723_v33 = vpop.permute.xlu1 %722 }
  0x9e   : > { %817 = vst.msk [vmem:[#allocation2 + $0x8] sm:$0xf] %vm814_vm8, %v723_v33  ;;  %v719_v37 = vpop.permute.xlu0 %718  ;;  %v3930_v33 = vld [vmem:[%s4607_s30 + $0x94] sm:$0xf] }
  0x9f   : > { %815 = vst.msk [vmem:[#allocation2] sm:$0xf] %vm814_vm8, %v719_v37  ;;  %1112 = vrot.lane.b32.xlu1 %v1043_v29, %s4484_s5  ;;  %v3929_v37 = vld [vmem:[%s4607_s30 + $0x90] sm:$0xf] }
  0xa0   : > { %1110 = vrot.lane.b32.xlu0 %v1040_v34, %s4484_s5  ;;  %v3939_v34 = vld [vmem:[%s4607_s30 + $0xc] sm:$0xf] }
  0xa1   : > { %v725_v42 = vpop.permute.xlu1 %724 }
  0xa2   : > { %818 = vst.msk [vmem:[#allocation2 + $0xc] sm:$0xf] %vm814_vm8, %v725_v42  ;;  %v721_v45 = vpop.permute.xlu0 %720  ;;  %v1430_v42 = vshrl.u32 %v3939_v34, 16 }
  0xa3   : > { %816 = vst.msk [vmem:[#allocation2 + $0x4] sm:$0xf] %vm814_vm8, %v721_v45  ;;  %1116 = vrot.lane.b32.xlu1 %v1050_v39, %s4484_s5  ;;  %v1467_v45 = vshrl.u32 %v3943_v35, 16 }
  0xa4   : > { %1114 = vrot.lane.b32.xlu0 %v1047_v43, %s4484_s5  ;;  %v1433_v43 = vshll.u32 %v3939_v34, 16 }
  0xa5   : > { %v729_v47 = vpop.permute.xlu1 %728 }
  0xa6   : > { %820 = vst.msk [vmem:[#allocation2 + $0x14] sm:$0xf] %vm814_vm8, %v729_v47  ;;  %v727_v49 = vpop.permute.xlu0 %726  ;;  %v1454_v47 = vshrl.u32 %v3942_v38, 16 }
  0xa7   : > { %819 = vst.msk [vmem:[#allocation2 + $0x10] sm:$0xf] %vm814_vm8, %v727_v49  ;;  %1120 = vrot.lane.b32.xlu1 %v1057_v46, %s4484_s5  ;;  %v3932_v46 = vld [vmem:[%s4607_s30 + $0xa0] sm:$0xf] }
  0xa8   : > { %1118 = vrot.lane.b32.xlu0 %v1054_v48, %s4484_s5  ;;  %v1457_v48 = vshll.u32 %v3942_v38, 16 }
  0xa9   : > { %v733_v51 = vpop.permute.xlu1 %732 }
  0xaa   : > { %822 = vst.msk [vmem:[#allocation2 + $0x1c] sm:$0xf] %vm814_vm8, %v733_v51  ;;  %v731_v53 = vpop.permute.xlu0 %730  ;;  %v3946_v51 = vld [vmem:[%s4607_s30 + $0x28] sm:$0xf] }
  0xab   : > { %821 = vst.msk [vmem:[#allocation2 + $0x18] sm:$0xf] %vm814_vm8, %v731_v53  ;;  %1254 = vrot.lane.b32.xlu1 %v3908_v50, %s4485_s6  ;;  %v3931_v50 = vld [vmem:[%s4607_s30 + $0x9c] sm:$0xf]  ;;  %v3934_v53 = vld [vmem:[%s4607_s30 + $0xac] sm:$0xf] }
  0xac   : > { %1252 = vrot.lane.b32.xlu0 %v3907_v52, %s4485_s6 }
  0xad   : > { %v737_v55 = vpop.permute.xlu1 %736 }
  0xae   : > { %824 = vst.msk [vmem:[#allocation2 + $0x24] sm:$0xf] %vm814_vm8, %v737_v55  ;;  %v735_v57 = vpop.permute.xlu0 %734  ;;  %v1445_v55 = vrot.slane %v1443_v41, 4  ;;  %v3951_v41 = vld [vmem:[%s4607_s30 + $0x3c] sm:$0xf] }
  0xaf   : > { %823 = vst.msk [vmem:[#allocation2 + $0x20] sm:$0xf] %vm814_vm8, %v735_v57  ;;  %1258 = vrot.lane.b32.xlu1 %v3910_v54, %s4485_s6  ;;  %v5061_v54 = vrot.slane %v1439_v40, 5  ;;  %v3941_v57 = vld [vmem:[%s4607_s30 + $0x14] sm:$0x1] }
  0xb0   : > { %1256 = vrot.lane.b32.xlu0 %v3909_v56, %s4485_s6  ;;  %v3945_v56 = vld [vmem:[%s4607_s30 + $0x24] sm:$0xf] }
  0xb1   : > { %v741_v59 = vpop.permute.xlu1 %740 }
  0xb2   : > { %826 = vst.msk [vmem:[#allocation2 + $0x2c] sm:$0xf] %vm814_vm8, %v741_v59  ;;  %v739_v61 = vpop.permute.xlu0 %738  ;;  %v1435_v59 = vrot.slane %v1433_v43, 5 }
  0xb3   : > { %825 = vst.msk [vmem:[#allocation2 + $0x28] sm:$0xf] %vm814_vm8, %v739_v61  ;;  %1262 = vrot.lane.b32.xlu1 %v3912_v58, %s4485_s6  ;;  %v1432_v58 = vrot.slane %v1430_v42, 4  ;;  %v1469_v61 = vrot.slane %v1467_v45, 4  ;;  %v3950_v45 = vld [vmem:[%s4607_s30 + $0x38] sm:$0x1] }
  0xb4   : > { %1260 = vrot.lane.b32.xlu0 %v3911_v60, %s4485_s6  ;;  %v5067_v60 = vrot.slane %v1463_v44, 5 }
  0xb5   : > { %v745_v0 = vpop.permute.xlu1 %744 }
  0xb6   : > { %828 = vst.msk [vmem:[#allocation2 + $0x34] sm:$0xf] %vm814_vm8, %v745_v0  ;;  %v743_v2 = vpop.permute.xlu0 %742  ;;  %v1456_v0 = vrot.slane %v1454_v47, 4 }
  0xb7   : > { %827 = vst.msk [vmem:[#allocation2 + $0x30] sm:$0xf] %vm814_vm8, %v743_v2  ;;  %1266 = vrot.lane.b32.xlu1 %v3914_v62, %s4485_s6  ;;  %v3944_v62 = vld [vmem:[%s4607_s30 + $0x20] sm:$0x1]  ;;  %v1487_v2 = vshll.u32 %v3946_v51, 16 }
  0xb8   : > { %1264 = vrot.lane.b32.xlu0 %v3913_v1, %s4485_s6  ;;  %v1459_v1 = vrot.slane %v1457_v48, 5 }
  0xb9   : > { %v749_v4 = vpop.permute.xlu1 %748 }
  0xba   : > { %830 = vst.msk [vmem:[#allocation2 + $0x3c] sm:$0xf] %vm814_vm8, %v749_v4  ;;  %v747_v6 = vpop.permute.xlu0 %746 }
  0xbb   : > { %829 = vst.msk [vmem:[#allocation2 + $0x38] sm:$0xf] %vm814_vm8, %v747_v6  ;;  %1270 = vrot.lane.b32.xlu1 %v3916_v3, %s4485_s6  ;;  %v1491_v3 = vshrl.u32 %v3946_v51, 16  ;;  %v1478_v6 = vshrl.u32 %v3945_v56, 16 }
  0xbc   : > { %1268 = vrot.lane.b32.xlu0 %v3915_v5, %s4485_s6  ;;  %v3933_v5 = vld [vmem:[%s4607_s30 + $0xa8] sm:$0xf] }
  0xbd   : > { %v753_v8 = vpop.permute.xlu1 %752 }
  0xbe   : > { %832 = vst.msk [vmem:[#allocation2 + $0x44] sm:$0xf] %vm814_vm8, %v753_v8  ;;  %v751_v10 = vpop.permute.xlu0 %750 }
  0xbf   : > { %831 = vst.msk [vmem:[#allocation2 + $0x40] sm:$0xf] %vm814_vm8, %v751_v10  ;;  %1274 = vrot.lane.b32.xlu1 %v3918_v7, %s4485_s6  ;;  %v1481_v7 = vshll.u32 %v3945_v56, 16  ;;  %v1446_v10 = vor.u32 %v1445_v55, %v5061_v54  ;;  %v1529_v55 = vshll.u32 %v3951_v41, 16 }
  0xc0   : > { %1272 = vrot.lane.b32.xlu0 %v3917_v9, %s4485_s6  ;;  %v3949_v9 = vld [vmem:[%s4607_s30 + $0x34] sm:$0xf] }
  0xc1   : > { %v757_v12 = vpop.permute.xlu1 %756 }
  0xc2   : > { %834 = vst.msk [vmem:[#allocation2 + $0x4c] sm:$0xf] %vm814_vm8, %v757_v12  ;;  %v755_v14 = vpop.permute.xlu0 %754  ;;  %v1436_v12 = vor.u32 %v1435_v59, %v1432_v58  ;;  %v1521_v59 = vshll.u32 %v3950_v45, 16 }
  0xc3   : > { %833 = vst.msk [vmem:[#allocation2 + $0x48] sm:$0xf] %vm814_vm8, %v755_v14  ;;  %1278 = vrot.lane.b32.xlu1 %v3920_v11, %s4485_s6  ;;  %v1449_v11 = vshll.u32 %v3941_v57, 16  ;;  %v3948_v14 = vld [vmem:[%s4607_s30 + $0x30] sm:$0xf] }
  0xc4   : > { %1276 = vrot.lane.b32.xlu0 %v3919_v13, %s4485_s6  ;;  %v1473_v13 = vshll.u32 %v3944_v62, 16 }
  0xc5   : > { %v761_v16 = vpop.permute.xlu1 %760  ;;  %v1451_v34 = vrot.slane %v1449_v11, 5 }
  0xc6   : > { %836 = vst.msk [vmem:[#allocation2 + $0x54] sm:$0xf] %vm814_vm8, %v761_v16  ;;  %v759_v18 = vpop.permute.xlu0 %758  ;;  %v3935_v16 = vld [vmem:[%s4607_s30 + $0xb4] sm:$0xf]  ;;  %v5090_v35 = vrot.slane %v1473_v13, 5 }
  0xc7   : > { %835 = vst.msk [vmem:[#allocation2 + $0x50] sm:$0xf] %vm814_vm8, %v759_v18  ;;  %1282 = vrot.lane.b32.xlu1 %v3922_v15, %s4485_s6  ;;  %v3936_v15 = vld [vmem:[%s4607_s30 + $0xb8] sm:$0xf]  ;;  %v1460_v18 = vor.u32 %v1459_v1, %v1456_v0 }
  0xc8   : > { %1280 = vrot.lane.b32.xlu0 %v3921_v17, %s4485_s6  ;;  %v1470_v17 = vor.u32 %v1469_v61, %v5067_v60  ;;  %v3955_v61 = vld [vmem:[%s4607_s30 + $0x4c] sm:$0xf] }
  0xc9   : > { %v765_v20 = vpop.permute.xlu1 %764  ;;  %v5098_v43 = vrot.slane %v1460_v18, 4  ;;  %v1559_v13 = vshll.u32 %v3955_v61, 16 }
  0xca   : > { %838 = vst.msk [vmem:[#allocation2 + $0x5c] sm:$0xf] %vm814_vm8, %v765_v20  ;;  %v763_v22 = vpop.permute.xlu0 %762  ;;  %v1493_v20 = vrot.slane %v1491_v3, 4  ;;  %v5094_v38 = vrot.slane %v1470_v17, 4 }
  0xcb   : > { %837 = vst.msk [vmem:[#allocation2 + $0x58] sm:$0xf] %vm814_vm8, %v763_v22  ;;  %1286 = vrot.lane.b32.xlu1 %v3924_v19, %s4485_s6  ;;  %v5082_v19 = vrot.slane %v1487_v2, 5  ;;  %v3947_v22 = vld [vmem:[%s4607_s30 + $0x2c] sm:$0x1]  ;;  %v1466_v1 = vsel %vm4618_vm3, %v5098_v43, %v5067_v60 }
  0xcc   : > { %1284 = vrot.lane.b32.xlu0 %v3923_v21, %s4485_s6  ;;  %v1497_v40 = vshll.u32 %v3947_v22, 16  ;;  %v1476_v0 = vsel %vm4618_vm3, %v5094_v38, %v5090_v35  ;;  %v3953_v60 = vld [vmem:[%s4607_s30 + $0x44] sm:$0x1]  ;;  %v1523_v22 = vrot.slane %v1521_v59, 5 }
  0xcd   : > { %v769_v24 = vpop.permute.xlu1 %768 }
  0xce   : > { %840 = vst.msk [vmem:[#allocation2 + $0x64] sm:$0xf] %vm814_vm8, %v769_v24  ;;  %v767_v26 = vpop.permute.xlu0 %766  ;;  %v1483_v24 = vrot.slane %v1481_v7, 5  ;;  %v5112_v58 = vrot.slane %v1497_v40, 5 }
  0xcf   : > { %839 = vst.msk [vmem:[#allocation2 + $0x60] sm:$0xf] %vm814_vm8, %v767_v26  ;;  %1290 = vrot.lane.b32.xlu1 %v3926_v23, %s4485_s6  ;;  %v1480_v23 = vrot.slane %v1478_v6, 4  ;;  %v1515_v26 = vshrl.u32 %v3949_v9, 16 }
  0xd0   : > { %1288 = vrot.lane.b32.xlu0 %v3925_v25, %s4485_s6  ;;  %v1511_v25 = vshll.u32 %v3949_v9, 16 }
  0xd1   : > { %v773_v29 = vpop.permute.xlu1 %772  ;;  %v1484_v44 = vor.u32 %v1483_v24, %v1480_v23  ;;  %v1517_v47 = vrot.slane %v1515_v26, 4 }
  0xd2   : > { %842 = vst.msk [vmem:[#allocation2 + $0x6c] sm:$0xf] %vm814_vm8, %v773_v29  ;;  %v771_v31 = vpop.permute.xlu0 %770  ;;  %v3938_v29 = vld [vmem:[%s4607_s30 + $0xc4] sm:$0xf] }
  0xd3   : > { %841 = vst.msk [vmem:[#allocation2 + $0x68] sm:$0xf] %vm814_vm8, %v771_v31  ;;  %1294 = vrot.lane.b32.xlu1 %v3928_v27, %s4485_s6  ;;  %v1505_v31 = vshll.u32 %v3948_v14, 16  ;;  %v5123_v3 = vrot.slane %v1484_v44, 4 }
  0xd4   : > { %1292 = vrot.lane.b32.xlu0 %v3927_v30, %s4485_s6  ;;  %v1502_v30 = vshrl.u32 %v3948_v14, 16  ;;  %v1563_v14 = vshrl.u32 %v3955_v61, 16 }
  0xd5   : > { %v777_v36 = vpop.permute.xlu1 %776  ;;  %v1490_v26 = vsel %vm4618_vm3, %v5123_v3, %v5082_v19 }
  0xd6   : > { %844 = vst.msk [vmem:[#allocation2 + $0x74] sm:$0xf] %vm814_vm8, %v777_v36  ;;  %v775_v39 = vpop.permute.xlu0 %774  ;;  %v3952_v36 = vld [vmem:[%s4607_s30 + $0x40] sm:$0xf]  ;;  %v1565_v35 = vrot.slane %v1563_v14, 4 }
  0xd7   : > { %843 = vst.msk [vmem:[#allocation2 + $0x70] sm:$0xf] %vm814_vm8, %v775_v39  ;;  %1298 = vrot.lane.b32.xlu1 %v3930_v33, %s4485_s6  ;;  %v1447_v33 = vrot.slane %v1446_v10, 4  ;;  %v1494_v39 = vor.u32 %v1493_v20, %v5082_v19  ;;  %v1535_v51 = vshll.u32 %v3952_v36, 16  ;;  %v3957_v10 = vld [vmem:[%s4607_s30 + $0x54] sm:$0xf] }
  0xd8   : > { %1296 = vrot.lane.b32.xlu0 %v3929_v37, %s4485_s6  ;;  %v1437_v37 = vrot.slane %v1436_v12, 4  ;;  %v1531_v12 = vrot.slane %v1529_v55, 5  ;;  %v1574_v23 = vshrl.u32 %v3957_v10, 16  ;;  %v1577_v24 = vshll.u32 %v3957_v10, 16 }
  0xd9   : > { %v781_v49 = vpop.permute.xlu1 %780  ;;  %v1452_v56 = vsel %vm4618_vm3, %v1447_v33, %v1451_v34  ;;  %v1495_v2 = vrot.slane %v1494_v39, 4  ;;  %v5148_v34 = vrot.slane %v1559_v13, 5 }
  0xda   : > { %846 = vst.msk [vmem:[#allocation2 + $0x7c] sm:$0xf] %vm814_vm8, %v781_v49  ;;  %v779_v52 = vpop.permute.xlu0 %778  ;;  %v1504_v49 = vrot.slane %v1502_v30, 4  ;;  %v1442_v57 = vsel %vm4618_vm3, %v1437_v37, %v5061_v54  ;;  %v3954_v54 = vld [vmem:[%s4607_s30 + $0x48] sm:$0xf]  ;;  %v1545_v30 = vshll.u32 %v3953_v60, 16 }
  0xdb   : > { %845 = vst.msk [vmem:[#allocation2 + $0x78] sm:$0xf] %vm814_vm8, %v779_v52  ;;  %1302 = vrot.lane.b32.xlu1 %v3932_v46, %s4485_s6  ;;  %v5101_v46 = vrot.slane %v1511_v25, 5  ;;  %v1539_v52 = vshrl.u32 %v3952_v36, 16  ;;  %v3960_v36 = vld [vmem:[%s4607_s30 + $0x60] sm:$0xf]  ;;  %v1566_v59 = vor.u32 %v1565_v35, %v5148_v34 }
  0xdc   : > { %1300 = vrot.lane.b32.xlu0 %v3931_v50, %s4485_s6  ;;  %v1507_v50 = vrot.slane %v1505_v31, 5  ;;  %v3961_v31 = vld [vmem:[%s4607_s30 + $0x64] sm:$0xf]  ;;  %v3956_v37 = vld [vmem:[%s4607_s30 + $0x50] sm:$0x1]  ;;  %v1576_v43 = vrot.slane %v1574_v23, 4 }
  0xdd   : > { %v1061_v4 = vpop.permute.xlu1 %1060  ;;  %v1518_v6 = vor.u32 %v1517_v47, %v5101_v46  ;;  %v1541_v9 = vrot.slane %v1539_v52, 4  ;;  %v1579_v44 = vrot.slane %v1577_v24, 5  ;;  %v1607_v45 = vshll.u32 %v3961_v31, 16 }
  0xde   : > { %1156 = vst.msk [vmem:[#allocation2 + $0x4] sm:$0xf] %vm1154_vm9, %v1061_v4  ;;  %v1059_v8 = vpop.permute.xlu0 %1058  ;;  %v3958_v4 = vld [vmem:[%s4607_s30 + $0x58] sm:$0xf]  ;;  %v1508_v7 = vor.u32 %v1507_v50, %v1504_v49  ;;  %v1611_v47 = vshrl.u32 %v3961_v31, 16  ;;  %v1547_v49 = vrot.slane %v1545_v30, 5 }
  0xdf   : > { %1155 = vst.msk [vmem:[#allocation2] sm:$0xf] %vm1154_vm9, %v1059_v8  ;;  %1306 = vrot.lane.b32.xlu1 %v3934_v53, %s4485_s6  ;;  %v1526_v53 = vshrl.u32 %v3951_v41, 16  ;;  %v5129_v8 = vrot.slane %v1535_v51, 5  ;;  %v1583_v17 = vshll.u32 %v3958_v4, 16  ;;  %v1587_v18 = vshrl.u32 %v3958_v4, 16 }
  0xe0   : > { %1304 = vrot.lane.b32.xlu0 %v3933_v5, %s4485_s6  ;;  %v1598_v50 = vshrl.u32 %v3960_v36, 16  ;;  %v1601_v51 = vshll.u32 %v3960_v36, 16  ;;  %v1580_v3 = vor.u32 %v1579_v44, %v1576_v43  ;;  %v1613_v4 = vrot.slane %v1611_v47, 4  ;;  %v3965_v31 = vld [vmem:[%s4607_s30 + $0x74] sm:$0x1] }
  0xe1   : > { %v1065_v21 = vpop.permute.xlu1 %1064  ;;  %v1528_v11 = vrot.slane %v1526_v53, 4  ;;  %v5153_v39 = vrot.slane %v1583_v17, 5  ;;  %v1589_v40 = vrot.slane %v1587_v18, 4  ;;  %v3967_v17 = vld [vmem:[%s4607_s30 + $0x7c] sm:$0xf] }
  0xe2   : > { %1158 = vst.msk [vmem:[#allocation2 + $0xc] sm:$0xf] %vm1154_vm9, %v1065_v21  ;;  %v1063_v27 = vpop.permute.xlu0 %1062  ;;  %v1500_v21 = vsel %vm4618_vm3, %v1495_v2, %v5112_v58  ;;  %v3966_v18 = vld [vmem:[%s4607_s30 + $0x78] sm:$0xf]  ;;  %v1655_v35 = vshll.u32 %v3967_v17, 16  ;;  %v1659_v36 = vshrl.u32 %v3967_v17, 16 }
  0xe3   : > { %1157 = vst.msk [vmem:[#allocation2 + $0x8] sm:$0xf] %vm1154_vm9, %v1063_v27  ;;  %1310 = vrot.lane.b32.xlu1 %v3936_v15, %s4485_s6  ;;  %v1550_v15 = vshrl.u32 %v3954_v54, 16  ;;  %v1519_v27 = vrot.slane %v1518_v6, 4  ;;  %v1532_v33 = vor.u32 %v1531_v12, %v1528_v11  ;;  %v1590_v2 = vor.u32 %v1589_v40, %v5153_v39  ;;  %v3969_v47 = vld [vmem:[%s4607_s30 + $0x84] sm:$0xf] }
  0xe4   : > { %1308 = vrot.lane.b32.xlu0 %v3935_v16, %s4485_s6  ;;  %v1553_v16 = vshll.u32 %v3954_v54, 16  ;;  %v5169_v54 = vrot.slane %v1607_v45, 5  ;;  %v1600_v6 = vrot.slane %v1598_v50, 4 }
  0xe5   : > { %v1069_v42 = vpop.permute.xlu1 %1068  ;;  %v1552_v19 = vrot.slane %v1550_v15, 4  ;;  %v1524_v52 = vsel %vm4618_vm3, %v1519_v27, %v1523_v22  ;;  %v1533_v58 = vrot.slane %v1532_v33, 4  ;;  %v1567_v15 = vrot.slane %v1566_v59, 4  ;;  %v3968_v59 = vld [vmem:[%s4607_s30 + $0x80] sm:$0x1] }
  0xe6   : > { %1160 = vst.msk [vmem:[#allocation2 + $0x14] sm:$0xf] %vm1154_vm9, %v1069_v42  ;;  %v1067_v48 = vpop.permute.xlu0 %1066  ;;  %v1555_v38 = vrot.slane %v1553_v16, 5  ;;  %v3959_v42 = vld [vmem:[%s4607_s30 + $0x5c] sm:$0x1]  ;;  %v1591_v22 = vrot.slane %v1590_v2, 4  ;;  %v1614_v23 = vor.u32 %v1613_v4, %v5169_v54 }
  0xe7   : > { %1159 = vst.msk [vmem:[#allocation2 + $0x10] sm:$0xf] %vm1154_vm9, %v1067_v48  ;;  %1314 = vrot.lane.b32.xlu1 %v3938_v29, %s4485_s6  ;;  %v1509_v29 = vrot.slane %v1508_v7, 4  ;;  %v1603_v7 = vrot.slane %v1601_v51, 5  ;;  %v1538_v14 = vsel %vm4618_vm3, %v1533_v58, %v5129_v8  ;;  %v1581_v27 = vrot.slane %v1580_v3, 4 }
  0xe8   : > { %1312 = vrot.lane.b32.xlu0 %v3937_v32, %s4485_s6  ;;  %v1542_v32 = vor.u32 %v1541_v9, %v5129_v8  ;;  %v1556_v61 = vor.u32 %v1555_v38, %v1552_v19  ;;  %v1646_v19 = vshrl.u32 %v3966_v18, 16  ;;  %v1649_v38 = vshll.u32 %v3966_v18, 16  ;;  %v3972_v58 = vld [vmem:[%s4607_s30 + $0x90] sm:$0xf]  ;;  %v3971_v2 = vld [vmem:[%s4607_s30 + $0x8c] sm:$0x1] }
  0xe9   : > { %v1073_v62 = vpop.permute.xlu1 %1072  ;;  %v1514_v53 = vsel %vm4618_vm3, %v1509_v29, %v5101_v46  ;;  %v1604_v29 = vor.u32 %v1603_v7, %v1600_v6  ;;  %v1615_v50 = vrot.slane %v1614_v23, 4  ;;  %v1673_v4 = vshll.u32 %v3969_v47, 16 }
  0xea   : > { %1162 = vst.msk [vmem:[#allocation2 + $0x1c] sm:$0xf] %vm1154_vm9, %v1073_v62  ;;  %v1071_v5 = vpop.permute.xlu0 %1070  ;;  %v1543_v55 = vrot.slane %v1542_v32, 4  ;;  %v1593_v62 = vshll.u32 %v3959_v42, 16  ;;  %v1689_v18 = vshll.u32 %v3971_v2, 16 }
  0xeb   : > { %1161 = vst.msk [vmem:[#allocation2 + $0x18] sm:$0xf] %vm1154_vm9, %v1071_v5  ;;  %1815 = vrot.lane.b32.xlu1 %v1452_v56, %s4486_s7  ;;  %v1569_v56 = vshll.u32 %v3956_v37, 16  ;;  %v3962_v5 = vld [vmem:[%s4607_s30 + $0x68] sm:$0x1]  ;;  %v1605_v51 = vrot.slane %v1604_v29, 4 }
  0xec   : > { %1813 = vrot.lane.b32.xlu0 %v1442_v57, %s4486_s7  ;;  %v3964_v57 = vld [vmem:[%s4607_s30 + $0x70] sm:$0xf]  ;;  %v1548_v13 = vsel %vm4618_vm3, %v1543_v55, %v1547_v49  ;;  %v5181_v16 = vrot.slane %v1593_v62, 5  ;;  %v1617_v24 = vshll.u32 %v3962_v5, 16  ;;  %v1586_v49 = vsel %vm4618_vm3, %v1581_v27, %v5153_v39  ;;  %v3974_v27 = vld [vmem:[%s4607_s30 + $0x98] sm:$0x1] }
  0xed   : > { %v1077_v20 = vpop.permute.xlu1 %1076  ;;  %v1631_v9 = vshll.u32 %v3964_v57, 16  ;;  %v1635_v10 = vshrl.u32 %v3964_v57, 16  ;;  %v1571_v60 = vrot.slane %v1569_v56, 5  ;;  %v5211_v56 = vrot.slane %v1655_v35, 5 }
  0xee   : > { %1164 = vst.msk [vmem:[#allocation2 + $0x24] sm:$0xf] %vm1154_vm9, %v1077_v20  ;;  %v1075_v25 = vpop.permute.xlu0 %1074  ;;  %v1596_v43 = vsel %vm4618_vm3, %v1591_v22, %v5181_v16  ;;  %v1619_v44 = vrot.slane %v1617_v24, 5  ;;  %v1661_v57 = vrot.slane %v1659_v36, 4  ;;  %v1648_v39 = vrot.slane %v1646_v19, 4 }
  0xef   : > { %1163 = vst.msk [vmem:[#allocation2 + $0x20] sm:$0xf] %vm1154_vm9, %v1075_v25  ;;  %1819 = vrot.lane.b32.xlu1 %v1476_v0, %s4486_s7  ;;  %v3963_v0 = vld [vmem:[%s4607_s30 + $0x6c] sm:$0xf]  ;;  %v3970_v25 = vld [vmem:[%s4607_s30 + $0x88] sm:$0xf]  ;;  %v1572_v37 = vsel %vm4618_vm3, %v1567_v15, %v1571_v60 }
  0xf0   : > { %1817 = vrot.lane.b32.xlu0 %v1466_v1, %s4486_s7  ;;  %v1622_v11 = vshrl.u32 %v3963_v0, 16  ;;  %v1625_v12 = vshll.u32 %v3963_v0, 16  ;;  %v5188_v30 = vrot.slane %v1631_v9, 5  ;;  %v1637_v8 = vrot.slane %v1635_v10, 4  ;;  %v3976_v15 = vld [vmem:[%s4607_s30 + $0xa0] sm:$0xf] }
  0xf1   : > { %v1081_v41 = vpop.permute.xlu1 %1080  ;;  %v1679_v40 = vshll.u32 %v3970_v25, 16  ;;  %v1683_v45 = vshrl.u32 %v3970_v25, 16  ;;  %v1670_v0 = vshrl.u32 %v3969_v47, 16  ;;  %v1620_v7 = vsel %vm4618_vm3, %v1615_v50, %v1619_v44 }
  0xf2   : > { %1166 = vst.msk [vmem:[#allocation2 + $0x2c] sm:$0xf] %vm1154_vm9, %v1081_v41  ;;  %v1079_v48 = vpop.permute.xlu0 %1078  ;;  %v1624_v32 = vrot.slane %v1622_v11, 4  ;;  %v1627_v33 = vrot.slane %v1625_v12, 5  ;;  %v1694_v10 = vshrl.u32 %v3972_v58, 16  ;;  %v1697_v60 = vshll.u32 %v3972_v58, 16 }
  0xf3   : > { %1165 = vst.msk [vmem:[#allocation2 + $0x28] sm:$0xf] %vm1154_vm9, %v1079_v48  ;;  %1823 = vrot.lane.b32.xlu1 %v1500_v21, %s4486_s7  ;;  %v1557_v21 = vrot.slane %v1556_v61, 4  ;;  %v1651_v61 = vrot.slane %v1649_v38, 5  ;;  %v5216_v62 = vrot.slane %v1679_v40, 5  ;;  %v1685_v3 = vrot.slane %v1683_v45, 4 }
  0xf4   : > { %1821 = vrot.lane.b32.xlu0 %v1490_v26, %s4486_s7  ;;  %v1628_v55 = vor.u32 %v1627_v33, %v1624_v32  ;;  %v1610_v11 = vsel %vm4618_vm3, %v1605_v51, %v5169_v54  ;;  %v1662_v16 = vor.u32 %v1661_v57, %v5211_v56  ;;  %v1675_v24 = vrot.slane %v1673_v4, 5  ;;  %v3982_v4 = vld [vmem:[%s4607_s30 + $0xb8] sm:$0xf] }
  0xf5   : > { %v1085_v1 = vpop.permute.xlu1 %1084  ;;  %v1562_v42 = vsel %vm4618_vm3, %v1557_v21, %v5148_v34  ;;  %v3973_v34 = vld [vmem:[%s4607_s30 + $0x94] sm:$0xf]  ;;  %v1652_v17 = vor.u32 %v1651_v61, %v1648_v39  ;;  %v3975_v21 = vld [vmem:[%s4607_s30 + $0x9c] sm:$0xf]  ;;  %v1686_v23 = vor.u32 %v1685_v3, %v5216_v62  ;;  %v1696_v29 = vrot.slane %v1694_v10, 4 }
  0xf6   : > { %1168 = vst.msk [vmem:[#allocation2 + $0x34] sm:$0xf] %vm1154_vm9, %v1085_v1  ;;  %v1083_v46 = vpop.permute.xlu0 %1082  ;;  %v1707_v5 = vshrl.u32 %v3973_v34, 16  ;;  %v1731_v32 = vshrl.u32 %v3976_v15, 16  ;;  %v1718_v35 = vshrl.u32 %v3975_v21, 16  ;;  %v1721_v36 = vshll.u32 %v3975_v21, 16 }
  0xf7   : > { %1167 = vst.msk [vmem:[#allocation2 + $0x30] sm:$0xf] %vm1154_vm9, %v1083_v46  ;;  %1827 = vrot.lane.b32.xlu1 %v1524_v52, %s4486_s7  ;;  %v1641_v52 = vshll.u32 %v3965_v31, 16  ;;  %v1703_v46 = vshll.u32 %v3973_v34, 16  ;;  %v1727_v31 = vshll.u32 %v3976_v15, 16  ;;  %v1663_v38 = vrot.slane %v1662_v16, 4 }
  0xf8   : > { %1825 = vrot.lane.b32.xlu0 %v1514_v53, %s4486_s7  ;;  %v1638_v53 = vor.u32 %v1637_v8, %v5188_v30  ;;  %v1709_v54 = vrot.slane %v1707_v5, 4  ;;  %v1699_v8 = vrot.slane %v1697_v60, 5  ;;  %v1691_v40 = vrot.slane %v1689_v18, 5  ;;  %v3981_v10 = vld [vmem:[%s4607_s30 + $0xb4] sm:$0xf] }
  0xf9   : > { %v1089_v20 = vpop.permute.xlu1 %1088  ;;  %v1643_v9 = vrot.slane %v1641_v52, 5  ;;  %v5232_v25 = vrot.slane %v1703_v46, 5  ;;  %v1687_v44 = vrot.slane %v1686_v23, 4  ;;  %v1713_v47 = vshll.u32 %v3974_v27, 16 }
  0xfa   : > { %1170 = vst.msk [vmem:[#allocation2 + $0x3c] sm:$0xf] %vm1154_vm9, %v1089_v20  ;;  %v1087_v26 = vpop.permute.xlu0 %1086  ;;  %v1639_v12 = vrot.slane %v1638_v53, 4  ;;  %v1672_v20 = vrot.slane %v1670_v0, 4  ;;  %v1700_v51 = vor.u32 %v1699_v8, %v1696_v29  ;;  %v5248_v52 = vrot.slane %v1727_v31, 5 }
  0xfb   : > { %1169 = vst.msk [vmem:[#allocation2 + $0x38] sm:$0xf] %vm1154_vm9, %v1087_v26  ;;  %1831 = vrot.lane.b32.xlu1 %v1548_v13, %s4486_s7  ;;  %v1629_v13 = vrot.slane %v1628_v55, 4  ;;  %v1710_v50 = vor.u32 %v1709_v54, %v5232_v25  ;;  %v1733_v34 = vrot.slane %v1731_v32, 4  ;;  %v1720_v53 = vrot.slane %v1718_v35, 4 }
  0xfc   : > { %1829 = vrot.lane.b32.xlu0 %v1538_v14, %s4486_s7  ;;  %v1665_v14 = vshll.u32 %v3968_v59, 16  ;;  %v1676_v45 = vor.u32 %v1675_v24, %v1672_v20  ;;  %v1723_v55 = vrot.slane %v1721_v36, 5  ;;  %v1715_v3 = vrot.slane %v1713_v47, 5 }
  0xfd   : > { %v1093_v41 = vpop.permute.xlu1 %1092  ;;  %v1634_v19 = vsel %vm4618_vm3, %v1629_v13, %v5188_v30  ;;  %v3977_v30 = vld [vmem:[%s4607_s30 + $0xa4] sm:$0x1]  ;;  %v1692_v5 = vsel %vm4618_vm3, %v1687_v44, %v1691_v40  ;;  %v3980_v13 = vld [vmem:[%s4607_s30 + $0xb0] sm:$0x1]  ;;  %v1775_v16 = vshll.u32 %v3982_v4, 16  ;;  %v1766_v21 = vshrl.u32 %v3981_v10, 16 }
  0xfe   : > { %1172 = vst.msk [vmem:[#allocation2 + $0x44] sm:$0xf] %vm1154_vm9, %v1093_v41  ;;  %v1091_v48 = vpop.permute.xlu0 %1090  ;;  %v1667_v33 = vrot.slane %v1665_v14, 5  ;;  %v3979_v41 = vld [vmem:[%s4607_s30 + $0xac] sm:$0xf]  ;;  %v1677_v2 = vrot.slane %v1676_v45, 4  ;;  %v1724_v60 = vor.u32 %v1723_v55, %v1720_v53 }
  0xff   : > { %1171 = vst.msk [vmem:[#allocation2 + $0x40] sm:$0xf] %vm1154_vm9, %v1091_v48  ;;  %1835 = vrot.lane.b32.xlu1 %v1572_v37, %s4486_s7  ;;  %v1644_v37 = vsel %vm4618_vm3, %v1639_v12, %v1643_v9  ;;  %v3978_v48 = vld [vmem:[%s4607_s30 + $0xa8] sm:$0xf]  ;;  %v1751_v57 = vshll.u32 %v3979_v41, 16  ;;  %v1755_v58 = vshrl.u32 %v3979_v41, 16 }
 0x100   : > { %1833 = vrot.lane.b32.xlu0 %v1562_v42, %s4486_s7  ;;  %v1668_v59 = vsel %vm4618_vm3, %v1663_v38, %v1667_v33  ;;  %v1742_v39 = vshrl.u32 %v3978_v48, 16  ;;  %v1745_v61 = vshll.u32 %v3978_v48, 16  ;;  %v1737_v9 = vshll.u32 %v3977_v30, 16  ;;  %v3985_v55 = vld [vmem:[%s4607_s30 + $0xc4] sm:$0xf] }
 0x101   : > { %v1097_v1 = vpop.permute.xlu1 %1096  ;;  %v1757_v12 = vrot.slane %v1755_v58, 4  ;;  %v1682_v20 = vsel %vm4618_vm3, %v1677_v2, %v5216_v62  ;;  %v1725_v29 = vrot.slane %v1724_v60, 4  ;;  %v1761_v8 = vshll.u32 %v3980_v13, 16  ;;  %v4011_v60 = vld [vmem:[%s4607_s30 + $0x6c] sm:$0xe] }
 0x102   : > { %1174 = vst.msk [vmem:[#allocation2 + $0x4c] sm:$0xf] %vm1154_vm9, %v1097_v1  ;;  %v1095_v6 = vpop.permute.xlu0 %1094  ;;  %v1744_v14 = vrot.slane %v1742_v39, 4  ;;  %v1747_v15 = vrot.slane %v1745_v61, 5  ;;  %v1739_v54 = vrot.slane %v1737_v9, 5  ;;  %v1777_v33 = vrot.slane %v1775_v16, 5 }
 0x103   : > { %1173 = vst.msk [vmem:[#allocation2 + $0x48] sm:$0xf] %vm1154_vm9, %v1095_v6  ;;  %1839 = vrot.lane.b32.xlu1 %v1596_v43, %s4486_s7  ;;  %v1653_v43 = vrot.slane %v1652_v17, 4  ;;  %v1711_v6 = vrot.slane %v1710_v50, 4  ;;  %v1779_v17 = vshrl.u32 %v3982_v4, 16  ;;  %v1730_v44 = vsel %vm4618_vm3, %v1725_v29, %v5248_v52 }
 0x104   : > { %1837 = vrot.lane.b32.xlu0 %v1586_v49, %s4486_s7  ;;  %v1748_v32 = vor.u32 %v1747_v15, %v1744_v14  ;;  %v3989_v13 = vld [vmem:[%s4607_s30 + $0x14] sm:$0x1]  ;;  %v4043_v15 = vrot.slane %v4011_v60, 9 }
 0x105   : > { %v1101_v22 = vpop.permute.xlu1 %1100  ;;  %v1658_v1 = vsel %vm4618_vm3, %v1653_v43, %v5211_v56  ;;  %v1701_v56 = vrot.slane %v1700_v51, 4  ;;  %v1716_v24 = vsel %vm4618_vm3, %v1711_v6, %v1715_v3  ;;  %v1781_v35 = vrot.slane %v1779_v17, 4 }
 0x106   : > { %1176 = vst.msk [vmem:[#allocation2 + $0x54] sm:$0xf] %vm1154_vm9, %v1101_v22  ;;  %v1099_v26 = vpop.permute.xlu0 %1098  ;;  %v1769_v22 = vshll.u32 %v3981_v10, 16  ;;  %v1763_v43 = vrot.slane %v1761_v8, 5  ;;  %v1749_v50 = vrot.slane %v1748_v32, 4  ;;  %v1799_v3 = vshll.u32 %v3985_v55, 16 }
 0x107   : > { %1175 = vst.msk [vmem:[#allocation2 + $0x50] sm:$0xf] %vm1154_vm9, %v1099_v26  ;;  %1843 = vrot.lane.b32.xlu1 %v1620_v7, %s4486_s7  ;;  %v1734_v7 = vor.u32 %v1733_v34, %v5248_v52  ;;  %v3984_v26 = vld [vmem:[%s4607_s30 + $0xc0] sm:$0xf]  ;;  %v1706_v27 = vsel %vm4618_vm3, %v1701_v56, %v5232_v25  ;;  %v1782_v47 = vor.u32 %v1781_v35, %v1777_v33  ;;  %v4015_v35 = vld [vmem:[%s4607_s30 + $0x7c] sm:$0xf] }
 0x108   : > { %1841 = vrot.lane.b32.xlu0 %v1610_v11, %s4486_s7  ;;  %v5267_v11 = vrot.slane %v1751_v57, 5  ;;  %v1771_v38 = vrot.slane %v1769_v22, 5  ;;  %v1790_v40 = vshrl.u32 %v3984_v26, 16  ;;  %v1793_v41 = vshll.u32 %v3984_v26, 16  ;;  %v3990_v22 = vld [vmem:[%s4607_s30 + $0x18] sm:$0xe] }
 0x109   : > { %v1105_v42 = vpop.permute.xlu1 %1104  ;;  %v1735_v62 = vrot.slane %v1734_v7, 4  ;;  %v1783_v57 = vrot.slane %v1782_v47, 4  ;;  %v5315_v56 = vrot.slane %v1799_v3, 5 }
 0x10a   : > { %1178 = vst.msk [vmem:[#allocation2 + $0x5c] sm:$0xf] %vm1154_vm9, %v1105_v42  ;;  %v1103_v49 = vpop.permute.xlu0 %1102  ;;  %v1758_v31 = vor.u32 %v1757_v12, %v5267_v11  ;;  %v1792_v34 = vrot.slane %v1790_v40, 4  ;;  %v1795_v30 = vrot.slane %v1793_v41, 5  ;;  %v1754_v39 = vsel %vm4618_vm3, %v1749_v50, %v5267_v11  ;;  %v4012_v11 = vld [vmem:[%s4607_s30 + $0x70] sm:$0xf] }
 0x10b   : > { %1177 = vst.msk [vmem:[#allocation2 + $0x58] sm:$0xf] %vm1154_vm9, %v1103_v49  ;;  %1847 = vrot.lane.b32.xlu1 %v1644_v37, %s4486_s7  ;;  %v3983_v37 = vld [vmem:[%s4607_s30 + $0xbc] sm:$0x1]  ;;  %v1740_v25 = vsel %vm4618_vm3, %v1735_v62, %v1739_v54  ;;  %v2096_v16 = vrot.slane %v4012_v11, 5  ;;  %v2103_v40 = vrot.slane %v4015_v35, 5 }
 0x10c   : > { %1845 = vrot.lane.b32.xlu0 %v1634_v19, %s4486_s7  ;;  %v1768_v19 = vrot.slane %v1766_v21, 4  ;;  %v1759_v45 = vrot.slane %v1758_v31, 4  ;;  %v1785_v48 = vshll.u32 %v3983_v37, 16  ;;  %v1796_v2 = vor.u32 %v1795_v30, %v1792_v34  ;;  %v4013_v54 = vld [vmem:[%s4607_s30 + $0x74] sm:$0x1] }
 0x10d   : > { %v1109_v0 = vpop.permute.xlu1 %1108  ;;  %v2043_v21 = vrot.slane %v3989_v13, 5  ;;  %v2097_v26 = vsel %vm4762_vm7, %v4043_v15, %v2096_v16  ;;  %v2098_v31 = vrot.slane %v2096_v16, 4  ;;  %v2099_v32 = vrot.slane %v4013_v54, 5  ;;  %v3992_v37 = vld [vmem:[%s4607_s30 + $0x20] sm:$0x1] }
 0x10e   : > { %1180 = vst.msk [vmem:[#allocation2 + $0x64] sm:$0xf] %vm1154_vm9, %v1109_v0  ;;  %v1107_v46 = vpop.permute.xlu0 %1106  ;;  %v1772_v51 = vor.u32 %v1771_v38, %v1768_v19  ;;  %v1764_v52 = vsel %vm4618_vm3, %v1759_v45, %v1763_v43  ;;  %v1787_v58 = vrot.slane %v1785_v48, 5  ;;  %v3987_v0 = vld [vmem:[%s4607_s30 + $0xc] sm:$0xe]  ;;  %v1797_v10 = vrot.slane %v1796_v2, 4 }
 0x10f   : > { %1179 = vst.msk [vmem:[#allocation2 + $0x60] sm:$0xf] %vm1154_vm9, %v1107_v46  ;;  %1851 = vrot.lane.b32.xlu1 %v1668_v59, %s4486_s7  ;;  %v2050_v43 = vrot.slane %v3992_v37, 5  ;;  %v4016_v45 = vld [vmem:[%s4607_s30 + $0x80] sm:$0x1] }
 0x110   : > { %1849 = vrot.lane.b32.xlu0 %v1658_v1, %s4486_s7  ;;  %v1773_v61 = vrot.slane %v1772_v51, 4  ;;  %v3988_v1 = vld [vmem:[%s4607_s30 + $0x10] sm:$0xf]  ;;  %v1788_v46 = vsel %vm4618_vm3, %v1783_v57, %v1787_v58  ;;  %v4083_v48 = vld [vmem:[%s4607_s30 + $0x18] sm:$0xf]  ;;  %v2105_v51 = vrot.slane %v2103_v40, 4 }
 0x111   : > { %v1113_v18 = vpop.permute.xlu1 %1112  ;;  %v2040_v6 = vrot.slane %v3988_v1, 5  ;;  %v2106_v34 = vrot.slane %v4016_v45, 5  ;;  %v2522_v55 = vshrl.u32 %v4083_v48, 16  ;;  %v4107_v57 = vld [vmem:[%s4607_s30 + $0x78] sm:$0xf] }
 0x112   : > { %1182 = vst.msk [vmem:[#allocation2 + $0x6c] sm:$0xf] %vm1154_vm9, %v1113_v18  ;;  %v1111_v23 = vpop.permute.xlu0 %1110  ;;  %v1778_v9 = vsel %vm4618_vm3, %v1773_v61, %v1777_v33  ;;  %v1802_v18 = vsel %vm4618_vm3, %v1797_v10, %v5315_v56  ;;  %v4014_v33 = vld [vmem:[%s4607_s30 + $0x78] sm:$0xe]  ;;  %v2714_v1 = vshrl.u32 %v4107_v57, 16 }
 0x113   : > { %1181 = vst.msk [vmem:[#allocation2 + $0x68] sm:$0xf] %vm1154_vm9, %v1111_v23  ;;  %1855 = vrot.lane.b32.xlu1 %v1692_v5, %s4486_s7  ;;  %v4035_v5 = vrot.slane %v3987_v0, 9  ;;  %v3991_v23 = vld [vmem:[%s4607_s30 + $0x1c] sm:$0xf]  ;;  %v4044_v38 = vrot.slane %v4014_v33, 9 }
 0x114   : > { %1853 = vrot.lane.b32.xlu0 %v1682_v20, %s4486_s7  ;;  %v2042_v20 = vrot.slane %v2040_v6, 4  ;;  %v2047_v62 = vrot.slane %v3991_v23, 5  ;;  %v4051_v58 = vld [vmem:[%s4607_s30 + $0x18] sm:$0xf]  ;;  %v2524_v2 = vrot.slane %v2522_v55, 4 }
 0x115   : > { %v1117_v36 = vpop.permute.xlu1 %1116  ;;  %v2041_v14 = vsel %vm4762_vm7, %v4035_v5, %v2040_v6  ;;  %v2104_v47 = vsel %vm4762_vm7, %v4044_v38, %v2103_v40  ;;  %v2717_v5 = vshll.u32 %v4107_v57, 16  ;;  %v4067_v6 = vld [vmem:[%s4607_s30 + $0x78] sm:$0xf]  ;;  %v4052_v10 = vld [vmem:[%s4607_s30 + $0x1c] sm:$0xf] }
 0x116   : > { %1184 = vst.msk [vmem:[#allocation2 + $0x74] sm:$0xf] %vm1154_vm9, %v1117_v36  ;;  %v1115_v42 = vpop.permute.xlu0 %1114  ;;  %v2044_v8 = vsel %vm4762_vm7, %v2042_v20, %v2043_v21  ;;  %v4085_v16 = vld [vmem:[%s4607_s30 + $0x20] sm:$0x1]  ;;  %v4053_v20 = vld [vmem:[%s4607_s30 + $0x24] sm:$0xf] }
 0x117   : > { %1183 = vst.msk [vmem:[#allocation2 + $0x70] sm:$0xf] %vm1154_vm9, %v1115_v42  ;;  %1859 = vrot.lane.b32.xlu1 %v1716_v24, %s4486_s7  ;;  %v2100_v42 = vsel %vm4762_vm7, %v2098_v31, %v2099_v32  ;;  %v2719_v15 = vrot.slane %v2717_v5, 5  ;;  %v4110_v54 = vld [vmem:[%s4607_s30 + $0x84] sm:$0xf] }
 0x118   : > { %1857 = vrot.lane.b32.xlu0 %v1706_v27, %s4486_s7  ;;  %v4036_v27 = vrot.slane %v3990_v22, 9  ;;  %v4069_v31 = vld [vmem:[%s4607_s30 + $0x84] sm:$0xf]  ;;  %v2738_v40 = vshrl.u32 %v4110_v54, 16 }
 0x119   : > { %v1121_v49 = vpop.permute.xlu1 %1120 }
 0x11a   : > { %1186 = vst.msk [vmem:[#allocation2 + $0x7c] sm:$0xf] %vm1154_vm9, %v1121_v49  ;;  %v1119_v53 = vpop.permute.xlu0 %1118  ;;  %v2048_v19 = vsel %vm4762_vm7, %v4036_v27, %v2047_v62 }
 0x11b   : > { %1185 = vst.msk [vmem:[#allocation2 + $0x78] sm:$0xf] %vm1154_vm9, %v1119_v53  ;;  %1863 = vrot.lane.b32.xlu1 %v1740_v25, %s4486_s7  ;;  %v2049_v25 = vrot.slane %v2047_v62, 4  ;;  %v4084_v53 = vld [vmem:[%s4607_s30 + $0x1c] sm:$0xf]  ;;  %v2541_v62 = vshll.u32 %v4085_v16, 16 }
 0x11c   : > { %1861 = vrot.lane.b32.xlu0 %v1730_v44, %s4486_s7  ;;  %v2531_v0 = vshll.u32 %v4084_v53, 16  ;;  %v4112_v16 = vld [vmem:[%s4607_s30 + $0x8c] sm:$0x1] }
 0x11d   : > { %v1255_v59 = vpop.permute.xlu1 %1254  ;;  %v2051_v50 = vsel %vm4762_vm7, %v2049_v25, %v2050_v43  ;;  %v4054_v25 = vld [vmem:[%s4607_s30 + $0x28] sm:$0xf] }
 0x11e   : > { %1350 = vst.msk [vmem:[#allocation2 + $0x4] sm:$0xf] %vm1348_vm10, %v1255_v59  ;;  %v1253_v4 = vpop.permute.xlu0 %1252  ;;  %v5379_v11 = vrot.slane %v2531_v0, 5 }
 0x11f   : > { %1349 = vst.msk [vmem:[#allocation2] sm:$0xf] %vm1348_vm10, %v1253_v4  ;;  %1867 = vrot.lane.b32.xlu1 %v1764_v52, %s4486_s7  ;;  %v2525_v52 = vshll.u32 %v4083_v48, 16  ;;  %v2535_v4 = vshrl.u32 %v4084_v53, 16  ;;  %v4111_v48 = vld [vmem:[%s4607_s30 + $0x88] sm:$0xf] }
 0x120   : > { %1865 = vrot.lane.b32.xlu0 %v1754_v39, %s4486_s7  ;;  %v2107_v39 = vsel %vm4762_vm7, %v2105_v51, %v2106_v34  ;;  %v2751_v0 = vshrl.u32 %v4111_v48, 16 }
 0x121   : > { %v1259_v7 = vpop.permute.xlu1 %1258  ;;  %v2527_v3 = vrot.slane %v2525_v52, 5  ;;  %v2740_v52 = vrot.slane %v2738_v40, 4  ;;  %v4156_v40 = vld [vmem:[%s4607_s30 + $0x7c] sm:$0xf] }
 0x122   : > { %1352 = vst.msk [vmem:[#allocation2 + $0xc] sm:$0xf] %vm1348_vm10, %v1259_v7  ;;  %v1257_v12 = vpop.permute.xlu0 %1256  ;;  %v4086_v7 = vld [vmem:[%s4607_s30 + $0x24] sm:$0xf] }
 0x123   : > { %1351 = vst.msk [vmem:[#allocation2 + $0x8] sm:$0xf] %vm1348_vm10, %v1257_v12  ;;  %1871 = vrot.lane.b32.xlu1 %v1788_v46, %s4486_s7  ;;  %v4108_v46 = vld [vmem:[%s4607_s30 + $0x7c] sm:$0xf]  ;;  %v2716_v12 = vrot.slane %v2714_v1, 4  ;;  %v2549_v22 = vshll.u32 %v4086_v7, 16 }
 0x124   : > { %1869 = vrot.lane.b32.xlu0 %v1778_v9, %s4486_s7  ;;  %v2723_v13 = vshll.u32 %v4108_v46, 16  ;;  %v2727_v21 = vshrl.u32 %v4108_v46, 16 }
 0x125   : > { %v1263_v17 = vpop.permute.xlu1 %1262  ;;  %v2720_v33 = vor.u32 %v2719_v15, %v2716_v12  ;;  %v2551_v37 = vrot.slane %v2549_v22, 5  ;;  %v4131_v22 = vld [vmem:[%s4607_s30 + $0x18] sm:$0xe] }
 0x126   : > { %1354 = vst.msk [vmem:[#allocation2 + $0x14] sm:$0xf] %vm1348_vm10, %v1263_v17  ;;  %v1261_v24 = vpop.permute.xlu0 %1260  ;;  %v2537_v17 = vrot.slane %v2535_v4, 4  ;;  %v5389_v27 = vrot.slane %v2723_v13, 5  ;;  %v2729_v38 = vrot.slane %v2727_v21, 4  ;;  %v4381_v4 = vld [vmem:[%s6144_s1 + $0x28] sm:$0xff]  }
 0x127   : > { %1353 = vst.msk [vmem:[#allocation2 + $0x10] sm:$0xf] %vm1348_vm10, %v1261_v24  ;;  %2150 = vrot.lane.b32.xlu1 %v2041_v14, %s4487_s8  ;;  %v2528_v14 = vor.u32 %v2527_v3, %v2524_v2  ;;  %v4068_v24 = vld [vmem:[%s4607_s30 + $0x7c] sm:$0xf]  ;;  %v2721_v51 = vrot.slane %v2720_v33, 4 }
 0x128   : > { %1873 = vrot.lane.b32.xlu0 %v1802_v18, %s4486_s7  ;;  %v2546_v18 = vshrl.u32 %v4086_v7, 16  ;;  %v2538_v35 = vor.u32 %v2537_v17, %v5379_v11  ;;  %v2730_v55 = vor.u32 %v2729_v38, %v5389_v27  ;;  %v4088_v3 = vld [vmem:[%s4607_s30 + $0x2c] sm:$0x1]  ;;  %v4382_v17 = vld [vmem:[%s6144_s1 + $0x20] sm:$0xff]   ;;  %v4155_v38 = vld [vmem:[%s4607_s30 + $0x78] sm:$0xe] }
 0x129   : > { %v1267_v29 = vpop.permute.xlu1 %1266  ;;  %v2529_v32 = vrot.slane %v2528_v14, 4  ;;  %v2726_v46 = vsel %vm4618_vm3, %v2721_v51, %v5389_v27  ;;  %v2565_v13 = vshll.u32 %v4088_v3, 16  ;;  %v2753_v14 = vrot.slane %v2751_v0, 4  ;;  %v4134_v51 = vld [vmem:[%s4607_s30 + $0x24] sm:$0xe] }
 0x12a   : > { %1356 = vst.msk [vmem:[#allocation2 + $0x1c] sm:$0xf] %vm1348_vm10, %v1267_v29  ;;  %v1265_v36 = vpop.permute.xlu0 %1264  ;;  %v4087_v29 = vld [vmem:[%s4607_s30 + $0x28] sm:$0xf]  ;;  %v2539_v34 = vrot.slane %v2538_v35, 4  ;;  %v2731_v7 = vrot.slane %v2730_v55, 4 }
 0x12b   : > { %1355 = vst.msk [vmem:[#allocation2 + $0x18] sm:$0xf] %vm1348_vm10, %v1265_v36  ;;  %2182 = vrot.lane.b32.xlu1 %v2097_v26, %s4487_s8  ;;  %v2548_v36 = vrot.slane %v2546_v18, 4  ;;  %v2555_v43 = vshll.u32 %v4087_v29, 16  ;;  %v4385_v55 = vld [vmem:[%s6144_s1 + $0x8] sm:$0xff]  }
 0x12c   : > { %2152 = vrot.lane.b32.xlu0 %v2044_v8, %s4487_s8  ;;  %v4379_v8 = vld [vmem:[%s6144_s1 + $0x38] sm:$0xff]  }
 0x12d   : > { %v1271_v41 = vpop.permute.xlu1 %1270  ;;  %4250 = vmatprep.subr.bf16.mxu0 %v4379_v8  ;;  %4298 = vmatprep.subr.bf16.mxu1 %v4379_v8  ;;  %v2552_v53 = vor.u32 %v2551_v37, %v2548_v36 }
 0x12e   : > { %1358 = vst.msk [vmem:[#allocation2 + $0x24] sm:$0xf] %vm1348_vm10, %v1271_v41  ;;  %v1269_v44 = vpop.permute.xlu0 %1268  ;;  %v2741_v41 = vshll.u32 %v4110_v54, 16  ;;  %4251 = vmatpush3.bf16.msra.mxu0 %v4379_v8  ;;  %4306 = vmatpush3.bf16.msra.mxu1 %v4379_v8  ;;  %v2567_v54 = vrot.slane %v2565_v13, 5  ;;  %v4383_v8 = vld [vmem:[%s6144_s1 + $0x18] sm:$0xff]  }
 0x12f   : > { %1357 = vst.msk [vmem:[#allocation2 + $0x20] sm:$0xf] %vm1348_vm10, %v1269_v44  ;;  %2154 = vrot.lane.b32.xlu1 %v2048_v19, %s4487_s8  ;;  %v4109_v19 = vld [vmem:[%s4607_s30 + $0x80] sm:$0x1]  ;;  %v2559_v44 = vshrl.u32 %v4087_v29, 16 }
 0x130   : > { %2184 = vrot.lane.b32.xlu0 %v2100_v42, %s4487_s8  ;;  %v2743_v57 = vrot.slane %v2741_v41, 5  ;;  %v3994_v13 = vld [vmem:[%s4607_s30 + $0x28] sm:$0xf] }
 0x131   : > { %v1275_v49 = vpop.permute.xlu1 %1274  ;;  %v2561_v1 = vrot.slane %v2559_v44, 4  ;;  %v4187_v44 = vrot.slane %v4155_v38, 9  ;;  %v4019_v38 = vld [vmem:[%s4607_s30 + $0x8c] sm:$0x1] }
 0x132   : > { %1360 = vst.msk [vmem:[#allocation2 + $0x2c] sm:$0xf] %vm1348_vm10, %v1275_v49  ;;  %v1273_v30 = vpop.permute.xlu0 %1272  ;;  %v4380_v49 = vld [vmem:[%s6144_s1 + $0x30] sm:$0xff]  }
 0x133   : > { %1359 = vst.msk [vmem:[#allocation2 + $0x28] sm:$0xf] %vm1348_vm10, %v1273_v30  ;;  %2186 = vrot.lane.b32.xlu1 %v2104_v47, %s4487_s8  ;;  %v2543_v47 = vrot.slane %v2541_v62, 5  ;;  %v2733_v30 = vshll.u32 %v4109_v19, 16  ;;  %4252 = vmatprep.subr.bf16.mxu0 %v4380_v49  ;;  %v2757_v62 = vshll.u32 %v4112_v16, 16 }
 0x134   : > { %2156 = vrot.lane.b32.xlu0 %v2051_v50, %s4487_s8  ;;  %v2534_v50 = vsel %vm4618_vm3, %v2529_v32, %v5379_v11  ;;  %4253 = vmatpush3.bf16.msra.mxu0 %v4380_v49  ;;  %v4179_v32 = vrot.slane %v4131_v22, 9 }
 0x135   : > { %v1279_v59 = vpop.permute.xlu1 %1278  ;;  %4299 = vmatprep.subr.bf16.mxu1 %v4380_v49  ;;  %v2544_v5 = vsel %vm4618_vm3, %v2539_v34, %v2543_v47  ;;  %4254 = vmatprep.subr.bf16.mxu0 %v4381_v4  ;;  %v2759_v19 = vrot.slane %v2757_v62, 5  ;;  %v4135_v34 = vld [vmem:[%s4607_s30 + $0x28] sm:$0xf] }
 0x136   : > { %1362 = vst.msk [vmem:[#allocation2 + $0x34] sm:$0xf] %vm1348_vm10, %v1279_v59  ;;  %v1277_v61 = vpop.permute.xlu0 %1276  ;;  %v4070_v59 = vld [vmem:[%s4607_s30 + $0x88] sm:$0xf]  ;;  %4307 = vmatpush3.bf16.msra.mxu1 %v4380_v49 }
 0x137   : > { %1361 = vst.msk [vmem:[#allocation2 + $0x30] sm:$0xf] %vm1348_vm10, %v1277_v61  ;;  %2344 = vrot.lane.b32.xlu1 %v4051_v58, %s4488_s9  ;;  %v2747_v61 = vshll.u32 %v4111_v48, 16  ;;  %4300 = vmatprep.subr.bf16.mxu1 %v4381_v4 }
 0x138   : > { %2188 = vrot.lane.b32.xlu0 %v2107_v39, %s4487_s8  ;;  %v2557_v39 = vrot.slane %v2555_v43, 5  ;;  %4255 = vmatpush3.bf16.msra.mxu0 %v4381_v4 }
 0x139   : > { %v1283_v9 = vpop.permute.xlu1 %1282  ;;  %v2749_v11 = vrot.slane %v2747_v61, 5  ;;  %4256 = vmatprep.subr.bf16.mxu0 %v4382_v17 }
 0x13a   : > { %1364 = vst.msk [vmem:[#allocation2 + $0x3c] sm:$0xf] %vm1348_vm10, %v1283_v9  ;;  %v1281_v60 = vpop.permute.xlu0 %1280  ;;  %v2735_v9 = vrot.slane %v2733_v30, 5  ;;  %v2562_v12 = vor.u32 %v2561_v1, %v2557_v39  ;;  %4308 = vmatpush3.bf16.msra.mxu1 %v4381_v4  ;;  %v4158_v1 = vld [vmem:[%s4607_s30 + $0x84] sm:$0xe] }
 0x13b   : > { %1363 = vst.msk [vmem:[#allocation2 + $0x38] sm:$0xf] %vm1348_vm10, %v1281_v60  ;;  %2376 = vrot.lane.b32.xlu1 %v4067_v6, %s4488_s9  ;;  %v2553_v6 = vrot.slane %v2552_v53, 4  ;;  %v2754_v27 = vor.u32 %v2753_v14, %v2749_v11  ;;  %4301 = vmatprep.subr.bf16.mxu1 %v4382_v17  ;;  %v4157_v53 = vld [vmem:[%s4607_s30 + $0x80] sm:$0x1] }
 0x13c   : > { %2346 = vrot.lane.b32.xlu0 %v4052_v10, %s4488_s9  ;;  %v2744_v10 = vor.u32 %v2743_v57, %v2740_v52  ;;  %4257 = vmatpush3.bf16.msra.mxu0 %v4382_v17  ;;  %v4180_v57 = vrot.slane %v4134_v51, 9  ;;  %v3191_v0 = vrot.slane %v4157_v53, 5  ;;  %v4136_v4 = vld [vmem:[%s4607_s30 + $0x2c] sm:$0x1] }
 0x13d   : > { %v1287_v23 = vpop.permute.xlu1 %1286  ;;  %v2558_v18 = vsel %vm4618_vm3, %v2553_v6, %v2557_v39  ;;  %4258 = vmatprep.subr.bf16.mxu0 %v4383_v8  ;;  %v2755_v37 = vrot.slane %v2754_v27, 4  ;;  %v4188_v6 = vrot.slane %v4158_v1, 9  ;;  %v3995_v27 = vld [vmem:[%s4607_s30 + $0x2c] sm:$0x1] }
 0x13e   : > { %1366 = vst.msk [vmem:[#allocation2 + $0x44] sm:$0xf] %vm1348_vm10, %v1287_v23  ;;  %v1285_v26 = vpop.permute.xlu0 %1284  ;;  %v2745_v21 = vrot.slane %v2744_v10, 4  ;;  %4309 = vmatpush3.bf16.msra.mxu1 %v4382_v17 }
 0x13f   : > { %1365 = vst.msk [vmem:[#allocation2 + $0x40] sm:$0xf] %vm1348_vm10, %v1285_v26  ;;  %2348 = vrot.lane.b32.xlu1 %v4053_v20, %s4488_s9  ;;  %v2736_v20 = vsel %vm4618_vm3, %v2731_v7, %v2735_v9  ;;  %v4132_v26 = vld [vmem:[%s4607_s30 + $0x1c] sm:$0xf]  ;;  %4302 = vmatprep.subr.bf16.mxu1 %v4383_v8  ;;  %v2760_v48 = vsel %vm4618_vm3, %v2755_v37, %v2759_v19  ;;  %v3997_v37 = vld [vmem:[%s4607_s30 + $0x34] sm:$0xf] }
 0x140   : > { %2378 = vrot.lane.b32.xlu0 %v4068_v24, %s4488_s9  ;;  %v2563_v24 = vrot.slane %v2562_v12, 4  ;;  %v3132_v33 = vrot.slane %v4132_v26, 5  ;;  %4259 = vmatpush3.bf16.msra.mxu0 %v4383_v8  ;;  %v3993_v12 = vld [vmem:[%s4607_s30 + $0x24] sm:$0xe] }
 0x141   : > { %v1291_v42 = vpop.permute.xlu1 %1290  ;;  %v4037_v17 = vrot.slane %v3993_v12, 9 }
 0x142   : > { %1368 = vst.msk [vmem:[#allocation2 + $0x4c] sm:$0xf] %vm1348_vm10, %v1291_v42  ;;  %v1289_v45 = vpop.permute.xlu0 %1288  ;;  %v2568_v36 = vsel %vm4618_vm3, %v2563_v24, %v2567_v54  ;;  %v4133_v42 = vld [vmem:[%s4607_s30 + $0x20] sm:$0x1]  ;;  %4310 = vmatpush3.bf16.msra.mxu1 %v4383_v8  ;;  %v3133_v43 = vsel %vm4762_vm7, %v4179_v32, %v3132_v33  ;;  %v3134_v49 = vrot.slane %v3132_v33, 4 }
 0x143   : > { %1367 = vst.msk [vmem:[#allocation2 + $0x48] sm:$0xf] %vm1348_vm10, %v1289_v45  ;;  %2380 = vrot.lane.b32.xlu1 %v4069_v31, %s4488_s9  ;;  %v2750_v31 = vsel %vm4618_vm3, %v2745_v21, %v2749_v11  ;;  %v3188_v45 = vrot.slane %v4156_v40, 5  ;;  %v3142_v11 = vrot.slane %v4136_v4, 5  ;;  %v4017_v24 = vld [vmem:[%s4607_s30 + $0x84] sm:$0xe] }
 0x144   : > { %2350 = vrot.lane.b32.xlu0 %v4054_v25, %s4488_s9  ;;  %v4384_v25 = vld [vmem:[%s6144_s1 + $0x10] sm:$0xff]   ;;  %v4018_v54 = vld [vmem:[%s4607_s30 + $0x88] sm:$0xf] }
 0x145   : > { %v1295_v58 = vpop.permute.xlu1 %1294  ;;  %4260 = vmatprep.subr.bf16.mxu0 %v4384_v25  ;;  %4303 = vmatprep.subr.bf16.mxu1 %v4384_v25  ;;  %v3189_v52 = vsel %vm4762_vm7, %v4187_v44, %v3188_v45  ;;  %v3190_v61 = vrot.slane %v3188_v45, 4  ;;  %v2110_v8 = vrot.slane %v4018_v54, 5  ;;  %v2113_v45 = vrot.slane %v4019_v38, 5  ;;  %v4116_v38 = vld [vmem:[%s4607_s30 + $0x9c] sm:$0xf] }
 0x146   : > { %1370 = vst.msk [vmem:[#allocation2 + $0x54] sm:$0xf] %vm1348_vm10, %v1295_v58  ;;  %v1293_v2 = vpop.permute.xlu0 %1292  ;;  %4261 = vmatpush3.bf16.msra.mxu0 %v4384_v25  ;;  %4311 = vmatpush3.bf16.msra.mxu1 %v4384_v25  ;;  %v3139_v58 = vrot.slane %v4135_v34, 5 }
 0x147   : > { %1369 = vst.msk [vmem:[#allocation2 + $0x50] sm:$0xf] %vm1348_vm10, %v1293_v2  ;;  %2905 = vrot.lane.b32.xlu1 %v2534_v50, %s4489_s26  ;;  %v3135_v50 = vrot.slane %v4133_v42, 5  ;;  %4262 = vmatprep.subr.bf16.mxu0 %v4385_v55  ;;  %v4159_v2 = vld [vmem:[%s4607_s30 + $0x88] sm:$0xf]  ;;  %v3192_v10 = vsel %vm4762_vm7, %v3190_v61, %v3191_v0  ;;  %v2061_v42 = vrot.slane %v3997_v37, 5 }
 0x148   : > { %2382 = vrot.lane.b32.xlu0 %v4070_v59, %s4488_s9  ;;  %4304 = vmatprep.subr.bf16.mxu1 %v4385_v55  ;;  %v3195_v7 = vrot.slane %v4159_v2, 5  ;;  %v2112_v44 = vrot.slane %v2110_v8, 4 }
 0x149   : > { %v1299_v60 = vpop.permute.xlu1 %1298  ;;  %v3136_v39 = vsel %vm4762_vm7, %v3134_v49, %v3135_v50  ;;  %v3998_v50 = vld [vmem:[%s4607_s30 + $0x38] sm:$0x1] }
 0x14a   : > { %1372 = vst.msk [vmem:[#allocation2 + $0x5c] sm:$0xf] %vm1348_vm10, %v1299_v60  ;;  %v1297_v15 = vpop.permute.xlu0 %1296  ;;  %4263 = vmatpush3.bf16.msra.mxu0 %v4385_v55  ;;  %4312 = vmatpush3.bf16.msra.mxu1 %v4385_v55  ;;  %v3141_v60 = vrot.slane %v3139_v58, 4  ;;  %v3196_v16 = vsel %vm4762_vm7, %v4188_v6, %v3195_v7  ;;  %v3197_v22 = vrot.slane %v3195_v7, 4  ;;  %v2114_v55 = vsel %vm4762_vm7, %v2112_v44, %v2113_v45  ;;  %v4090_v6 = vld [vmem:[%s4607_s30 + $0x34] sm:$0xf] }
 0x14b   : > { %1371 = vst.msk [vmem:[#allocation2 + $0x58] sm:$0xf] %vm1348_vm10, %v1297_v15  ;;  %2937 = vrot.lane.b32.xlu1 %v2726_v46, %s4489_s26  ;;  %v4387_v46 = vld [vmem:[%s6144_s1] sm:$0xff]   ;;  %v4160_v15 = vld [vmem:[%s4607_s30 + $0x8c] sm:$0x1] }
 0x14c   : > { %2907 = vrot.lane.b32.xlu0 %v2544_v5, %s4489_s26  ;;  %v3140_v5 = vsel %vm4762_vm7, %v4180_v57, %v3139_v58  ;;  %4264 = vmatprep.subr.bf16.mxu0 %v4387_v46  ;;  %v3143_v21 = vsel %vm4762_vm7, %v3141_v60, %v3142_v11  ;;  %v2064_v57 = vrot.slane %v3998_v50, 5  ;;  %v4055_v7 = vld [vmem:[%s4607_s30 + $0x30] sm:$0xf] }
 0x14d   : > { %v1303_v23 = vpop.permute.xlu1 %1302  ;;  %4305 = vmatprep.subr.bf16.mxu1 %v4387_v46 }
 0x14e   : > { %1374 = vst.msk [vmem:[#allocation2 + $0x64] sm:$0xf] %vm1348_vm10, %v1303_v23  ;;  %v1301_v29 = vpop.permute.xlu0 %1300  ;;  %4265 = vmatpush3.bf16.msra.mxu0 %v4387_v46  ;;  %4313 = vmatpush3.bf16.msra.mxu1 %v4387_v46  ;;  %v3198_v23 = vrot.slane %v4160_v15, 5  ;;  %v2583_v15 = vshrl.u32 %v4090_v6, 16 }
 0x14f   : > { %1373 = vst.msk [vmem:[#allocation2 + $0x60] sm:$0xf] %vm1348_vm10, %v1301_v29  ;;  %2909 = vrot.lane.b32.xlu1 %v2558_v18, %s4489_s26  ;;  %v2054_v18 = vrot.slane %v3994_v13, 5  ;;  %v4045_v29 = vrot.slane %v4017_v24, 9 }
 0x150   : > { %2939 = vrot.lane.b32.xlu0 %v2736_v20, %s4489_s26  ;;  %v3199_v32 = vsel %vm4762_vm7, %v3197_v22, %v3198_v23  ;;  %v4056_v22 = vld [vmem:[%s4607_s30 + $0x34] sm:$0xf]  ;;  %v4092_v23 = vld [vmem:[%s4607_s30 + $0x3c] sm:$0xf] }
 0x151   : > { %v1307_v35 = vpop.permute.xlu1 %1306  ;;  %v2055_v62 = vsel %vm4762_vm7, %v4037_v17, %v2054_v18  ;;  %v2056_v33 = vrot.slane %v2054_v18, 4  ;;  %v2111_v40 = vsel %vm4762_vm7, %v4045_v29, %v2110_v8  ;;  %v4071_v18 = vld [vmem:[%s4607_s30 + $0x90] sm:$0xf] }
 0x152   : > { %1376 = vst.msk [vmem:[#allocation2 + $0x6c] sm:$0xf] %vm1348_vm10, %v1307_v35  ;;  %v1305_v41 = vpop.permute.xlu0 %1304  ;;  %v2057_v35 = vrot.slane %v3995_v27, 5  ;;  %v2585_v27 = vrot.slane %v2583_v15, 4 }
 0x153   : > { %1375 = vst.msk [vmem:[#allocation2 + $0x68] sm:$0xf] %vm1348_vm10, %v1305_v41  ;;  %2941 = vrot.lane.b32.xlu1 %v2750_v31, %s4489_s26 }
 0x154   : > { %2911 = vrot.lane.b32.xlu0 %v2568_v36, %s4489_s26  ;;  %v3996_v36 = vld [vmem:[%s4607_s30 + $0x30] sm:$0xe] }
 0x155   : > { %v1311_v47 = vpop.permute.xlu1 %1310  ;;  %v4038_v41 = vrot.slane %v3996_v36, 9  ;;  %v2597_v36 = vshll.u32 %v4092_v23, 16 }
 0x156   : > { %1378 = vst.msk [vmem:[#allocation2 + $0x74] sm:$0xf] %vm1348_vm10, %v1311_v47  ;;  %v1309_v30 = vpop.permute.xlu0 %1308  ;;  %v4020_v47 = vld [vmem:[%s4607_s30 + $0x90] sm:$0xe] }
 0x157   : > { %1377 = vst.msk [vmem:[#allocation2 + $0x70] sm:$0xf] %vm1348_vm10, %v1309_v30  ;;  %3242 = vrot.lane.b32.xlu1 %v3133_v43, %s4490_s18  ;;  %v2058_v43 = vsel %vm4762_vm7, %v2056_v33, %v2057_v35  ;;  %v2062_v51 = vsel %vm4762_vm7, %v4038_v41, %v2061_v42  ;;  %v4046_v34 = vrot.slane %v4020_v47, 9  ;;  %v4091_v33 = vld [vmem:[%s4607_s30 + $0x38] sm:$0x1]  ;;  %v2594_v35 = vshrl.u32 %v4092_v23, 16 }
 0x158   : > { %2943 = vrot.lane.b32.xlu0 %v2760_v48, %s4489_s26  ;;  %v4021_v48 = vld [vmem:[%s4607_s30 + $0x94] sm:$0xf]  ;;  %v2589_v45 = vshll.u32 %v4091_v33, 16  ;;  %v2599_v50 = vrot.slane %v2597_v36, 5 }
 0x159   : > { %v1315_v59 = vpop.permute.xlu1 %1314  ;;  %v2117_v30 = vrot.slane %v4021_v48, 5  ;;  %v4073_v48 = vld [vmem:[%s4607_s30 + $0x9c] sm:$0xf]  ;;  %v4138_v36 = vld [vmem:[%s4607_s30 + $0x34] sm:$0xf] }
 0x15a   : > { %1380 = vst.msk [vmem:[#allocation2 + $0x7c] sm:$0xf] %vm1348_vm10, %v1315_v59  ;;  %v1313_v3 = vpop.permute.xlu0 %1312  ;;  %v4022_v59 = vld [vmem:[%s4607_s30 + $0x98] sm:$0x1] }
 0x15b   : > { %1379 = vst.msk [vmem:[#allocation2 + $0x78] sm:$0xf] %vm1348_vm10, %v1313_v3  ;;  %3274 = vrot.lane.b32.xlu1 %v3189_v52, %s4490_s18  ;;  %v2063_v52 = vrot.slane %v2061_v42, 4  ;;  %v2118_v61 = vsel %vm4762_vm7, %v4046_v34, %v2117_v30  ;;  %v2119_v2 = vrot.slane %v2117_v30, 4  ;;  %v2120_v3 = vrot.slane %v4022_v59, 5 }
 0x15c   : > { %3244 = vrot.lane.b32.xlu0 %v3136_v39, %s4490_s18  ;;  %v4089_v39 = vld [vmem:[%s4607_s30 + $0x30] sm:$0xf]  ;;  %v2789_v34 = vshll.u32 %v4116_v38, 16 }
 0x15d   : > { %v1816_v9 = vpop.permute.xlu1 %1815  ;;  %v2065_v1 = vsel %vm4762_vm7, %v2063_v52, %v2064_v57  ;;  %v2570_v46 = vshrl.u32 %v4089_v39, 16  ;;  %v2121_v60 = vsel %vm4762_vm7, %v2119_v2, %v2120_v3  ;;  %v4115_v57 = vld [vmem:[%s4607_s30 + $0x98] sm:$0x1]  ;;  %v4074_v3 = vld [vmem:[%s4607_s30 + $0xa0] sm:$0xf] }
 0x15e   : > { %1911 = vst.msk [vmem:[#allocation2 + $0x4] sm:$0xf] %vm1909_vm11, %v1816_v9  ;;  %v1814_v14 = vpop.permute.xlu0 %1813  ;;  %v4113_v9 = vld [vmem:[%s4607_s30 + $0x90] sm:$0xf] }
 0x15f   : > { %1910 = vst.msk [vmem:[#allocation2] sm:$0xf] %vm1909_vm11, %v1814_v14  ;;  %3246 = vrot.lane.b32.xlu1 %v3140_v5, %s4490_s18  ;;  %v2573_v5 = vshll.u32 %v4089_v39, 16  ;;  %v2572_v12 = vrot.slane %v2570_v46, 4  ;;  %v2579_v14 = vshll.u32 %v4090_v6, 16  ;;  %v2765_v17 = vshll.u32 %v4113_v9, 16 }
 0x160   : > { %3276 = vrot.lane.b32.xlu0 %v3192_v10, %s4490_s18  ;;  %v4117_v39 = vld [vmem:[%s4607_s30 + $0xa0] sm:$0xf]  ;;  %v2781_v46 = vshll.u32 %v4115_v57, 16  ;;  %v2791_v6 = vrot.slane %v2789_v34, 5 }
 0x161   : > { %v1820_v20 = vpop.permute.xlu1 %1819  ;;  %v2575_v13 = vrot.slane %v2573_v5, 5  ;;  %v2767_v29 = vrot.slane %v2765_v17, 5 }
 0x162   : > { %1913 = vst.msk [vmem:[#allocation2 + $0xc] sm:$0xf] %vm1909_vm11, %v1820_v20  ;;  %v1818_v26 = vpop.permute.xlu0 %1817  ;;  %v4114_v20 = vld [vmem:[%s4607_s30 + $0x94] sm:$0xf] }
 0x163   : > { %1912 = vst.msk [vmem:[#allocation2 + $0x8] sm:$0xf] %vm1909_vm11, %v1818_v26  ;;  %3278 = vrot.lane.b32.xlu1 %v3196_v16, %s4490_s18  ;;  %v2762_v16 = vshrl.u32 %v4113_v9, 16  ;;  %v2576_v54 = vor.u32 %v2575_v13, %v2572_v12  ;;  %v5567_v26 = vrot.slane %v2579_v14, 5  ;;  %v2771_v8 = vshll.u32 %v4114_v20, 16 }
 0x164   : > { %3248 = vrot.lane.b32.xlu0 %v3143_v21, %s4490_s18 }
 0x165   : > { %v1824_v31 = vpop.permute.xlu1 %1823  ;;  %v2577_v41 = vrot.slane %v2576_v54, 4  ;;  %v2586_v42 = vor.u32 %v2585_v27, %v5567_v26  ;;  %v2773_v44 = vrot.slane %v2771_v8, 5  ;;  %v4118_v27 = vld [vmem:[%s4607_s30 + $0xa4] sm:$0x1] }
 0x166   : > { %1915 = vst.msk [vmem:[#allocation2 + $0x14] sm:$0xf] %vm1909_vm11, %v1824_v31  ;;  %v1822_v19 = vpop.permute.xlu0 %1821  ;;  %v2775_v31 = vshrl.u32 %v4114_v20, 16 }
 0x167   : > { %1914 = vst.msk [vmem:[#allocation2 + $0x10] sm:$0xf] %vm1909_vm11, %v1822_v19  ;;  %2158 = vrot.lane.b32.xlu1 %v2055_v62, %s4487_s8  ;;  %v2764_v62 = vrot.slane %v2762_v16, 4  ;;  %v4072_v19 = vld [vmem:[%s4607_s30 + $0x94] sm:$0xf]  ;;  %v2582_v59 = vsel %vm4618_vm3, %v2577_v41, %v5567_v26 }
 0x168   : > { %3280 = vrot.lane.b32.xlu0 %v3199_v32, %s4490_s18  ;;  %v4057_v32 = vld [vmem:[%s4607_s30 + $0x3c] sm:$0xf]  ;;  %v2777_v47 = vrot.slane %v2775_v31, 4 }
 0x169   : > { %v1828_v25 = vpop.permute.xlu1 %1827 }
 0x16a   : > { %1917 = vst.msk [vmem:[#allocation2 + $0x1c] sm:$0xf] %vm1909_vm11, %v1828_v25  ;;  %v1826_v49 = vpop.permute.xlu0 %1825  ;;  %v4093_v25 = vld [vmem:[%s4607_s30 + $0x40] sm:$0xf]  ;;  %v2778_v2 = vor.u32 %v2777_v47, %v2773_v44  ;;  %v4161_v47 = vld [vmem:[%s4607_s30 + $0x90] sm:$0xe] }
 0x16b   : > { %1916 = vst.msk [vmem:[#allocation2 + $0x18] sm:$0xf] %vm1909_vm11, %v1826_v49  ;;  %2190 = vrot.lane.b32.xlu1 %v2111_v40, %s4487_s8  ;;  %v2596_v49 = vrot.slane %v2594_v35, 4  ;;  %v2607_v52 = vshrl.u32 %v4093_v25, 16  ;;  %v4137_v35 = vld [vmem:[%s4607_s30 + $0x30] sm:$0xe] }
 0x16c   : > { %2160 = vrot.lane.b32.xlu0 %v2058_v43, %s4487_s8  ;;  %v2768_v43 = vor.u32 %v2767_v29, %v2764_v62  ;;  %v2779_v17 = vrot.slane %v2778_v2, 4  ;;  %v4181_v41 = vrot.slane %v4137_v35, 9  ;;  %v4189_v34 = vrot.slane %v4161_v47, 9 }
 0x16d   : > { %v1832_v53 = vpop.permute.xlu1 %1831  ;;  %v2609_v12 = vrot.slane %v2607_v52, 4 }
 0x16e   : > { %1919 = vst.msk [vmem:[#allocation2 + $0x24] sm:$0xf] %vm1909_vm11, %v1832_v53  ;;  %v1830_v58 = vpop.permute.xlu0 %1829  ;;  %v4058_v53 = vld [vmem:[%s4607_s30 + $0x40] sm:$0xf] }
 0x16f   : > { %1918 = vst.msk [vmem:[#allocation2 + $0x20] sm:$0xf] %vm1909_vm11, %v1830_v58  ;;  %2162 = vrot.lane.b32.xlu1 %v2062_v51, %s4487_s8  ;;  %v2786_v51 = vshrl.u32 %v4116_v38, 16 }
 0x170   : > { %2192 = vrot.lane.b32.xlu0 %v2114_v55, %s4487_s8  ;;  %v2603_v55 = vshll.u32 %v4093_v25, 16 }
 0x171   : > { %v1836_v0 = vpop.permute.xlu1 %1835  ;;  %v2788_v5 = vrot.slane %v2786_v51, 4 }
 0x172   : > { %1921 = vst.msk [vmem:[#allocation2 + $0x2c] sm:$0xf] %vm1909_vm11, %v1836_v0  ;;  %v1834_v4 = vpop.permute.xlu0 %1833  ;;  %v2587_v0 = vrot.slane %v2586_v42, 4  ;;  %v2605_v9 = vrot.slane %v2603_v55, 5  ;;  %v3146_v42 = vrot.slane %v4138_v36, 5 }
 0x173   : > { %1920 = vst.msk [vmem:[#allocation2 + $0x28] sm:$0xf] %vm1909_vm11, %v1834_v4  ;;  %2194 = vrot.lane.b32.xlu1 %v2118_v61, %s4487_s8  ;;  %v2769_v61 = vrot.slane %v2768_v43, 4  ;;  %v2600_v4 = vor.u32 %v2599_v50, %v2596_v49  ;;  %v4139_v50 = vld [vmem:[%s4607_s30 + $0x38] sm:$0x1] }
 0x174   : > { %2164 = vrot.lane.b32.xlu0 %v2065_v1, %s4487_s8  ;;  %v2591_v1 = vrot.slane %v2589_v45, 5  ;;  %v3147_v51 = vsel %vm4762_vm7, %v4181_v41, %v3146_v42  ;;  %v3148_v52 = vrot.slane %v3146_v42, 4  ;;  %v3149_v57 = vrot.slane %v4139_v50, 5  ;;  %v4002_v41 = vld [vmem:[%s4607_s30 + $0x48] sm:$0xe] }
 0x175   : > { %v1840_v10 = vpop.permute.xlu1 %1839  ;;  %v2774_v14 = vsel %vm4618_vm3, %v2769_v61, %v2773_v44  ;;  %v2601_v16 = vrot.slane %v2600_v4, 4  ;;  %v4163_v61 = vld [vmem:[%s4607_s30 + $0x98] sm:$0x1]  ;;  %v4003_v42 = vld [vmem:[%s4607_s30 + $0x4c] sm:$0xf] }
 0x176   : > { %1923 = vst.msk [vmem:[#allocation2 + $0x34] sm:$0xf] %vm1909_vm11, %v1840_v10  ;;  %v1838_v11 = vpop.permute.xlu0 %1837  ;;  %v2795_v10 = vshll.u32 %v4117_v39, 16  ;;  %v2592_v15 = vsel %vm4618_vm3, %v2587_v0, %v2591_v1  ;;  %v3150_v4 = vsel %vm4762_vm7, %v3148_v52, %v3149_v57  ;;  %v2075_v47 = vrot.slane %v4003_v42, 5 }
 0x177   : > { %1922 = vst.msk [vmem:[#allocation2 + $0x30] sm:$0xf] %vm1909_vm11, %v1838_v11  ;;  %2352 = vrot.lane.b32.xlu1 %v4055_v7, %s4488_s9  ;;  %v4094_v11 = vld [vmem:[%s4607_s30 + $0x44] sm:$0x1]  ;;  %v2606_v62 = vsel %vm4618_vm3, %v2601_v16, %v2605_v9 }
 0x178   : > { %2196 = vrot.lane.b32.xlu0 %v2121_v60, %s4487_s8  ;;  %v2799_v60 = vshrl.u32 %v4117_v39, 16  ;;  %v2613_v20 = vshll.u32 %v4094_v11, 16  ;;  %v2797_v23 = vrot.slane %v2795_v10, 5  ;;  %v4142_v10 = vld [vmem:[%s4607_s30 + $0x44] sm:$0x1] }
 0x179   : > { %v1844_v21 = vpop.permute.xlu1 %1843  ;;  %v3156_v16 = vrot.slane %v4142_v10, 5 }
 0x17a   : > { %1925 = vst.msk [vmem:[#allocation2 + $0x3c] sm:$0xf] %vm1909_vm11, %v1844_v21  ;;  %v1842_v24 = vpop.permute.xlu0 %1841  ;;  %v2801_v54 = vrot.slane %v2799_v60, 4  ;;  %v2615_v8 = vrot.slane %v2613_v20, 5 }
 0x17b   : > { %1924 = vst.msk [vmem:[#allocation2 + $0x38] sm:$0xf] %vm1909_vm11, %v1842_v24  ;;  %2384 = vrot.lane.b32.xlu1 %v4071_v18, %s4488_s9  ;;  %v2792_v18 = vor.u32 %v2791_v6, %v2788_v5  ;;  %v2610_v24 = vor.u32 %v2609_v12, %v2605_v9  ;;  %v3205_v5 = vrot.slane %v4163_v61, 5  ;;  %v4164_v6 = vld [vmem:[%s4607_s30 + $0x9c] sm:$0xe]  ;;  %v2077_v61 = vrot.slane %v2075_v47, 4 }
 0x17c   : > { %2354 = vrot.lane.b32.xlu0 %v4056_v22, %s4488_s9  ;;  %v2783_v22 = vrot.slane %v2781_v46, 5  ;;  %v4190_v11 = vrot.slane %v4164_v6, 9 }
 0x17d   : > { %v1848_v37 = vpop.permute.xlu1 %1847  ;;  %v2793_v29 = vrot.slane %v2792_v18, 4  ;;  %v2611_v33 = vrot.slane %v2610_v24, 4  ;;  %v4000_v18 = vld [vmem:[%s4607_s30 + $0x40] sm:$0xf] }
 0x17e   : > { %1927 = vst.msk [vmem:[#allocation2 + $0x44] sm:$0xf] %vm1909_vm11, %v1848_v37  ;;  %v1846_v40 = vpop.permute.xlu0 %1845  ;;  %v2802_v37 = vor.u32 %v2801_v54, %v2797_v23  ;;  %v2068_v24 = vrot.slane %v4000_v18, 5 }
 0x17f   : > { %1926 = vst.msk [vmem:[#allocation2 + $0x40] sm:$0xf] %vm1909_vm11, %v1846_v40  ;;  %2356 = vrot.lane.b32.xlu1 %v4057_v32, %s4488_s9  ;;  %v2784_v32 = vsel %vm4618_vm3, %v2779_v17, %v2783_v22  ;;  %v2798_v40 = vsel %vm4618_vm3, %v2793_v29, %v2797_v23  ;;  %v2616_v43 = vsel %vm4618_vm3, %v2611_v33, %v2615_v8  ;;  %v3999_v17 = vld [vmem:[%s4607_s30 + $0x3c] sm:$0xe]  ;;  %v4024_v8 = vld [vmem:[%s4607_s30 + $0xa0] sm:$0xf] }
 0x180   : > { %2386 = vrot.lane.b32.xlu0 %v4072_v19, %s4488_s9  ;;  %v2805_v19 = vshll.u32 %v4118_v27, 16  ;;  %v2803_v44 = vrot.slane %v2802_v37, 4  ;;  %v4039_v23 = vrot.slane %v3999_v17, 9  ;;  %v4023_v29 = vld [vmem:[%s4607_s30 + $0x9c] sm:$0xe]  ;;  %v2124_v36 = vrot.slane %v4024_v8, 5 }
 0x181   : > { %v1852_v30 = vpop.permute.xlu1 %1851  ;;  %v4047_v35 = vrot.slane %v4023_v29, 9  ;;  %v4120_v8 = vld [vmem:[%s4607_s30 + $0xac] sm:$0xf] }
 0x182   : > { %1929 = vst.msk [vmem:[#allocation2 + $0x4c] sm:$0xf] %vm1909_vm11, %v1852_v30  ;;  %v1850_v58 = vpop.permute.xlu0 %1849  ;;  %v2807_v45 = vrot.slane %v2805_v19, 5  ;;  %v2069_v33 = vsel %vm4762_vm7, %v4039_v23, %v2068_v24  ;;  %v2126_v50 = vrot.slane %v2124_v36, 4  ;;  %v2819_v42 = vshll.u32 %v4120_v8, 16 }
 0x183   : > { %1928 = vst.msk [vmem:[#allocation2 + $0x48] sm:$0xf] %vm1909_vm11, %v1850_v58  ;;  %2388 = vrot.lane.b32.xlu1 %v4073_v48, %s4488_s9  ;;  %v4162_v48 = vld [vmem:[%s4607_s30 + $0x94] sm:$0xf]  ;;  %v4140_v58 = vld [vmem:[%s4607_s30 + $0x3c] sm:$0xe] }
 0x184   : > { %2358 = vrot.lane.b32.xlu0 %v4058_v53, %s4488_s9  ;;  %v3202_v30 = vrot.slane %v4162_v48, 5  ;;  %v2808_v55 = vsel %vm4618_vm3, %v2803_v44, %v2807_v45  ;;  %v4182_v1 = vrot.slane %v4140_v58, 9  ;;  %v2125_v44 = vsel %vm4762_vm7, %v4047_v35, %v2124_v36  ;;  %v4061_v36 = vld [vmem:[%s4607_s30 + $0x54] sm:$0xf] }
 0x185   : > { %v1856_v7 = vpop.permute.xlu1 %1855  ;;  %v4040_v45 = vrot.slane %v4002_v41, 9  ;;  %v4076_v41 = vld [vmem:[%s4607_s30 + $0xac] sm:$0xf] }
 0x186   : > { %1931 = vst.msk [vmem:[#allocation2 + $0x54] sm:$0xf] %vm1909_vm11, %v1856_v7  ;;  %v1854_v13 = vpop.permute.xlu0 %1853  ;;  %v3203_v0 = vsel %vm4762_vm7, %v4189_v34, %v3202_v30  ;;  %v3204_v46 = vrot.slane %v3202_v30, 4  ;;  %v4165_v7 = vld [vmem:[%s4607_s30 + $0xa0] sm:$0xf] }
 0x187   : > { %1930 = vst.msk [vmem:[#allocation2 + $0x50] sm:$0xf] %vm1909_vm11, %v1854_v13  ;;  %2913 = vrot.lane.b32.xlu1 %v2582_v59, %s4489_s26  ;;  %v4141_v59 = vld [vmem:[%s4607_s30 + $0x40] sm:$0xf]  ;;  %v3209_v12 = vrot.slane %v4165_v7, 5  ;;  %v2076_v52 = vsel %vm4762_vm7, %v4040_v45, %v2075_v47 }
 0x188   : > { %2390 = vrot.lane.b32.xlu0 %v4074_v3, %s4488_s9  ;;  %v3153_v2 = vrot.slane %v4141_v59, 5  ;;  %v4026_v34 = vld [vmem:[%s4607_s30 + $0xa8] sm:$0xe]  ;;  %v4027_v30 = vld [vmem:[%s4607_s30 + $0xac] sm:$0xf] }
 0x189   : > { %v1860_v21 = vpop.permute.xlu1 %1859  ;;  %v3210_v22 = vsel %vm4762_vm7, %v4190_v11, %v3209_v12  ;;  %v3211_v27 = vrot.slane %v3209_v12, 4  ;;  %v4048_v57 = vrot.slane %v4026_v34, 9  ;;  %v2131_v58 = vrot.slane %v4027_v30, 5  ;;  %v4059_v11 = vld [vmem:[%s4607_s30 + $0x48] sm:$0xf] }
 0x18a   : > { %1933 = vst.msk [vmem:[#allocation2 + $0x5c] sm:$0xf] %vm1909_vm11, %v1860_v21  ;;  %v1858_v26 = vpop.permute.xlu0 %1857  ;;  %v3154_v60 = vsel %vm4762_vm7, %v4182_v1, %v3153_v2  ;;  %v4166_v21 = vld [vmem:[%s4607_s30 + $0xa4] sm:$0x1]  ;;  %v4096_v12 = vld [vmem:[%s4607_s30 + $0x4c] sm:$0xf] }
 0x18b   : > { %1932 = vst.msk [vmem:[#allocation2 + $0x58] sm:$0xf] %vm1909_vm11, %v1858_v26  ;;  %2945 = vrot.lane.b32.xlu1 %v2774_v14, %s4489_s26  ;;  %v3206_v14 = vsel %vm4762_vm7, %v3204_v46, %v3205_v5  ;;  %v2133_v6 = vrot.slane %v2131_v58, 4  ;;  %v4099_v47 = vld [vmem:[%s4607_s30 + $0x58] sm:$0xf] }
 0x18c   : > { %2915 = vrot.lane.b32.xlu0 %v2592_v15, %s4489_s26  ;;  %v3155_v15 = vrot.slane %v3153_v2, 4  ;;  %v4028_v2 = vld [vmem:[%s4607_s30 + $0xb0] sm:$0x1]  ;;  %v4062_v30 = vld [vmem:[%s4607_s30 + $0x58] sm:$0xf] }
 0x18d   : > { %v1864_v31 = vpop.permute.xlu1 %1863  ;;  %v2134_v7 = vrot.slane %v4028_v2, 5 }
 0x18e   : > { %1935 = vst.msk [vmem:[#allocation2 + $0x64] sm:$0xf] %vm1909_vm11, %v1864_v31  ;;  %v1862_v38 = vpop.permute.xlu0 %1861  ;;  %v3157_v26 = vsel %vm4762_vm7, %v3155_v15, %v3156_v16 }
 0x18f   : > { %1934 = vst.msk [vmem:[#allocation2 + $0x60] sm:$0xf] %vm1909_vm11, %v1862_v38  ;;  %2917 = vrot.lane.b32.xlu1 %v2606_v62, %s4489_s26  ;;  %v3212_v62 = vrot.slane %v4166_v21, 5  ;;  %v2070_v38 = vrot.slane %v2068_v24, 4  ;;  %v2135_v15 = vsel %vm4762_vm7, %v2133_v6, %v2134_v7  ;;  %v2631_v21 = vshrl.u32 %v4096_v12, 16 }
 0x190   : > { %2947 = vrot.lane.b32.xlu0 %v2784_v32, %s4489_s26  ;;  %v4001_v32 = vld [vmem:[%s4607_s30 + $0x44] sm:$0x1]  ;;  %v4075_v24 = vld [vmem:[%s4607_s30 + $0xa8] sm:$0xf] }
 0x191   : > { %v1868_v25 = vpop.permute.xlu1 %1867  ;;  %v3213_v19 = vsel %vm4762_vm7, %v3211_v27, %v3212_v62  ;;  %v4098_v27 = vld [vmem:[%s4607_s30 + $0x54] sm:$0xf]  ;;  %v2633_v35 = vrot.slane %v2631_v21, 4 }
 0x192   : > { %1937 = vst.msk [vmem:[#allocation2 + $0x6c] sm:$0xf] %vm1909_vm11, %v1868_v25  ;;  %v1866_v49 = vpop.permute.xlu0 %1865 }
 0x193   : > { %1936 = vst.msk [vmem:[#allocation2 + $0x68] sm:$0xf] %vm1909_vm11, %v1866_v49  ;;  %2949 = vrot.lane.b32.xlu1 %v2798_v40, %s4489_s26  ;;  %v2071_v40 = vrot.slane %v4001_v32, 5 }
 0x194   : > { %2919 = vrot.lane.b32.xlu0 %v2616_v43, %s4489_s26  ;;  %v4025_v43 = vld [vmem:[%s4607_s30 + $0xa4] sm:$0x1] }
 0x195   : > { %v1872_v53 = vpop.permute.xlu1 %1871  ;;  %v2072_v49 = vsel %vm4762_vm7, %v2070_v38, %v2071_v40  ;;  %v4122_v38 = vld [vmem:[%s4607_s30 + $0xb4] sm:$0xf] }
 0x196   : > { %1939 = vst.msk [vmem:[#allocation2 + $0x74] sm:$0xf] %vm1909_vm11, %v1872_v53  ;;  %v1870_v39 = vpop.permute.xlu0 %1869  ;;  %v2837_v34 = vshll.u32 %v4122_v38, 16 }
 0x197   : > { %1938 = vst.msk [vmem:[#allocation2 + $0x70] sm:$0xf] %vm1909_vm11, %v1870_v39  ;;  %3250 = vrot.lane.b32.xlu1 %v3147_v51, %s4490_s18  ;;  %v2127_v51 = vrot.slane %v4025_v43, 5  ;;  %v4097_v43 = vld [vmem:[%s4607_s30 + $0x50] sm:$0x1] }
 0x198   : > { %2951 = vrot.lane.b32.xlu0 %v2808_v55, %s4489_s26  ;;  %v4004_v55 = vld [vmem:[%s4607_s30 + $0x50] sm:$0x1]  ;;  %v2839_v6 = vrot.slane %v2837_v34, 5  ;;  %v4167_v34 = vld [vmem:[%s4607_s30 + $0xa8] sm:$0xe] }
 0x199   : > { %v2151_v3 = vpop.permute.xlu1 %2150  ;;  %v2128_v39 = vsel %vm4762_vm7, %v2126_v50, %v2127_v51  ;;  %v2834_v51 = vshrl.u32 %v4122_v38, 16 }
 0x19a   : > { %2247 = vst.msk [vmem:[#allocation2] sm:$0xf] %vm2246_vm12, %v2151_v3  ;;  %v1874_v9 = vpop.permute.xlu0 %1873  ;;  %v4095_v3 = vld [vmem:[%s4607_s30 + $0x48] sm:$0xf] }
 0x19b   : > { %1940 = vst.msk [vmem:[#allocation2 + $0x78] sm:$0xf] %vm1909_vm11, %v1874_v9  ;;  %3282 = vrot.lane.b32.xlu1 %v3203_v0, %s4490_s18  ;;  %v2078_v0 = vrot.slane %v4004_v55, 5  ;;  %v2618_v10 = vshrl.u32 %v4095_v3, 16 }
 0x19c   : > { %3252 = vrot.lane.b32.xlu0 %v3150_v4, %s4490_s18  ;;  %v2132_v4 = vsel %vm4762_vm7, %v4048_v57, %v2131_v58  ;;  %v2821_v58 = vrot.slane %v2819_v42, 5  ;;  %v4143_v42 = vld [vmem:[%s4607_s30 + $0x48] sm:$0xe] }
 0x19d   : > { %v2183_v13 = vpop.permute.xlu1 %2182  ;;  %v2079_v5 = vsel %vm4762_vm7, %v2077_v61, %v2078_v0  ;;  %v2620_v17 = vrot.slane %v2618_v10, 4  ;;  %v4123_v0 = vld [vmem:[%s4607_s30 + $0xb8] sm:$0xf] }
 0x19e   : > { %2263 = vst.msk [vmem:[#allocation2 + $0x40] sm:$0xf] %vm2246_vm12, %v2183_v13  ;;  %v2153_v20 = vpop.permute.xlu0 %2152  ;;  %v4119_v13 = vld [vmem:[%s4607_s30 + $0xa8] sm:$0xf]  ;;  %v2843_v10 = vshll.u32 %v4123_v0, 16 }
 0x19f   : > { %2248 = vst.msk [vmem:[#allocation2 + $0x4] sm:$0xf] %vm2246_vm12, %v2153_v20  ;;  %3254 = vrot.lane.b32.xlu1 %v3154_v60, %s4490_s18  ;;  %v2621_v60 = vshll.u32 %v4095_v3, 16  ;;  %v2627_v20 = vshll.u32 %v4096_v12, 16  ;;  %v2813_v23 = vshll.u32 %v4119_v13, 16 }
 0x1a0   : > { %3284 = vrot.lane.b32.xlu0 %v3206_v14, %s4490_s18  ;;  %v4121_v3 = vld [vmem:[%s4607_s30 + $0xb0] sm:$0x1]  ;;  %v4078_v12 = vld [vmem:[%s4607_s30 + $0xb8] sm:$0xf] }
 0x1a1   : > { %v2155_v54 = vpop.permute.xlu1 %2154  ;;  %v2623_v18 = vrot.slane %v2621_v60, 5  ;;  %v2847_v60 = vshrl.u32 %v4123_v0, 16  ;;  %v4147_v0 = vld [vmem:[%s4607_s30 + $0x58] sm:$0xf] }
 0x1a2   : > { %2249 = vst.msk [vmem:[#allocation2 + $0x8] sm:$0xf] %vm2246_vm12, %v2155_v54  ;;  %v2185_v31 = vpop.permute.xlu0 %2184 }
 0x1a3   : > { %2264 = vst.msk [vmem:[#allocation2 + $0x44] sm:$0xf] %vm2246_vm12, %v2185_v31  ;;  %3286 = vrot.lane.b32.xlu1 %v3210_v22, %s4490_s18  ;;  %v2810_v22 = vshrl.u32 %v4119_v13, 16  ;;  %v2624_v29 = vor.u32 %v2623_v18, %v2620_v17  ;;  %v2629_v31 = vrot.slane %v2627_v20, 5  ;;  %v4100_v18 = vld [vmem:[%s4607_s30 + $0x5c] sm:$0x1] }
 0x1a4   : > { %3256 = vrot.lane.b32.xlu0 %v3157_v26, %s4490_s18  ;;  %v4060_v26 = vld [vmem:[%s4607_s30 + $0x4c] sm:$0xf] }
 0x1a5   : > { %v2187_v37 = vpop.permute.xlu1 %2186  ;;  %v2812_v32 = vrot.slane %v2810_v22, 4  ;;  %v2625_v45 = vrot.slane %v2624_v29, 4  ;;  %v2634_v50 = vor.u32 %v2633_v35, %v2629_v31 }
 0x1a6   : > { %2265 = vst.msk [vmem:[#allocation2 + $0x48] sm:$0xf] %vm2246_vm12, %v2187_v37  ;;  %v2157_v25 = vpop.permute.xlu0 %2156  ;;  %v2642_v37 = vshrl.u32 %v4098_v27, 16 }
 0x1a7   : > { %2250 = vst.msk [vmem:[#allocation2 + $0xc] sm:$0xf] %vm2246_vm12, %v2157_v25  ;;  %2166 = vrot.lane.b32.xlu1 %v2069_v33, %s4487_s8  ;;  %v2815_v33 = vrot.slane %v2813_v23, 5  ;;  %v2823_v25 = vshrl.u32 %v4120_v8, 16  ;;  %v2630_v2 = vsel %vm4618_vm3, %v2625_v45, %v2629_v31  ;;  %v2661_v8 = vshll.u32 %v4100_v18, 16 }
 0x1a8   : > { %3288 = vrot.lane.b32.xlu0 %v3213_v19, %s4490_s18  ;;  %v2645_v19 = vshll.u32 %v4098_v27, 16  ;;  %v2644_v55 = vrot.slane %v2642_v37, 4  ;;  %v4124_v31 = vld [vmem:[%s4607_s30 + $0xbc] sm:$0x1]  ;;  %v4183_v45 = vrot.slane %v4143_v42, 9 }
 0x1a9   : > { %v2345_v48 = vpop.permute.xlu1 %2344  ;;  %v2825_v61 = vrot.slane %v2823_v25, 4  ;;  %v2853_v37 = vshll.u32 %v4124_v31, 16  ;;  %v4144_v25 = vld [vmem:[%s4607_s30 + $0x4c] sm:$0xf]  ;;  %v4006_v31 = vld [vmem:[%s4607_s30 + $0x58] sm:$0xf] }
 0x1aa   : > { %2441 = vst.msk [vmem:[#allocation2] sm:$0xf] %vm2440_vm13, %v2345_v48  ;;  %v2189_v53 = vpop.permute.xlu0 %2188  ;;  %v4077_v48 = vld [vmem:[%s4607_s30 + $0xb4] sm:$0xf] }
 0x1ab   : > { %2266 = vst.msk [vmem:[#allocation2 + $0x4c] sm:$0xf] %vm2246_vm12, %v2189_v53  ;;  %2198 = vrot.lane.b32.xlu1 %v2125_v44, %s4487_s8  ;;  %v2637_v53 = vshll.u32 %v4097_v43, 16 }
 0x1ac   : > { %2168 = vrot.lane.b32.xlu0 %v2072_v49, %s4487_s8  ;;  %v2816_v49 = vor.u32 %v2815_v33, %v2812_v32 }
 0x1ad   : > { %v2377_v59 = vpop.permute.xlu1 %2376  ;;  %v2639_v7 = vrot.slane %v2637_v53, 5 }
 0x1ae   : > { %2457 = vst.msk [vmem:[#allocation2 + $0x40] sm:$0xf] %vm2440_vm13, %v2377_v59  ;;  %v2347_v1 = vpop.permute.xlu0 %2346  ;;  %v2651_v59 = vshll.u32 %v4099_v47, 16 }
 0x1af   : > { %2442 = vst.msk [vmem:[#allocation2 + $0x4] sm:$0xf] %vm2440_vm13, %v2347_v1  ;;  %2170 = vrot.lane.b32.xlu1 %v2076_v52, %s4487_s8  ;;  %v2647_v52 = vrot.slane %v2645_v19, 5 }
 0x1b0   : > { %2200 = vrot.lane.b32.xlu0 %v2128_v39, %s4487_s8  ;;  %v2655_v39 = vshrl.u32 %v4099_v47, 16  ;;  %v2653_v13 = vrot.slane %v2651_v59, 5  ;;  %v3160_v47 = vrot.slane %v4144_v25, 5  ;;  %v4191_v59 = vrot.slane %v4167_v34, 9  ;;  %v4007_v25 = vld [vmem:[%s4607_s30 + $0x5c] sm:$0x1] }
 0x1b1   : > { %v2349_v46 = vpop.permute.xlu1 %2348 }
 0x1b2   : > { %2443 = vst.msk [vmem:[#allocation2 + $0x8] sm:$0xf] %vm2440_vm13, %v2349_v46  ;;  %v2379_v9 = vpop.permute.xlu0 %2378  ;;  %v2635_v46 = vrot.slane %v2634_v50, 4 }
 0x1b3   : > { %2458 = vst.msk [vmem:[#allocation2 + $0x44] sm:$0xf] %vm2440_vm13, %v2379_v9  ;;  %2202 = vrot.lane.b32.xlu1 %v2132_v4, %s4487_s8  ;;  %v2817_v4 = vrot.slane %v2816_v49, 4  ;;  %v2648_v9 = vor.u32 %v2647_v52, %v2644_v55  ;;  %v2855_v49 = vrot.slane %v2853_v37, 5  ;;  %v4145_v55 = vld [vmem:[%s4607_s30 + $0x50] sm:$0x1] }
 0x1b4   : > { %2172 = vrot.lane.b32.xlu0 %v2079_v5, %s4487_s8  ;;  %v2836_v5 = vrot.slane %v2834_v51, 4  ;;  %v2640_v22 = vsel %vm4618_vm3, %v2635_v46, %v2639_v7  ;;  %v4403_v52 = vld [vmem:[%s4607_s30 + $0xc4] sm:$0xf]  ;;  %v4169_v46 = vld [vmem:[%s4607_s30 + $0xb0] sm:$0x1] }
 0x1b5   : > { %v2381_v14 = vpop.permute.xlu1 %2380  ;;  %v2822_v20 = vsel %vm4618_vm3, %v2817_v4, %v2821_v58  ;;  %v2649_v23 = vrot.slane %v2648_v9, 4  ;;  %v3163_v4 = vrot.slane %v4145_v55, 5  ;;  %v3167_v9 = vrot.slane %v4147_v0, 5  ;;  %v4031_v55 = vld [vmem:[%s4607_s30 + $0xbc] sm:$0x1] }
 0x1b6   : > { %2459 = vst.msk [vmem:[#allocation2 + $0x48] sm:$0xf] %vm2440_vm13, %v2381_v14  ;;  %v2351_v16 = vpop.permute.xlu0 %2350  ;;  %v2826_v14 = vor.u32 %v2825_v61, %v2821_v58  ;;  %v2840_v21 = vor.u32 %v2839_v6, %v2836_v5  ;;  %v3161_v58 = vsel %vm4762_vm7, %v4183_v45, %v3160_v47  ;;  %v4146_v61 = vld [vmem:[%s4607_s30 + $0x54] sm:$0xe] }
 0x1b7   : > { %2444 = vst.msk [vmem:[#allocation2 + $0xc] sm:$0xf] %vm2440_vm13, %v2351_v16  ;;  %2360 = vrot.lane.b32.xlu1 %v4059_v11, %s4488_s9  ;;  %v2657_v16 = vrot.slane %v2655_v39, 4  ;;  %v2654_v35 = vsel %vm4618_vm3, %v2649_v23, %v2653_v13  ;;  %v4184_v7 = vrot.slane %v4146_v61, 9  ;;  %v2141_v61 = vrot.slane %v4031_v55, 5 }
 0x1b8   : > { %2204 = vrot.lane.b32.xlu0 %v2135_v15, %s4487_s8  ;;  %v2829_v15 = vshll.u32 %v4121_v3, 16  ;;  %v2827_v27 = vrot.slane %v2826_v14, 4  ;;  %v2841_v33 = vrot.slane %v2840_v21, 4  ;;  %v3162_v3 = vrot.slane %v3160_v47, 4  ;;  %v4148_v21 = vld [vmem:[%s4607_s30 + $0x5c] sm:$0x1] }
 0x1b9   : > { %v2906_v54 = vpop.permute.xlu1 %2905  ;;  %v2658_v29 = vor.u32 %v2657_v16, %v2653_v13  ;;  %v4171_v16 = vld [vmem:[%s4607_s30 + $0xb8] sm:$0xf]  ;;  %v4005_v47 = vld [vmem:[%s4607_s30 + $0x54] sm:$0xe] }
 0x1ba   : > { %3002 = vst.msk [vmem:[#allocation2] sm:$0xf] %vm3001_vm14, %v2906_v54  ;;  %v2383_v62 = vpop.permute.xlu0 %2382  ;;  %v2849_v54 = vrot.slane %v2847_v60, 4 }
 0x1bb   : > { %2460 = vst.msk [vmem:[#allocation2 + $0x4c] sm:$0xf] %vm2440_vm13, %v2383_v62  ;;  %2392 = vrot.lane.b32.xlu1 %v4075_v24, %s4488_s9  ;;  %v2845_v24 = vrot.slane %v2843_v10, 5  ;;  %v2831_v62 = vrot.slane %v2829_v15, 5  ;;  %v3164_v15 = vsel %vm4762_vm7, %v3162_v3, %v3163_v4  ;;  %v4010_v4 = vld [vmem:[%s4607_s30 + $0x68] sm:$0x1] }
 0x1bc   : > { %2362 = vrot.lane.b32.xlu0 %v4060_v26, %s4488_s9 }
 0x1bd   : > { %v2938_v40 = vpop.permute.xlu1 %2937  ;;  %v2832_v38 = vsel %vm4618_vm3, %v2827_v27, %v2831_v62 }
 0x1be   : > { %3018 = vst.msk [vmem:[#allocation2 + $0x40] sm:$0xf] %vm3001_vm14, %v2938_v40  ;;  %v2908_v44 = vpop.permute.xlu0 %2907  ;;  %v2659_v40 = vrot.slane %v2658_v29, 4  ;;  %v3169_v29 = vrot.slane %v3167_v9, 4 }
 0x1bf   : > { %3003 = vst.msk [vmem:[#allocation2 + $0x4] sm:$0xf] %vm3001_vm14, %v2908_v44  ;;  %2364 = vrot.lane.b32.xlu1 %v4061_v36, %s4488_s9  ;;  %v2850_v36 = vor.u32 %v2849_v54, %v2845_v24  ;;  %v2846_v44 = vsel %vm4618_vm3, %v2841_v33, %v2845_v24  ;;  %v3223_v24 = vrot.slane %v4171_v16, 5  ;;  %v4032_v16 = vld [vmem:[%s4607_s30 + $0xc0] sm:$0xe] }
 0x1c0   : > { %2394 = vrot.lane.b32.xlu0 %v4076_v41, %s4488_s9  ;;  %v2663_v41 = vrot.slane %v2661_v8, 5  ;;  %v3170_v8 = vrot.slane %v4148_v21, 5 }
 0x1c1   : > { %v2910_v57 = vpop.permute.xlu1 %2909 }
 0x1c2   : > { %3004 = vst.msk [vmem:[#allocation2 + $0x8] sm:$0xf] %vm3001_vm14, %v2910_v57  ;;  %v2940_v1 = vpop.permute.xlu0 %2939  ;;  %v2664_v51 = vsel %vm4618_vm3, %v2659_v40, %v2663_v41  ;;  %v1803_v57 = vshrl.u32 %v4403_v52, 16  ;;  %v3171_v40 = vsel %vm4762_vm7, %v3169_v29, %v3170_v8  ;;  %v3225_v41 = vrot.slane %v3223_v24, 4  ;;  %v4009_v52 = vld [vmem:[%s4607_s30 + $0x64] sm:$0xf] }
 0x1c3   : > { %3019 = vst.msk [vmem:[#allocation2 + $0x44] sm:$0xf] %vm3001_vm14, %v2940_v1  ;;  %2396 = vrot.lane.b32.xlu1 %v4077_v48, %s4488_s9  ;;  %v2851_v48 = vrot.slane %v2850_v36, 4  ;;  %v2089_v0 = vrot.slane %v4009_v52, 5 }
 0x1c4   : > { %2366 = vrot.lane.b32.xlu0 %v4062_v30, %s4488_s9  ;;  %v4168_v30 = vld [vmem:[%s4607_s30 + $0xac] sm:$0xf]  ;;  %v1805_v13 = vrot.slane %v1803_v57, 4 }
 0x1c5   : > { %v2942_v11 = vpop.permute.xlu1 %2941  ;;  %v3216_v39 = vrot.slane %v4168_v30, 5 }
 0x1c6   : > { %3020 = vst.msk [vmem:[#allocation2 + $0x48] sm:$0xf] %vm3001_vm14, %v2942_v11  ;;  %v2912_v17 = vpop.permute.xlu0 %2911  ;;  %v3219_v11 = vrot.slane %v4169_v46, 5  ;;  %v1806_v54 = vor.u32 %v1805_v13, %v5315_v56  ;;  %v4033_v46 = vld [vmem:[%s4607_s30 + $0xc4] sm:$0xf] }
 0x1c7   : > { %3005 = vst.msk [vmem:[#allocation2 + $0xc] sm:$0xf] %vm3001_vm14, %v2912_v17  ;;  %2921 = vrot.lane.b32.xlu1 %v2630_v2, %s4489_s26  ;;  %v2856_v2 = vsel %vm4618_vm3, %v2851_v48, %v2855_v49  ;;  %v3217_v10 = vsel %vm4762_vm7, %v4191_v59, %v3216_v39  ;;  %v3218_v60 = vrot.slane %v3216_v39, 4  ;;  %v3986_v17 = vld [vmem:[%s4607_s30 + $0xc8] sm:$0x1] }
 0x1c8   : > { %2398 = vrot.lane.b32.xlu0 %v4078_v12, %s4488_s9  ;;  %v4170_v12 = vld [vmem:[%s4607_s30 + $0xb4] sm:$0xe]  ;;  %v1807_v36 = vrot.slane %v1806_v54, 4  ;;  %v4102_v54 = vld [vmem:[%s4607_s30 + $0x64] sm:$0xf] }
 0x1c9   : > { %v3243_v26 = vpop.permute.xlu1 %3242  ;;  %v4192_v23 = vrot.slane %v4170_v12, 9  ;;  %v3220_v62 = vsel %vm4762_vm7, %v3218_v60, %v3219_v11  ;;  %v2145_v60 = vrot.slane %v4033_v46, 5  ;;  %v2675_v8 = vshll.u32 %v4102_v54, 16 }
 0x1ca   : > { %3339 = vst.msk [vmem:[#allocation2] sm:$0xf] %vm3338_vm15, %v3243_v26  ;;  %v2944_v32 = vpop.permute.xlu0 %2943  ;;  %v1809_v26 = vshll.u32 %v3986_v17, 16 }
 0x1cb   : > { %3021 = vst.msk [vmem:[#allocation2 + $0x4c] sm:$0xf] %vm3001_vm14, %v2944_v32  ;;  %2953 = vrot.lane.b32.xlu1 %v2822_v20, %s4489_s26  ;;  %v3224_v56 = vsel %vm4762_vm7, %v4192_v23, %v3223_v24  ;;  %v4050_v23 = vrot.slane %v4032_v16, 9 }
 0x1cc   : > { %2923 = vrot.lane.b32.xlu0 %v2640_v22, %s4489_s26  ;;  %v3168_v22 = vsel %vm4762_vm7, %v4184_v7, %v3167_v9  ;;  %v1811_v37 = vrot.slane %v1809_v26, 5  ;;  %v2091_v9 = vrot.slane %v2089_v0, 4 }
 0x1cd   : > { %v3275_v19 = vpop.permute.xlu1 %3274 }
 0x1ce   : > { %3355 = vst.msk [vmem:[#allocation2 + $0x40] sm:$0xf] %vm3338_vm15, %v3275_v19  ;;  %v3245_v43 = vpop.permute.xlu0 %3244  ;;  %v2082_v19 = vrot.slane %v4006_v31, 5  ;;  %v1812_v48 = vsel %vm4618_vm3, %v1807_v36, %v1811_v37  ;;  %v2679_v31 = vshrl.u32 %v4102_v54, 16  ;;  %v4063_v36 = vld [vmem:[%s4607_s30 + $0x60] sm:$0xf] }
 0x1cf   : > { %3340 = vst.msk [vmem:[#allocation2 + $0x4] sm:$0xf] %vm3338_vm15, %v3245_v43  ;;  %2925 = vrot.lane.b32.xlu1 %v2654_v35, %s4489_s26  ;;  %v4172_v35 = vld [vmem:[%s4607_s30 + $0xbc] sm:$0x1]  ;;  %v4030_v43 = vld [vmem:[%s4607_s30 + $0xb8] sm:$0xf] }
 0x1d0   : > { %2955 = vrot.lane.b32.xlu0 %v2832_v38, %s4489_s26  ;;  %v3226_v42 = vrot.slane %v4172_v35, 5  ;;  %v2084_v49 = vrot.slane %v2082_v19, 4  ;;  %v4126_v35 = vld [vmem:[%s4607_s30 + $0xc4] sm:$0xf]  ;;  %v4081_v54 = vld [vmem:[%s4607_s30 + $0xcc] sm:$0xf] }
 0x1d1   : > { %v3247_v50 = vpop.permute.xlu1 %3246 }
 0x1d2   : > { %3341 = vst.msk [vmem:[#allocation2 + $0x8] sm:$0xf] %vm3338_vm15, %v3247_v50  ;;  %v3277_v53 = vpop.permute.xlu0 %3276  ;;  %v2085_v50 = vrot.slane %v4007_v25, 5  ;;  %v3227_v30 = vsel %vm4762_vm7, %v3225_v41, %v3226_v42  ;;  %v5886_v41 = vrot.slane %v2675_v8, 5  ;;  %v2681_v42 = vrot.slane %v2679_v31, 4 }
 0x1d3   : > { %3356 = vst.msk [vmem:[#allocation2 + $0x44] sm:$0xf] %vm3338_vm15, %v3277_v53  ;;  %2957 = vrot.lane.b32.xlu1 %v2846_v44, %s4489_s26  ;;  %v4041_v53 = vrot.slane %v4005_v47, 9  ;;  %v4103_v25 = vld [vmem:[%s4607_s30 + $0x68] sm:$0x1] }
 0x1d4   : > { %2927 = vrot.lane.b32.xlu0 %v2664_v51, %s4489_s26  ;;  %v2138_v51 = vrot.slane %v4030_v43, 5  ;;  %v2086_v59 = vsel %vm4762_vm7, %v2084_v49, %v2085_v50  ;;  %v2867_v43 = vshll.u32 %v4126_v35, 16  ;;  %v4105_v49 = vld [vmem:[%s4607_s30 + $0x70] sm:$0xf]  ;;  %v2682_v55 = vor.u32 %v2681_v42, %v5886_v41 }
 0x1d5   : > { %v3279_v1 = vpop.permute.xlu1 %3278  ;;  %v2685_v52 = vshll.u32 %v4103_v25, 16 }
 0x1d6   : > { %3357 = vst.msk [vmem:[#allocation2 + $0x48] sm:$0xf] %vm3338_vm15, %v3279_v1  ;;  %v3249_v5 = vpop.permute.xlu0 %3248  ;;  %v4386_v6 = vld [vmem:[#allocation2] sm:$0xff]   ;;  %v2140_v39 = vrot.slane %v2138_v51, 4 }
 0x1d7   : > { %3342 = vst.msk [vmem:[#allocation2 + $0xc] sm:$0xf] %vm3338_vm15, %v3249_v5  ;;  %3258 = vrot.lane.b32.xlu1 %v3161_v58, %s4490_s18  ;;  %4266 = vmatprep.mubr.bf16.mxu0 %v4386_v6  ;;  %v4029_v58 = vld [vmem:[%s4607_s30 + $0xb4] sm:$0xe]  ;;  %v4008_v6 = vld [vmem:[%s4607_s30 + $0x60] sm:$0xe] }
 0x1d8   : > { %2959 = vrot.lane.b32.xlu0 %v2856_v2, %s4489_s26  ;;  %v2083_v2 = vsel %vm4762_vm7, %v4041_v53, %v2082_v19  ;;  %v4049_v3 = vrot.slane %v4029_v58, 9  ;;  %v2142_v7 = vsel %vm4762_vm7, %v2140_v39, %v2141_v61  ;;  %v4042_v13 = vrot.slane %v4008_v6, 9  ;;  %v4066_v58 = vld [vmem:[%s4607_s30 + $0x70] sm:$0xf] }
 0x1d9   : > { %v2159_v14 = vpop.permute.xlu1 %2158  ;;  %v2699_v61 = vshll.u32 %v4105_v49, 16 }
 0x1da   : > { %2251 = vst.msk [vmem:[#allocation2 + $0x10] sm:$0xf] %vm2246_vm12, %v2159_v14  ;;  %v3281_v18 = vpop.permute.xlu0 %3280  ;;  %v4388_v20 = vld [vmem:[#allocation2 + $0x40] sm:$0xff]   ;;  %v2139_v12 = vsel %vm4762_vm7, %v4049_v3, %v2138_v51  ;;  %v4034_v14 = vld [vmem:[%s4607_s30 + $0xc8] sm:$0x1] }
 0x1db   : > { %3358 = vst.msk [vmem:[#allocation2 + $0x4c] sm:$0xf] %vm3338_vm15, %v3281_v18  ;;  %3290 = vrot.lane.b32.xlu1 %v3217_v10, %s4490_s18  ;;  %4282 = vmatprep.mubr.bf16.mxu1 %v4388_v20  ;;  %v2092_v10 = vrot.slane %v4010_v4, 5  ;;  %v2147_v18 = vrot.slane %v2145_v60, 4  ;;  %v2148_v20 = vrot.slane %v4034_v14, 5  ;;  %v5913_v16 = vrot.slane %v2699_v61, 5 }
 0x1dc   : > { %3260 = vrot.lane.b32.xlu0 %v3164_v15, %s4490_s18  ;;  %v4079_v51 = vld [vmem:[%s4607_s30 + $0xc0] sm:$0xf] }
 0x1dd   : > { %v2191_v27 = vpop.permute.xlu1 %2190  ;;  %v2093_v17 = vsel %vm4762_vm7, %v2091_v9, %v2092_v10  ;;  %v2149_v26 = vsel %vm4762_vm7, %v2147_v18, %v2148_v20  ;;  %v4129_v9 = vld [vmem:[%s4607_s30 + $0xd0] sm:$0xf]  ;;  %v4128_v10 = vld [vmem:[%s4607_s30 + $0xcc] sm:$0xf]  ;;  %v4106_v18 = vld [vmem:[%s4607_s30 + $0x74] sm:$0x1] }
 0x1de   : > { %2267 = vst.msk [vmem:[#allocation2 + $0x50] sm:$0xf] %vm2246_vm12, %v2191_v27  ;;  %v2161_v32 = vpop.permute.xlu0 %2160  ;;  %v4389_v33 = vld [vmem:[#allocation2 + $0x8] sm:$0xff]   ;;  %v2891_v20 = vshll.u32 %v4129_v9, 16 }
 0x1df   : > { %2252 = vst.msk [vmem:[#allocation2 + $0x14] sm:$0xf] %vm2246_vm12, %v2161_v32  ;;  %3262 = vrot.lane.b32.xlu1 %v3168_v22, %s4490_s18  ;;  %4267 = vmatmul.mubr.bf16.vlgmr.msra.gmra.mxu0 %v4389_v33  ;;  %v2090_v22 = vsel %vm4762_vm7, %v4042_v13, %v2089_v0  ;;  %v4101_v32 = vld [vmem:[%s4607_s30 + $0x60] sm:$0xf]  ;;  %v4064_v33 = vld [vmem:[%s4607_s30 + $0x64] sm:$0xf] }
 0x1e0   : > { %3292 = vrot.lane.b32.xlu0 %v3220_v62, %s4490_s18  ;;  %v2146_v62 = vsel %vm4762_vm7, %v4050_v23, %v2145_v60  ;;  %v2666_v37 = vshrl.u32 %v4101_v32, 16  ;;  %v2669_v19 = vshll.u32 %v4101_v32, 16  ;;  %v2703_v0 = vshrl.u32 %v4105_v49, 16  ;;  %v4082_v13 = vld [vmem:[%s4607_s30 + $0xd0] sm:$0xf] }
 0x1e1   : > { %v2163_v38 = vpop.permute.xlu1 %2162  ;;  %v2885_v23 = vshll.u32 %v4128_v10, 16 }
 0x1e2   : > { %2253 = vst.msk [vmem:[#allocation2 + $0x18] sm:$0xf] %vm2246_vm12, %v2163_v38  ;;  %v2193_v44 = vpop.permute.xlu0 %2192  ;;  %v4390_v45 = vld [vmem:[#allocation2 + $0x48] sm:$0xff]   ;;  %v4125_v38 = vld [vmem:[%s4607_s30 + $0xc0] sm:$0xf] }
 0x1e3   : > { %2268 = vst.msk [vmem:[#allocation2 + $0x54] sm:$0xf] %vm2246_vm12, %v2193_v44  ;;  %3294 = vrot.lane.b32.xlu1 %v3224_v56, %s4490_s18  ;;  %4283 = vmatmul.mubr.bf16.vlgmr.msra.gmra.mxu1 %v4390_v45  ;;  %v2871_v44 = vshrl.u32 %v4126_v35, 16  ;;  %v4080_v45 = vld [vmem:[%s4607_s30 + $0xc4] sm:$0xf]  ;;  %v2858_v47 = vshrl.u32 %v4125_v38, 16 }
 0x1e4   : > { %3264 = vrot.lane.b32.xlu0 %v3171_v40, %s4490_s18 }
 0x1e5   : > { %v2195_v34 = vpop.permute.xlu1 %2194  ;;  %v2873_v39 = vrot.slane %v2871_v44, 4  ;;  %v2860_v3 = vrot.slane %v2858_v47, 4  ;;  %v4130_v44 = vld [vmem:[%s4607_s30 + $0xd4] sm:$0x1] }
 0x1e6   : > { %2269 = vst.msk [vmem:[#allocation2 + $0x58] sm:$0xf] %vm2246_vm12, %v2195_v34  ;;  %v2165_v57 = vpop.permute.xlu0 %2164  ;;  %v2668_v34 = vrot.slane %v2666_v37, 4 }
 0x1e7   : > { %2254 = vst.msk [vmem:[#allocation2 + $0x1c] sm:$0xf] %vm2246_vm12, %v2165_v57  ;;  %1875 = vrot.lane.b32.xlu1 %v1812_v48, %s4486_s7  ;;  %v2861_v48 = vshll.u32 %v4125_v38, 16  ;;  %v4104_v57 = vld [vmem:[%s4607_s30 + $0x6c] sm:$0xf]  ;;  %v2887_v38 = vrot.slane %v2885_v23, 5 }
 0x1e8   : > { %3296 = vrot.lane.b32.xlu0 %v3227_v30, %s4490_s18  ;;  %v2671_v30 = vrot.slane %v2669_v19, 5  ;;  %v2690_v6 = vshrl.u32 %v4104_v57, 16 }
 0x1e9   : > { %v2353_v1 = vpop.permute.xlu1 %2352  ;;  %v2863_v4 = vrot.slane %v2861_v48, 5 }
 0x1ea   : > { %2445 = vst.msk [vmem:[#allocation2 + $0x10] sm:$0xf] %vm2440_vm13, %v2353_v1  ;;  %v2197_v5 = vpop.permute.xlu0 %2196  ;;  %v4065_v1 = vld [vmem:[%s4607_s30 + $0x6c] sm:$0xf] }
 0x1eb   : > { %2270 = vst.msk [vmem:[#allocation2 + $0x5c] sm:$0xf] %vm2246_vm12, %v2197_v5  ;;  %2176 = vrot.lane.b32.xlu1 %v2086_v59, %s4487_s8  ;;  %v5901_v59 = vrot.slane %v2867_v43, 5  ;;  %v2672_v5 = vor.u32 %v2671_v30, %v2668_v34  ;;  %v4150_v34 = vld [vmem:[%s4607_s30 + $0x64] sm:$0xf] }
 0x1ec   : > { %2174 = vrot.lane.b32.xlu0 %v2083_v2, %s4487_s8  ;;  %v4127_v2 = vld [vmem:[%s4607_s30 + $0xc8] sm:$0x1] }
 0x1ed   : > { %v2385_v11 = vpop.permute.xlu1 %2384  ;;  %v2874_v14 = vor.u32 %v2873_v39, %v5901_v59 }
 0x1ee   : > { %2461 = vst.msk [vmem:[#allocation2 + $0x50] sm:$0xf] %vm2440_vm13, %v2385_v11  ;;  %v2355_v15 = vpop.permute.xlu0 %2354  ;;  %v2683_v11 = vrot.slane %v2682_v55, 4 }
 0x1ef   : > { %2446 = vst.msk [vmem:[#allocation2 + $0x14] sm:$0xf] %vm2440_vm13, %v2355_v15  ;;  %2208 = vrot.lane.b32.xlu1 %v2142_v7, %s4487_s8  ;;  %v2693_v7 = vshll.u32 %v4104_v57, 16  ;;  %v2877_v15 = vshll.u32 %v4127_v2, 16  ;;  %v2875_v32 = vrot.slane %v2874_v14, 4  ;;  %v3174_v57 = vrot.slane %v4150_v34, 5 }
 0x1f0   : > { %2206 = vrot.lane.b32.xlu0 %v2139_v12, %s4487_s8  ;;  %v2687_v12 = vrot.slane %v2685_v52, 5  ;;  %v4153_v14 = vld [vmem:[%s4607_s30 + $0x70] sm:$0xf] }
 0x1f1   : > { %v2357_v21 = vpop.permute.xlu1 %2356 }
 0x1f2   : > { %2447 = vst.msk [vmem:[#allocation2 + $0x18] sm:$0xf] %vm2440_vm13, %v2357_v21  ;;  %v2387_v24 = vpop.permute.xlu0 %2386  ;;  %v2895_v21 = vshrl.u32 %v4129_v9, 16  ;;  %v2688_v31 = vsel %vm4618_vm3, %v2683_v11, %v2687_v12 }
 0x1f3   : > { %2462 = vst.msk [vmem:[#allocation2 + $0x54] sm:$0xf] %vm2440_vm13, %v2387_v24  ;;  %2180 = vrot.lane.b32.xlu1 %v2093_v17, %s4487_s8  ;;  %v2705_v17 = vrot.slane %v2703_v0, 4 }
 0x1f4   : > { %2178 = vrot.lane.b32.xlu0 %v2090_v22, %s4487_s8  ;;  %v2882_v22 = vshrl.u32 %v4128_v10, 16  ;;  %v2897_v37 = vrot.slane %v2895_v21, 4  ;;  %v4175_v10 = vld [vmem:[%s4607_s30 + $0xc8] sm:$0x1]  ;;  %v3181_v21 = vrot.slane %v4153_v14, 5 }
 0x1f5   : > { %v2389_v27 = vpop.permute.xlu1 %2388  ;;  %v2706_v35 = vor.u32 %v2705_v17, %v5913_v16 }
 0x1f6   : > { %2463 = vst.msk [vmem:[#allocation2 + $0x58] sm:$0xf] %vm2440_vm13, %v2389_v27  ;;  %v2359_v29 = vpop.permute.xlu0 %2358  ;;  %v2864_v27 = vor.u32 %v2863_v4, %v2860_v3  ;;  %v2884_v19 = vrot.slane %v2882_v22, 4  ;;  %v4149_v3 = vld [vmem:[%s4607_s30 + $0x60] sm:$0xe] }
 0x1f7   : > { %2448 = vst.msk [vmem:[#allocation2 + $0x1c] sm:$0xf] %vm2440_vm13, %v2359_v29  ;;  %2212 = vrot.lane.b32.xlu1 %v2149_v26, %s4487_s8  ;;  %v2673_v26 = vrot.slane %v2672_v5, 4  ;;  %v2695_v29 = vrot.slane %v2693_v7, 5  ;;  %v2707_v49 = vrot.slane %v2706_v35, 4  ;;  %v3176_v5 = vrot.slane %v3174_v57, 4 }
 0x1f8   : > { %2210 = vrot.lane.b32.xlu0 %v2146_v62, %s4487_s8  ;;  %v2692_v62 = vrot.slane %v2690_v6, 4  ;;  %v2865_v25 = vrot.slane %v2864_v27, 4  ;;  %v4174_v4 = vld [vmem:[%s4607_s30 + $0xc4] sm:$0xf]  ;;  %v4185_v9 = vrot.slane %v4149_v3, 9  ;;  %s175_s8 = sand.u32 1, %s4464_s13  }
 0x1f9   : > { %v2914_v56 = vpop.permute.xlu1 %2913  ;;  %v2678_v42 = vsel %vm4618_vm3, %v2673_v26, %v5886_v41  ;;  %v2888_v41 = vor.u32 %v2887_v38, %v2884_v19  ;;  %v4176_v38 = vld [vmem:[%s4607_s30 + $0xcc] sm:$0xe]  ;;  %s3798_s5 = scalar_lea.sflag [#allocation4], %s175_s8 }
 0x1fa   : > { %3006 = vst.msk [vmem:[#allocation2 + $0x10] sm:$0xf] %vm3001_vm14, %v2914_v56  ;;  %v2391_v40 = vpop.permute.xlu0 %2390  ;;  %v2709_v56 = vshll.u32 %v4106_v18, 16  ;;  %v2696_v43 = vor.u32 %v2695_v29, %v2692_v62  ;;  %v3233_v18 = vrot.slane %v4175_v10, 5  ;;  %v3175_v23 = vsel %vm4762_vm7, %v4185_v9, %v3174_v57  ;;  %v4152_v62 = vld [vmem:[%s4607_s30 + $0x6c] sm:$0xe] }
 0x1fb   : > { %2464 = vst.msk [vmem:[#allocation2 + $0x5c] sm:$0xf] %vm2440_vm13, %v2391_v40  ;;  %2370 = vrot.lane.b32.xlu1 %v4064_v33, %s4488_s9  ;;  %v2879_v33 = vrot.slane %v2877_v15, 5  ;;  %v2889_v0 = vrot.slane %v2888_v41, 4 }
 0x1fc   : > { %2368 = vrot.lane.b32.xlu0 %v4063_v36, %s4488_s9  ;;  %v2893_v36 = vrot.slane %v2891_v20, 5  ;;  %v2711_v48 = vrot.slane %v2709_v56, 5  ;;  %v2697_v55 = vrot.slane %v2696_v43, 4  ;;  %v4186_v56 = vrot.slane %v4152_v62, 9 }
 0x1fd   : > { %v2946_v50 = vpop.permute.xlu1 %2945  ;;  %v2880_v47 = vsel %vm4618_vm3, %v2875_v32, %v2879_v33 }
 0x1fe   : > { %3022 = vst.msk [vmem:[#allocation2 + $0x50] sm:$0xf] %vm3001_vm14, %v2946_v50  ;;  %v2916_v53 = vpop.permute.xlu0 %2915  ;;  %v2898_v50 = vor.u32 %v2897_v37, %v2893_v36  ;;  %v2702_v2 = vsel %vm4618_vm3, %v2697_v55, %v5913_v16  ;;  %v2894_v12 = vsel %vm4618_vm3, %v2889_v0, %v2893_v36  ;;  %v4178_v36 = vld [vmem:[%s4607_s30 + $0xd4] sm:$0x1] }
 0x1ff   : > { %3007 = vst.msk [vmem:[#allocation2 + $0x14] sm:$0xf] %vm3001_vm14, %v2916_v53  ;;  %2402 = vrot.lane.b32.xlu1 %v4080_v45, %s4488_s9  ;;  %v2870_v53 = vsel %vm4618_vm3, %v2865_v25, %v5901_v59  ;;  %v4151_v59 = vld [vmem:[%s4607_s30 + $0x68] sm:$0x1]  ;;  %v3240_v25 = vrot.slane %v4178_v36, 5 }
 0x200   : > { %2400 = vrot.lane.b32.xlu0 %v4079_v51, %s4488_s9  ;;  %v2901_v51 = vshll.u32 %v4130_v44, 16  ;;  %v2899_v39 = vrot.slane %v2898_v50, 4  ;;  %v3177_v6 = vrot.slane %v4151_v59, 5  ;;  %v3182_v44 = vsel %vm4762_vm7, %v4186_v56, %v3181_v21 }
 0x201   : > { %v2918_v46 = vpop.permute.xlu1 %2917 }
 0x202   : > { %3008 = vst.msk [vmem:[#allocation2 + $0x18] sm:$0xf] %vm3001_vm14, %v2918_v46  ;;  %v2948_v60 = vpop.permute.xlu0 %2947  ;;  %v2903_v61 = vrot.slane %v2901_v51, 5  ;;  %v3178_v17 = vsel %vm4762_vm7, %v3176_v5, %v3177_v6 }
 0x203   : > { %3023 = vst.msk [vmem:[#allocation2 + $0x54] sm:$0xf] %vm3001_vm14, %v2948_v60  ;;  %2374 = vrot.lane.b32.xlu1 %v4066_v58, %s4488_s9  ;;  %v2712_v58 = vsel %vm4618_vm3, %v2707_v49, %v2711_v48  ;;  %v3230_v60 = vrot.slane %v4174_v4, 5 }
 0x204   : > { %2372 = vrot.lane.b32.xlu0 %v4065_v1, %s4488_s9  ;;  %v2904_v7 = vsel %vm4618_vm3, %v2899_v39, %v2903_v61 }
 0x205   : > { %v2950_v24 = vpop.permute.xlu1 %2949  ;;  %v3232_v28 = vrot.slane %v3230_v60, 4 }
 0x206   : > { %3024 = vst.msk [vmem:[#allocation2 + $0x58] sm:$0xf] %vm3001_vm14, %v2950_v24  ;;  %v2920_v8 = vpop.permute.xlu0 %2919  ;;  %v4154_v24 = vld [vmem:[%s4607_s30 + $0x74] sm:$0x1] }
 0x207   : > { %3009 = vst.msk [vmem:[#allocation2 + $0x1c] sm:$0xf] %vm3001_vm14, %v2920_v8  ;;  %2406 = vrot.lane.b32.xlu1 %v4082_v13, %s4488_s9  ;;  %v4173_v13 = vld [vmem:[%s4607_s30 + $0xc0] sm:$0xe]  ;;  %v3234_v29 = vsel %vm4762_vm7, %v3232_v28, %v3233_v18  ;;  %v3183_v8 = vrot.slane %v3181_v21, 4 }
 0x208   : > { %2404 = vrot.lane.b32.xlu0 %v4081_v54, %s4488_s9  ;;  %v4193_v20 = vrot.slane %v4173_v13, 9  ;;  %v4177_v54 = vld [vmem:[%s4607_s30 + $0xd0] sm:$0xf]  ;;  %s3889_s9 = sshll.u32 %s175_s8, 4 }
 0x209   : > { %v3251_v40 = vpop.permute.xlu1 %3250  ;;  %v3237_v32 = vrot.slane %v4177_v54, 5  ;;  %s177_s23 = scalar_lea.vmem [#allocation3], %s3889_s9 }
 0x20a   : > { %3343 = vst.msk [vmem:[#allocation2 + $0x10] sm:$0xf] %vm3338_vm15, %v3251_v40  ;;  %v2952_v45 = vpop.permute.xlu0 %2951  ;;  %v3231_v35 = vsel %vm4762_vm7, %v4193_v20, %v3230_v60 }
 0x20b   : > { %3025 = vst.msk [vmem:[#allocation2 + $0x5c] sm:$0xf] %vm3001_vm14, %v2952_v45  ;;  %2931 = vrot.lane.b32.xlu1 %v2688_v31, %s4489_s26  ;;  %v3184_v31 = vrot.slane %v4154_v24, 5  ;;  %v4194_v45 = vrot.slane %v4176_v38, 9 }
 0x20c   : > { %2929 = vrot.lane.b32.xlu0 %v2678_v42, %s4489_s26  ;;  %v3239_v42 = vrot.slane %v3237_v32, 4 }
 0x20d   : > { %v3283_v30 = vpop.permute.xlu1 %3282  ;;  %v3185_v40 = vsel %vm4762_vm7, %v3183_v8, %v3184_v31  ;;  %v3238_v51 = vsel %vm4762_vm7, %v4194_v45, %v3237_v32 }
 0x20e   : > { %3359 = vst.msk [vmem:[#allocation2 + $0x50] sm:$0xf] %vm3338_vm15, %v3283_v30  ;;  %v3253_v52 = vpop.permute.xlu0 %3252  ;;  %v3241_v49 = vsel %vm4762_vm7, %v3239_v42, %v3240_v25 }
 0x20f   : > { %3344 = vst.msk [vmem:[#allocation2 + $0x14] sm:$0xf] %vm3338_vm15, %v3253_v52  ;;  %2963 = vrot.lane.b32.xlu1 %v2880_v47, %s4489_s26 }
 0x210   : > { %2961 = vrot.lane.b32.xlu0 %v2870_v53, %s4489_s26 }
 0x211   : > { %v3255_v1 = vpop.permute.xlu1 %3254 }
 0x212   : > { %3345 = vst.msk [vmem:[#allocation2 + $0x18] sm:$0xf] %vm3338_vm15, %v3255_v1  ;;  %v3285_v46 = vpop.permute.xlu0 %3284 }
 0x213   : > { %3360 = vst.msk [vmem:[#allocation2 + $0x54] sm:$0xf] %vm3338_vm15, %v3285_v46  ;;  %2935 = vrot.lane.b32.xlu1 %v2712_v58, %s4489_s26 }
 0x214   : > { %2933 = vrot.lane.b32.xlu0 %v2702_v2, %s4489_s26 }
 0x215   : > { %v3287_v11 = vpop.permute.xlu1 %3286 }
 0x216   : > { %3361 = vst.msk [vmem:[#allocation2 + $0x58] sm:$0xf] %vm3338_vm15, %v3287_v11  ;;  %v3257_v15 = vpop.permute.xlu0 %3256  ;;  %v4391_v16 = vld [vmem:[#allocation2 + $0x10] sm:$0xff]  }
 0x217   : > { %3346 = vst.msk [vmem:[#allocation2 + $0x1c] sm:$0xf] %vm3338_vm15, %v3257_v15  ;;  %2967 = vrot.lane.b32.xlu1 %v2904_v7, %s4489_s26  ;;  %4270 = vmatprep.mubr.bf16.mxu0 %v4391_v16 }
 0x218   : > { %2965 = vrot.lane.b32.xlu0 %v2894_v12, %s4489_s26  ;;  %s3814_s26 = sshll.u32 %s177_s23, 4  ;;  %s6100_s26 = int_to_ptr.vmem [resolvable:$true] %s3814_s26 }
 0x219   : > { %v2167_v22 = vpop.permute.xlu1 %2166  ;;  %s4404_s6 = scalar_lea.vmem %s6100_s26, 256  ;;  %p4411_p1 = scmp.lt.s32.totalorder %s6100_s26, %s4409_s15 }
 0x21a   : > { %2255 = vst.msk [vmem:[#allocation2 + $0x20] sm:$0xf] %vm2246_vm12, %v2167_v22  ;;  %v3289_v26 = vpop.permute.xlu0 %3288  ;;  %v4392_v27 = vld [vmem:[#allocation2 + $0x50] sm:$0xff]   ;;  %p4405_p12 = scmp.ne.s32.totalorder %s6100_s26, %s4404_s6  ;;  %p4412_p2 = scmp.lt.s32.totalorder %s4410_s11, %s4404_s6 }
 0x21b   : > { %3362 = vst.msk [vmem:[#allocation2 + $0x5c] sm:$0xf] %vm3338_vm15, %v3289_v26  ;;  %3268 = vrot.lane.b32.xlu1 %v3178_v17, %s4490_s18  ;;  %4286 = vmatprep.mubr.bf16.mxu1 %v4392_v27 }
 0x21c   : > { %3266 = vrot.lane.b32.xlu0 %v3175_v23, %s4490_s18  ;;  %p4406_p13 = pnand %p4405_p12, %p4552_p4  ;;  %p4413_p3 = por %p4412_p2, %p4411_p1 }
 0x21d   : > { %v2199_v33 = vpop.permute.xlu1 %2198 }
 0x21e   : > { %2271 = vst.msk [vmem:[#allocation2 + $0x60] sm:$0xf] %vm2246_vm12, %v2199_v33  ;;  %v2169_v37 = vpop.permute.xlu0 %2168  ;;  %v4393_v19 = vld [vmem:[#allocation2 + $0x18] sm:$0xff]   ;;  %p4407_p0 = pneg %p4406_p13 }
 0x21f   : > { %2256 = vst.msk [vmem:[#allocation2 + $0x24] sm:$0xf] %vm2246_vm12, %v2169_v37  ;;  %3300 = vrot.lane.b32.xlu1 %v3234_v29, %s4490_s18  ;;  %4271 = vmatmul.mubr.bf16.gmra.mxu0 %v4393_v19 }
 0x220   : > { %3298 = vrot.lane.b32.xlu0 %v3231_v35, %s4490_s18  ;;  %p4414_p5 = pnand %p4413_p3, %p4407_p0 }
 0x221   : > { %v2171_v43 = vpop.permute.xlu1 %2170 }
 0x222   : > { %2257 = vst.msk [vmem:[#allocation2 + $0x28] sm:$0xf] %vm2246_vm12, %v2171_v43  ;;  %v2201_v47 = vpop.permute.xlu0 %2200  ;;  %v4394_v48 = vld [vmem:[#allocation2 + $0x58] sm:$0xff]  }
 0x223   : > { %2272 = vst.msk [vmem:[#allocation2 + $0x64] sm:$0xf] %vm2246_vm12, %v2201_v47  ;;  %3272 = vrot.lane.b32.xlu1 %v3185_v40, %s4490_s18  ;;  %4287 = vmatmul.mubr.bf16.gmra.mxu1 %v4394_v48 }
 0x224   : > { %3270 = vrot.lane.b32.xlu0 %v3182_v44, %s4490_s18 }
 0x225   : > { %v2203_v50 = vpop.permute.xlu1 %2202 }
 0x226   : > { %2273 = vst.msk [vmem:[#allocation2 + $0x68] sm:$0xf] %vm2246_vm12, %v2203_v50  ;;  %v2173_v41 = vpop.permute.xlu0 %2172 }
 0x227   : > { %2258 = vst.msk [vmem:[#allocation2 + $0x2c] sm:$0xf] %vm2246_vm12, %v2173_v41  ;;  %3304 = vrot.lane.b32.xlu1 %v3241_v49, %s4490_s18 }
 0x228   : > { %3302 = vrot.lane.b32.xlu0 %v3238_v51, %s4490_s18 }
 0x229   : > { %v2361_v34 = vpop.permute.xlu1 %2360 }
 0x22a   : > { %2449 = vst.msk [vmem:[#allocation2 + $0x20] sm:$0xf] %vm2440_vm13, %v2361_v34  ;;  %v2205_v30 = vpop.permute.xlu0 %2204 }
 0x22b   : > { %2274 = vst.msk [vmem:[#allocation2 + $0x6c] sm:$0xf] %vm2246_vm12, %v2205_v30 }
 0x22d   : > { %v2393_v53 = vpop.permute.xlu1 %2392 }
 0x22e   : > { %2465 = vst.msk [vmem:[#allocation2 + $0x60] sm:$0xf] %vm2440_vm13, %v2393_v53  ;;  %v2363_v63 = vpop.permute.xlu0 %2362  ;;  %v6064_v53 = vld [vmem:[%s6145_s2] ss:$0 sm:$0xff] }
 0x22f   : > { %2450 = vst.msk [vmem:[#allocation2 + $0x24] sm:$0xf] %vm2440_vm13, %v2363_v63 }
 0x231   : > { %v2365_v55 = vpop.permute.xlu1 %2364 }
 0x232   : > { %2451 = vst.msk [vmem:[#allocation2 + $0x28] sm:$0xf] %vm2440_vm13, %v2365_v55  ;;  %v2395_v52 = vpop.permute.xlu0 %2394 }
 0x233   : > { %2466 = vst.msk [vmem:[#allocation2 + $0x64] sm:$0xf] %vm2440_vm13, %v2395_v52 }
 0x235   : > { %v2397_v57 = vpop.permute.xlu1 %2396 }
 0x236   : > { %2467 = vst.msk [vmem:[#allocation2 + $0x68] sm:$0xf] %vm2440_vm13, %v2397_v57  ;;  %v2367_v58 = vpop.permute.xlu0 %2366 }
 0x237   : > { %2452 = vst.msk [vmem:[#allocation2 + $0x2c] sm:$0xf] %vm2440_vm13, %v2367_v58 }
 0x239   : > { %v2922_v39 = vpop.permute.xlu1 %2921 }
 0x23a   : > { %3010 = vst.msk [vmem:[#allocation2 + $0x20] sm:$0xf] %vm3001_vm14, %v2922_v39  ;;  %v2399_v61 = vpop.permute.xlu0 %2398 }
 0x23b   : > { %2468 = vst.msk [vmem:[#allocation2 + $0x6c] sm:$0xf] %vm2440_vm13, %v2399_v61 }
 0x23d   : > { %v2954_v0 = vpop.permute.xlu1 %2953 }
 0x23e   : > { %3026 = vst.msk [vmem:[#allocation2 + $0x60] sm:$0xf] %vm3001_vm14, %v2954_v0  ;;  %v2924_v59 = vpop.permute.xlu0 %2923 }
 0x23f   : > { %3011 = vst.msk [vmem:[#allocation2 + $0x24] sm:$0xf] %vm3001_vm14, %v2924_v59 }
 0x241   : > { %v2926_v1 = vpop.permute.xlu1 %2925 }
 0x242   : > { %3012 = vst.msk [vmem:[#allocation2 + $0x28] sm:$0xf] %vm3001_vm14, %v2926_v1  ;;  %v2956_v2 = vpop.permute.xlu0 %2955 }
 0x243   : > { %3027 = vst.msk [vmem:[#allocation2 + $0x64] sm:$0xf] %vm3001_vm14, %v2956_v2 }
 0x245   : > { %v2958_v3 = vpop.permute.xlu1 %2957 }
 0x246   : > { %3028 = vst.msk [vmem:[#allocation2 + $0x68] sm:$0xf] %vm3001_vm14, %v2958_v3  ;;  %v2928_v4 = vpop.permute.xlu0 %2927 }
 0x247   : > { %3013 = vst.msk [vmem:[#allocation2 + $0x2c] sm:$0xf] %vm3001_vm14, %v2928_v4 }
 0x249   : > { %v3259_v46 = vpop.permute.xlu1 %3258 }
 0x24a   : > { %3347 = vst.msk [vmem:[#allocation2 + $0x20] sm:$0xf] %vm3338_vm15, %v3259_v46  ;;  %v2960_v5 = vpop.permute.xlu0 %2959 }
 0x24b   : > { %3029 = vst.msk [vmem:[#allocation2 + $0x6c] sm:$0xf] %vm3001_vm14, %v2960_v5 }
 0x24d   : > { %v3291_v6 = vpop.permute.xlu1 %3290 }
 0x24e   : > { %3363 = vst.msk [vmem:[#allocation2 + $0x60] sm:$0xf] %vm3338_vm15, %v3291_v6  ;;  %v3261_v7 = vpop.permute.xlu0 %3260 }
 0x24f   : > { %3348 = vst.msk [vmem:[#allocation2 + $0x24] sm:$0xf] %vm3338_vm15, %v3261_v7 }
 0x251   : > { %v3263_v9 = vpop.permute.xlu1 %3262 }
 0x252   : > { %3349 = vst.msk [vmem:[#allocation2 + $0x28] sm:$0xf] %vm3338_vm15, %v3263_v9  ;;  %v3293_v10 = vpop.permute.xlu0 %3292 }
 0x253   : > { %3364 = vst.msk [vmem:[#allocation2 + $0x64] sm:$0xf] %vm3338_vm15, %v3293_v10 }
 0x255   : > { %v3295_v60 = vpop.permute.xlu1 %3294 }
 0x256   : > { %3365 = vst.msk [vmem:[#allocation2 + $0x68] sm:$0xf] %vm3338_vm15, %v3295_v60  ;;  %v3265_v11 = vpop.permute.xlu0 %3264  ;;  %v4395_v12 = vld [vmem:[#allocation2 + $0x20] sm:$0xff]  }
 0x257   : > { %3350 = vst.msk [vmem:[#allocation2 + $0x2c] sm:$0xf] %vm3338_vm15, %v3265_v11  ;;  %4274 = vmatprep.mubr.bf16.mxu0 %v4395_v12 }
 0x259   : > { %v1876_v13 = vpop.permute.xlu1 %1875 }
 0x25a   : > { %1941 = vst.msk [vmem:[#allocation2 + $0x7c] sm:$0xf] %vm1909_vm11, %v1876_v13  ;;  %v3297_v14 = vpop.permute.xlu0 %3296  ;;  %v4396_v15 = vld [vmem:[#allocation2 + $0x60] sm:$0xff]  }
 0x25b   : > { %3366 = vst.msk [vmem:[#allocation2 + $0x6c] sm:$0xf] %vm3338_vm15, %v3297_v14  ;;  %4290 = vmatprep.mubr.bf16.mxu1 %v4396_v15 }
 0x25d   : > { %v2177_v16 = vpop.permute.xlu1 %2176 }
 0x25e   : > { %2260 = vst.msk [vmem:[#allocation2 + $0x34] sm:$0xf] %vm2246_vm12, %v2177_v16  ;;  %v2175_v17 = vpop.permute.xlu0 %2174  ;;  %v4397_v28 = vld [vmem:[#allocation2 + $0x28] sm:$0xff]  }
 0x25f   : > { %2259 = vst.msk [vmem:[#allocation2 + $0x30] sm:$0xf] %vm2246_vm12, %v2175_v17  ;;  %4275 = vmatmul.mubr.bf16.gmra.mxu0 %v4397_v28 }
 0x261   : > { %v2209_v18 = vpop.permute.xlu1 %2208 }
 0x262   : > { %2276 = vst.msk [vmem:[#allocation2 + $0x74] sm:$0xf] %vm2246_vm12, %v2209_v18  ;;  %v2207_v20 = vpop.permute.xlu0 %2206  ;;  %v4398_v21 = vld [vmem:[#allocation2 + $0x68] sm:$0xff]  }
 0x263   : > { %2275 = vst.msk [vmem:[#allocation2 + $0x70] sm:$0xf] %vm2246_vm12, %v2207_v20  ;;  %4291 = vmatmul.mubr.bf16.gmra.mxu1 %v4398_v21 }
 0x265   : > { %v2181_v22 = vpop.permute.xlu1 %2180 }
 0x266   : > { %2262 = vst.msk [vmem:[#allocation2 + $0x3c] sm:$0xf] %vm2246_vm12, %v2181_v22  ;;  %v2179_v23 = vpop.permute.xlu0 %2178 }
 0x267   : > { %2261 = vst.msk [vmem:[#allocation2 + $0x38] sm:$0xf] %vm2246_vm12, %v2179_v23 }
 0x269   : > { %v2213_v24 = vpop.permute.xlu1 %2212 }
 0x26a   : > { %2278 = vst.msk [vmem:[#allocation2 + $0x7c] sm:$0xf] %vm2246_vm12, %v2213_v24  ;;  %v2211_v54 = vpop.permute.xlu0 %2210 }
 0x26b   : > { %2277 = vst.msk [vmem:[#allocation2 + $0x78] sm:$0xf] %vm2246_vm12, %v2211_v54 }
 0x26d   : > { %v2371_v26 = vpop.permute.xlu1 %2370 }
 0x26e   : > { %2454 = vst.msk [vmem:[#allocation2 + $0x34] sm:$0xf] %vm2440_vm13, %v2371_v26  ;;  %v2369_v27 = vpop.permute.xlu0 %2368 }
 0x26f   : > { %2453 = vst.msk [vmem:[#allocation2 + $0x30] sm:$0xf] %vm2440_vm13, %v2369_v27 }
 0x271   : > { %v2403_v62 = vpop.permute.xlu1 %2402 }
 0x272   : > { %2470 = vst.msk [vmem:[#allocation2 + $0x74] sm:$0xf] %vm2440_vm13, %v2403_v62  ;;  %v2401_v29 = vpop.permute.xlu0 %2400 }
 0x273   : > { %2469 = vst.msk [vmem:[#allocation2 + $0x70] sm:$0xf] %vm2440_vm13, %v2401_v29 }
 0x275   : > { %v2375_v8 = vpop.permute.xlu1 %2374 }
 0x276   : > { %2456 = vst.msk [vmem:[#allocation2 + $0x3c] sm:$0xf] %vm2440_vm13, %v2375_v8  ;;  %v2373_v31 = vpop.permute.xlu0 %2372 }
 0x277   : > { %2455 = vst.msk [vmem:[#allocation2 + $0x38] sm:$0xf] %vm2440_vm13, %v2373_v31 }
 0x279   : > { %v2407_v32 = vpop.permute.xlu1 %2406 }
 0x27a   : > { %2472 = vst.msk [vmem:[#allocation2 + $0x7c] sm:$0xf] %vm2440_vm13, %v2407_v32  ;;  %v2405_v33 = vpop.permute.xlu0 %2404 }
 0x27b   : > { %2471 = vst.msk [vmem:[#allocation2 + $0x78] sm:$0xf] %vm2440_vm13, %v2405_v33 }
 0x27d   : > { %v2932_v35 = vpop.permute.xlu1 %2931 }
 0x27e   : > { %3015 = vst.msk [vmem:[#allocation2 + $0x34] sm:$0xf] %vm3001_vm14, %v2932_v35  ;;  %v2930_v56 = vpop.permute.xlu0 %2929 }
 0x27f   : > { %3014 = vst.msk [vmem:[#allocation2 + $0x30] sm:$0xf] %vm3001_vm14, %v2930_v56 }
 0x281   : > { %v2964_v36 = vpop.permute.xlu1 %2963 }
 0x282   : > { %3031 = vst.msk [vmem:[#allocation2 + $0x74] sm:$0xf] %vm3001_vm14, %v2964_v36  ;;  %v2962_v37 = vpop.permute.xlu0 %2961 }
 0x283   : > { %3030 = vst.msk [vmem:[#allocation2 + $0x70] sm:$0xf] %vm3001_vm14, %v2962_v37 }
 0x285   : > { %v2936_v19 = vpop.permute.xlu1 %2935 }
 0x286   : > { %3017 = vst.msk [vmem:[#allocation2 + $0x3c] sm:$0xf] %vm3001_vm14, %v2936_v19  ;;  %v2934_v38 = vpop.permute.xlu0 %2933 }
 0x287   : > { %3016 = vst.msk [vmem:[#allocation2 + $0x38] sm:$0xf] %vm3001_vm14, %v2934_v38 }
 0x289   : > { %v2968_v40 = vpop.permute.xlu1 %2967 }
 0x28a   : > { %3033 = vst.msk [vmem:[#allocation2 + $0x7c] sm:$0xf] %vm3001_vm14, %v2968_v40  ;;  %v2966_v42 = vpop.permute.xlu0 %2965 }
 0x28b   : > { %3032 = vst.msk [vmem:[#allocation2 + $0x78] sm:$0xf] %vm3001_vm14, %v2966_v42 }
 0x28d   : > { %v3269_v25 = vpop.permute.xlu1 %3268 }
 0x28e   : > { %3352 = vst.msk [vmem:[#allocation2 + $0x34] sm:$0xf] %vm3338_vm15, %v3269_v25  ;;  %v3267_v43 = vpop.permute.xlu0 %3266 }
 0x28f   : > { %3351 = vst.msk [vmem:[#allocation2 + $0x30] sm:$0xf] %vm3338_vm15, %v3267_v43 }
 0x291   : > { %v3301_v44 = vpop.permute.xlu1 %3300 }
 0x292   : > { %3368 = vst.msk [vmem:[#allocation2 + $0x74] sm:$0xf] %vm3338_vm15, %v3301_v44  ;;  %v3299_v45 = vpop.permute.xlu0 %3298 }
 0x293   : > { %3367 = vst.msk [vmem:[#allocation2 + $0x70] sm:$0xf] %vm3338_vm15, %v3299_v45 }
 0x295   : > { %v3273_v47 = vpop.permute.xlu1 %3272 }
 0x296   : > { %3354 = vst.msk [vmem:[#allocation2 + $0x3c] sm:$0xf] %vm3338_vm15, %v3273_v47  ;;  %v3271_v48 = vpop.permute.xlu0 %3270  ;;  %v4399_v49 = vld [vmem:[#allocation2 + $0x30] sm:$0xff]  }
 0x297   : > { %3353 = vst.msk [vmem:[#allocation2 + $0x38] sm:$0xf] %vm3338_vm15, %v3271_v48  ;;  %4278 = vmatprep.mubr.bf16.mxu0 %v4399_v49 }
 0x299   : > { %v3305_v50 = vpop.permute.xlu1 %3304 }
 0x29a   : > { %3370 = vst.msk [vmem:[#allocation2 + $0x7c] sm:$0xf] %vm3338_vm15, %v3305_v50  ;;  %v3303_v51 = vpop.permute.xlu0 %3302  ;;  %v4400_v41 = vld [vmem:[#allocation2 + $0x70] sm:$0xff]  }
 0x29b   : > { %3369 = vst.msk [vmem:[#allocation2 + $0x78] sm:$0xf] %vm3338_vm15, %v3303_v51  ;;  %4294 = vmatprep.mubr.bf16.mxu1 %v4400_v41 }
 0x29e   : > { %v4401_v34 = vld [vmem:[#allocation2 + $0x38] sm:$0xff]  }
 0x29f   : > { %v4268_v30 = vpop.f32.mrf.mxu0  ;;  %4279 = vmatmul.mubr.bf16.gmra.mxu0 %v4401_v34 }
 0x2a0   : > { %v3613_v3 = vadd.f32 %v4268_v30, %v6064_v53 }
 0x2a1   : > { %v3604_v63 = vpop.f32.mrf.mxu0 }
 0x2a2   : > { %v4402_v55 = vld [vmem:[#allocation2 + $0x78] sm:$0xff]   ;;  %v3605_v52 = vadd.f32 %v6064_v53, %v3604_v63 }
 0x2a3   : > { %v4269_v57 = vpop.f32.mrf.mxu0  ;;  %v4284_v58 = vpop.f32.mrf.mxu1  ;;  %4295 = vmatmul.mubr.bf16.gmra.mxu1 %v4402_v55 }
 0x2a4   : > { %3731 = vxpose.xlu0.b32.start [1/16] (narrow) %v3605_v52, 8  ;;  %v3616_v46 = vadd.f32 %v4269_v57, %v6064_v53  ;;  %v3677_v5 = vadd.f32 %v4284_v58, %v6064_v53 }
 0x2a5   : > { %v3607_v39 = vpop.f32.mrf.mxu0  ;;  %v3668_v61 = vpop.f32.mrf.mxu1 }
 0x2a6   : > { %v3608_v0 = vadd.f32 %v6064_v53, %v3607_v39  ;;  %v3669_v59 = vadd.f32 %v6064_v53, %v3668_v61 }
 0x2a7   : > { %v4285_v1 = vpop.f32.mrf.mxu1 }
 0x2a8   : > { %3763 = vxpose.xlu1.b32.start [1/16] (narrow) %v3669_v59, 8  ;;  %3732 = vxpose.xlu0.b32.cont [2/16] (narrow) %v3608_v0, 8  ;;  %v3680_v6 = vadd.f32 %v4285_v1, %v6064_v53 }
 0x2a9   : > { %v3671_v2 = vpop.f32.mrf.mxu1 }
 0x2aa   : > { %v3672_v4 = vadd.f32 %v6064_v53, %v3671_v2 }
 0x2ac   : > { %3764 = vxpose.xlu1.b32.cont [2/16] (narrow) %v3672_v4, 8  ;;  %3733 = vxpose.xlu0.b32.cont [3/16] (narrow) %v3613_v3, 8 }
 0x2b0   : > { %3765 = vxpose.xlu1.b32.cont [3/16] (narrow) %v3677_v5, 8  ;;  %3734 = vxpose.xlu0.b32.cont [4/16] (narrow) %v3616_v46, 8 }
 0x2b4   : > { %3766 = vxpose.xlu1.b32.cont [4/16] (narrow) %v3680_v6, 8 }
 0x2df   : > { %v4272_v7 = vpop.f32.mrf.mxu0 }
 0x2e0   : > { %v3629_v28 = vadd.f32 %v4272_v7, %v6064_v53 }
 0x2e1   : > { %v3620_v9 = vpop.f32.mrf.mxu0 }
 0x2e2   : > { %v3621_v10 = vadd.f32 %v6064_v53, %v3620_v9 }
 0x2e3   : > { %v4273_v60 = vpop.f32.mrf.mxu0  ;;  %v4288_v11 = vpop.f32.mrf.mxu1 }
 0x2e4   : > { %3735 = vxpose.xlu0.b32.cont [5/16] (narrow) %v3621_v10, 8  ;;  %v3632_v20 = vadd.f32 %v4273_v60, %v6064_v53  ;;  %v3693_v21 = vadd.f32 %v4288_v11, %v6064_v53 }
 0x2e5   : > { %v3623_v12 = vpop.f32.mrf.mxu0  ;;  %v3684_v13 = vpop.f32.mrf.mxu1 }
 0x2e6   : > { %v3624_v14 = vadd.f32 %v6064_v53, %v3623_v12  ;;  %v3685_v15 = vadd.f32 %v6064_v53, %v3684_v13 }
 0x2e7   : > { %v4289_v16 = vpop.f32.mrf.mxu1 }
 0x2e8   : > { %3767 = vxpose.xlu1.b32.cont [5/16] (narrow) %v3685_v15, 8  ;;  %3736 = vxpose.xlu0.b32.cont [6/16] (narrow) %v3624_v14, 8  ;;  %v3696_v22 = vadd.f32 %v4289_v16, %v6064_v53 }
 0x2e9   : > { %v3687_v17 = vpop.f32.mrf.mxu1 }
 0x2ea   : > { %v3688_v18 = vadd.f32 %v6064_v53, %v3687_v17 }
 0x2ec   : > { %3768 = vxpose.xlu1.b32.cont [6/16] (narrow) %v3688_v18, 8  ;;  %3737 = vxpose.xlu0.b32.cont [7/16] (narrow) %v3629_v28, 8 }
 0x2f0   : > { %3769 = vxpose.xlu1.b32.cont [7/16] (narrow) %v3693_v21, 8  ;;  %3738 = vxpose.xlu0.b32.cont [8/16] (narrow) %v3632_v20, 8 }
 0x2f4   : > { %3770 = vxpose.xlu1.b32.cont [8/16] (narrow) %v3696_v22, 8 }
 0x31f   : > { %v4276_v23 = vpop.f32.mrf.mxu0 }
 0x320   : > { %v3645_v35 = vadd.f32 %v4276_v23, %v6064_v53 }
 0x321   : > { %v3636_v24 = vpop.f32.mrf.mxu0 }
 0x322   : > { %v3637_v54 = vadd.f32 %v6064_v53, %v3636_v24 }
 0x323   : > { %v4277_v26 = vpop.f32.mrf.mxu0  ;;  %v4292_v27 = vpop.f32.mrf.mxu1 }
 0x324   : > { %3739 = vxpose.xlu0.b32.cont [9/16] (narrow) %v3637_v54, 8  ;;  %v3648_v36 = vadd.f32 %v4277_v26, %v6064_v53  ;;  %v3709_v37 = vadd.f32 %v4292_v27, %v6064_v53 }
 0x325   : > { %v3639_v62 = vpop.f32.mrf.mxu0  ;;  %v3700_v29 = vpop.f32.mrf.mxu1 }
 0x326   : > { %v3640_v8 = vadd.f32 %v6064_v53, %v3639_v62  ;;  %v3701_v31 = vadd.f32 %v6064_v53, %v3700_v29 }
 0x327   : > { %v4293_v32 = vpop.f32.mrf.mxu1 }
 0x328   : > { %3771 = vxpose.xlu1.b32.cont [9/16] (narrow) %v3701_v31, 8  ;;  %3740 = vxpose.xlu0.b32.cont [10/16] (narrow) %v3640_v8, 8  ;;  %v3712_v19 = vadd.f32 %v4293_v32, %v6064_v53 }
 0x329   : > { %v3703_v33 = vpop.f32.mrf.mxu1 }
 0x32a   : > { %v3704_v56 = vadd.f32 %v6064_v53, %v3703_v33 }
 0x32c   : > { %3772 = vxpose.xlu1.b32.cont [10/16] (narrow) %v3704_v56, 8  ;;  %3741 = vxpose.xlu0.b32.cont [11/16] (narrow) %v3645_v35, 8 }
 0x330   : > { %3773 = vxpose.xlu1.b32.cont [11/16] (narrow) %v3709_v37, 8  ;;  %3742 = vxpose.xlu0.b32.cont [12/16] (narrow) %v3648_v36, 8 }
 0x334   : > { %3774 = vxpose.xlu1.b32.cont [12/16] (narrow) %v3712_v19, 8 }
 0x35f   : > { %v4280_v38 = vpop.f32.mrf.mxu0 }
 0x360   : > { %v3661_v51 = vadd.f32 %v4280_v38, %v6064_v53 }
 0x361   : > { %v3652_v40 = vpop.f32.mrf.mxu0 }
 0x362   : > { %v3653_v42 = vadd.f32 %v6064_v53, %v3652_v40 }
 0x363   : > { %v4281_v25 = vpop.f32.mrf.mxu0  ;;  %v4296_v43 = vpop.f32.mrf.mxu1 }
 0x364   : > { %3743 = vxpose.xlu0.b32.cont [13/16] (narrow) %v3653_v42, 8  ;;  %v3664_v34 = vadd.f32 %v4281_v25, %v6064_v53  ;;  %v3725_v30 = vadd.f32 %v4296_v43, %v6064_v53 }
 0x365   : > { %v3655_v44 = vpop.f32.mrf.mxu0  ;;  %v3716_v45 = vpop.f32.mrf.mxu1 }
 0x366   : > { %v3656_v47 = vadd.f32 %v6064_v53, %v3655_v44  ;;  %v3717_v48 = vadd.f32 %v6064_v53, %v3716_v45 }
 0x367   : > { %v4297_v49 = vpop.f32.mrf.mxu1 }
 0x368   : > { %3775 = vxpose.xlu1.b32.cont [13/16] (narrow) %v3717_v48, 8  ;;  %3744 = vxpose.xlu0.b32.cont [14/16] (narrow) %v3656_v47, 8  ;;  %v3728_v63 = vadd.f32 %v4297_v49, %v6064_v53 }
 0x369   : > { %v3719_v50 = vpop.f32.mrf.mxu1 }
 0x36a   : > { %v3720_v41 = vadd.f32 %v6064_v53, %v3719_v50 }
 0x36c   : > { %3776 = vxpose.xlu1.b32.cont [14/16] (narrow) %v3720_v41, 8  ;;  %3745 = vxpose.xlu0.b32.cont [15/16] (narrow) %v3661_v51, 8 }
 0x370   : > { %3777 = vxpose.xlu1.b32.cont [15/16] (narrow) %v3725_v30, 8  ;;  %3746 = vxpose.xlu0.b32.end [16/16] (narrow) %v3664_v34, 8 }
 0x374   : > { %3778 = vxpose.xlu1.b32.end [16/16] (narrow) %v3728_v63, 8 }
 0x3b0   : > { %v3747_v55 = vpop.trf.xlu0 }
 0x3b1   : > { %3795 = vst [vmem:[%s177_s23] sm:$0xff] %v3747_v55 }
 0x3b4   : > { %v3779_v52 = vpop.trf.xlu1 }
 0x3b5   : > { %3796 = vst [vmem:[%s177_s23 + $0x8] sm:$0xff] %v3779_v52 }
 0x3b6   : > { %4417 = shalt.err (!%p4414_p5)
}
 0x3b7   : > { %s4418_s18 = scalar_lea.hbm %s3812_s4, 256  ;;  %s4422_s30 = scalar_lea.hbm %s6146_s3, 512 }
 0x3b8   : > { %p4419_p6 = scmp.ne.s32.totalorder %s3812_s4, %s4418_s18  ;;  %p4423_p10 = scmp.lt.s32.totalorder %s3812_s4, %s6146_s3 }
 0x3b9   : > { %p4424_p11 = scmp.lt.s32.totalorder %s4422_s30, %s4418_s18 }
 0x3ba   : > { %p4420_p7 = pnand %p4419_p6, %p4552_p4 }
 0x3bb   : > { %p4425_p12 = por %p4424_p11, %p4423_p10 }
 0x3bc   : > { %p4421_p9 = pneg %p4420_p7 }
 0x3be   : > { %p4426_p13 = pnand %p4425_p12, %p4421_p9 }
 0x3c0   : > { %4429 = shalt.err (!%p4426_p13)
}
 0x3c1   : > { %4315 = dma.vmem_to_hbm [thread:$0]  (%p4552_p4), %s6100_s26, 256, %s3812_s4, %s3798_s5  }
 0x3c2 PF: > { %p4321_p0 = scmp.ge.s32.totalorder %s4480_s17, 2  ;;  %s3826_s9 = sand.u32 1, %s4460_s12  }
 0x3c3   : > { %s3827_s23 = scalar_lea.sflag [#allocation4], %s3826_s9 }
 0x3c4   : > { %p4318_p1 = pnand %p4321_p0, %p4559_p8 }
 0x3c6   : > { %p4319_p2 = pneg %p4318_p1 }
 0x3c8   : > { %4455 = dma.done.wait (%p4319_p2), %s3827_s23, 256  }
 0x3c9   : > { %4457 = vsyncadd (%p4319_p2), %s3827_s23, 4294967040  ;;  %s16_s17 = sadd.s32 1, %s4480_s17   ;;  %s6153_s12 = smov %s4464_s13 }
 0x3ca   : > { %p13_p3 = scmp.ge.s32.totalorder %s16_s17, 4   ;;  %s6154_s13 = smov %s4468_s14 }
 0x3cb   : > { %s6155_s14 = smov %s4565_s25  ;;  %s6156_s15 = smov %s4476_s16 }
 0x3cc   : > { %s6157_s16 = smov %s6159_s20  ;;  %15 = sbr.rel (!%p13_p3) target bundleno = 4 (0x4), region = 69 }
 0x3d1   :  { %3832 = vsyncpa [#allocation4], 1 }
 0x3d2   :  { %3834 = vsyncpa [#allocation4 + $0x1], 1 }

</bundles_post_ra>
